<compile_context>
chip_gen: v7x
topology: tpu7x:2x2x1
jax: 0.10.0
libtpu: 0.0.40
codegen_flags: <defaults>
</compile_context>

<pallas_src>
import functools

import jax
import jax.numpy as jnp
import numpy as np
from jax import lax
from jax.experimental import pallas as pl
from jax.experimental.pallas import tpu as pltpu


# ----------------------------------------------------------------------------
# Wrapper-side helpers (trace-time only; static slices, no gathers)
# ----------------------------------------------------------------------------
def _im2col_static(x_nhwc, kh, kw, stride):
    """im2col via static strided slices (lowers to cheap XLA slices)."""
    B, H, W, C = x_nhwc.shape
    oh = (H - kh) // stride + 1
    ow = (W - kw) // stride + 1
    cols = []
    for dh in range(kh):
        for dw in range(kw):
            sl = x_nhwc[:, dh:dh + stride * (oh - 1) + 1:stride,
                           dw:dw + stride * (ow - 1) + 1:stride, :]  # (B,oh,ow,C)
            cols.append(sl)
    p = jnp.stack(cols, axis=3)                       # (B, oh, ow, kh*kw, C)
    return p.reshape(B * oh * ow, kh * kw * C), oh, ow


def _conv_select(bb, ih, iw, kh, kw, stride):
    """Constant 0/1 row-selection matrices, one per kernel offset.

    S[t, p_out, p_in] = 1 selects input row (b, s*i+dh, s*j+dw) for output row
    (b, i, j); rows are (batch, h, w) row-major within a batch block of bb.
    """
    oh = (ih - kh) // stride + 1
    ow = (iw - kw) // stride + 1
    S = np.zeros((kh * kw, bb * oh * ow, bb * ih * iw), np.float32)
    for dh in range(kh):
        for dw in range(kw):
            t = dh * kw + dw
            for b in range(bb):
                for i in range(oh):
                    for j in range(ow):
                        po = b * oh * ow + i * ow + j
                        pi = b * ih * iw + (stride * i + dh) * iw + (stride * j + dw)
                        S[t, po, pi] = 1.0
    return S, oh, ow


def _flatten_select(bb, q):
    """S[t, b, b*q + t] = 1 : picks spatial position t of every batch row."""
    S = np.zeros((q, bb, bb * q), np.float32)
    for t in range(q):
        for b in range(bb):
            S[t, b, b * q + t] = 1.0
    return S


# ----------------------------------------------------------------------------
# Fused Pallas kernel: conv1 + conv2 + conv3 + fc1 + fc2 (+ softmax)
# ----------------------------------------------------------------------------
def _fused_forward_kernel(p1_ref, w1_ref, b1_ref,
                          s2_ref, w2_ref, b2_ref,
                          s3_ref, w3_ref, b3_ref,
                          s4_ref, w4_ref, b4_ref,
                          w5_ref, b5_ref,
                          o_ref, *,
                          compute_dtype, apply_softmax, approx_recip):
    cd = compute_dtype
    f32 = jnp.float32

    def mm(a, b):
        return jnp.dot(a, b, preferred_element_type=f32)

    # ---- conv1: matmul on pre-extracted patches ----------------------------
    a1 = jnp.maximum(mm(p1_ref[...], w1_ref[...]) + b1_ref[...], 0.0)
    a1 = a1.astype(cd)                                   # (bb*oh1*ow1, 32)

    # ---- conv2: sum over 16 kernel offsets; row gather via selection matmul
    acc2 = mm(mm(s2_ref[0], a1).astype(cd), w2_ref[0])
    for t in range(1, s2_ref.shape[0]):
        acc2 = acc2 + mm(mm(s2_ref[t], a1).astype(cd), w2_ref[t])
    a2 = jnp.maximum(acc2 + b2_ref[...], 0.0).astype(cd)  # (bb*oh2*ow2, 64)

    # ---- conv3: sum over 9 kernel offsets -----------------------------------
    acc3 = mm(mm(s3_ref[0], a2).astype(cd), w3_ref[0])
    for t in range(1, s3_ref.shape[0]):
        acc3 = acc3 + mm(mm(s3_ref[t], a2).astype(cd), w3_ref[t])
    a3 = jnp.maximum(acc3 + b3_ref[...], 0.0).astype(cd)  # (bb*oh3*ow3, 64)

    # ---- fc1: NCHW flatten folded into per-spatial-position weight blocks ---
    n_q = s4_ref.shape[0]
    if n_q == 1:
        acc4 = mm(a3, w4_ref[0])
    else:
        acc4 = mm(mm(s4_ref[0], a3).astype(cd), w4_ref[0])
        for q in range(1, n_q):
            acc4 = acc4 + mm(mm(s4_ref[q], a3).astype(cd), w4_ref[q])
    h = jnp.maximum(acc4 + b4_ref[...], 0.0).astype(cd)   # (bb, 256)

    # ---- fc2 (+ optional softmax) -------------------------------------------
    logits = mm(h, w5_ref[...]) + b5_ref[...]              # (bb, out), f32
    if apply_softmax:
        z = logits - jnp.max(logits, axis=-1, keepdims=True)
        e = jnp.exp(z)
        denom = jnp.sum(e, axis=-1, keepdims=True)
        if approx_recip:
            out = e * pl.reciprocal(denom, approx=True)
        else:
            out = e / denom
    else:
        out = logits
    o_ref[...] = out.astype(o_ref.dtype)


# ----------------------------------------------------------------------------
# Forward wrapper (single pallas_call)
# ----------------------------------------------------------------------------
def shapley_estimator_forward(params, x_nchw, apply_softmax=True,
                              use_bf16=True, batch_block=None):
    x = jnp.transpose(x_nchw.astype(jnp.float32), (0, 2, 3, 1))  # NCHW -> NHWC
    B, H, W, C = x.shape
    cd = jnp.bfloat16 if use_bf16 else jnp.float32

    bb = B if batch_block is None else batch_block
    assert B % bb == 0, "batch must be divisible by batch_block"
    nb = B // bb

    # conv1 im2col (static strided slices; no gather)
    patches1, oh1, ow1 = _im2col_static(x, 8, 8, 4)          # (B*oh1*ow1, 64*C)
    q1 = oh1 * ow1
    k1 = 8 * 8 * C

    # constant selection matrices for the in-kernel layers
    S2_np, oh2, ow2 = _conv_select(bb, oh1, ow1, 4, 4, 2)
    S3_np, oh3, ow3 = _conv_select(bb, oh2, ow2, 3, 3, 1)
    q2 = oh2 * ow2
    q3 = oh3 * ow3
    S4_np = _flatten_select(bb, q3)

    # weight re-blocking (wrapper side, done once under jit)
    w1r = params["w1"].reshape(k1, 32)
    w2r = params["w2"].reshape(16, 32, 64)
    w3r = params["w3"].reshape(9, 64, 64)
    flat = params["w4"].shape[0]
    assert flat == 64 * q3, "fc1 weight does not match conv output size"
    # PyTorch flattens NCHW -> row index c*q3 + q ; re-block per spatial pos q.
    w4q = jnp.transpose(params["w4"].reshape(64, q3, 256), (1, 0, 2))  # (q3,64,256)
    w5 = params["w5"]
    out_n = w5.shape[1]

    def c(v):
        return jnp.asarray(v).astype(cd)

    def bias(v):
        return jnp.asarray(v).reshape(1, -1).astype(jnp.float32)

    args = (
        c(patches1), c(w1r), bias(params["b1"]),
        c(S2_np),    c(w2r), bias(params["b2"]),
        c(S3_np),    c(w3r), bias(params["b3"]),
        c(S4_np),    c(w4q), bias(params["b4"]),
        c(w5),               bias(params["b5"]),
    )

    in_specs = [
        pl.BlockSpec((bb * q1, k1), lambda i: (i, 0)),
        pl.BlockSpec((k1, 32), lambda i: (0, 0)),
        pl.BlockSpec((1, 32), lambda i: (0, 0)),
        pl.BlockSpec((16, bb * q2, bb * q1), lambda i: (0, 0, 0)),
        pl.BlockSpec((16, 32, 64), lambda i: (0, 0, 0)),
        pl.BlockSpec((1, 64), lambda i: (0, 0)),
        pl.BlockSpec((9, bb * q3, bb * q2), lambda i: (0, 0, 0)),
        pl.BlockSpec((9, 64, 64), lambda i: (0, 0, 0)),
        pl.BlockSpec((1, 64), lambda i: (0, 0)),
        pl.BlockSpec((q3, bb, bb * q3), lambda i: (0, 0, 0)),
        pl.BlockSpec((q3, 64, 256), lambda i: (0, 0, 0)),
        pl.BlockSpec((1, 256), lambda i: (0, 0)),
        pl.BlockSpec((256, out_n), lambda i: (0, 0)),
        pl.BlockSpec((1, out_n), lambda i: (0, 0)),
    ]
    out_spec = pl.BlockSpec((bb, out_n), lambda i: (i, 0))

    kernel = functools.partial(
        _fused_forward_kernel,
        compute_dtype=cd,
        apply_softmax=apply_softmax,
        approx_recip=use_bf16,
    )

    return pl.pallas_call(
        kernel,
        out_shape=jax.ShapeDtypeStruct((B, out_n), jnp.float32),
        grid=(nb,),
        in_specs=in_specs,
        out_specs=out_spec,
        compiler_params=pltpu.CompilerParams(
            dimension_semantics=("parallel",)),   # shards batch blocks on v7x
    )(*args)


# ----------------------------------------------------------------------------
# Parameter init (deterministic, PyTorch-default-like uniform bounds)
# ----------------------------------------------------------------------------
def _conv_out_sizes(h, w):
    oh1, ow1 = (h - 8) // 4 + 1, (w - 8) // 4 + 1
    oh2, ow2 = (oh1 - 4) // 2 + 1, (ow1 - 4) // 2 + 1
    oh3, ow3 = oh2 - 3 + 1, ow2 - 3 + 1
    return oh3, ow3


def init_params(key, input_size, output_size):
    c, h, w = input_size
    ks = jax.random.split(key, 10)

    def u(k, shape, fan_in):
        bound = 1.0 / np.sqrt(fan_in)
        return jax.random.uniform(k, shape, jnp.float32, -bound, bound)

    oh3, ow3 = _conv_out_sizes(h, w)
    flat = 64 * oh3 * ow3

    return {
        "w1": u(ks[0], (8, 8, c, 32), c * 8 * 8),
        "b1": u(ks[1], (32,), c * 8 * 8),
        "w2": u(ks[2], (4, 4, 32, 64), 32 * 4 * 4),
        "b2": u(ks[3], (64,), 32 * 4 * 4),
        "w3": u(ks[4], (3, 3, 64, 64), 64 * 3 * 3),
        "b3": u(ks[5], (64,), 64 * 3 * 3),
        "w4": u(ks[6], (flat, 256), flat),
        "b4": u(ks[7], (256,), flat),
        "w5": u(ks[8], (256, output_size), 256),
        "b5": u(ks[9], (output_size,), 256),
    }


# ----------------------------------------------------------------------------
# Pure-JAX reference
# ----------------------------------------------------------------------------
def reference_forward(params, x_nchw, apply_softmax=True):
    x = x_nchw.astype(jnp.float32).transpose(0, 2, 3, 1)
    dn = ("NHWC", "HWIO", "NHWC")

    def conv(x, w, b, s):
        y = lax.conv_general_dilated(x, w, (s, s), "VALID", dimension_numbers=dn)
        return jnp.maximum(y + b, 0.0)

    x = conv(x, params["w1"], params["b1"], 4)
    x = conv(x, params["w2"], params["b2"], 2)
    x = conv(x, params["w3"], params["b3"], 1)
    B = x.shape[0]
    x = x.transpose(0, 3, 1, 2).reshape(B, -1)      # NCHW flatten (PyTorch order)
    x = jnp.maximum(x @ params["w4"] + params["b4"], 0.0)
    x = x @ params["w5"] + params["b5"]
    if apply_softmax:
        x = jax.nn.softmax(x, axis=1)
    return x


# ----------------------------------------------------------------------------
if __name__ == "__main__":
    # input_size=(4, 36, 36): spatial shrinks 36 -> 8 -> 3 -> 1 through the
    # three convs (smallest square input the module accepts); output_size=6.
    input_size = (4, 36, 36)
    output_size = 6
    batch = 2

    key = jax.random.PRNGKey(0)
    k_params, k_x = jax.random.split(key)
    params = init_params(k_params, input_size, output_size)
    x = jax.random.normal(k_x, (batch,) + input_size, dtype=jnp.float32)

    ref = jax.block_until_ready(reference_forward(params, x))

    # Exact-precision path (f32 MXU operands) — bit-faithful to the module.
    fwd_f32 = jax.jit(functools.partial(shapley_estimator_forward, use_bf16=False))
    out_f32 = jax.block_until_ready(fwd_f32(params, x))
    np.testing.assert_allclose(np.asarray(out_f32), np.asarray(ref),
                               rtol=1e-3, atol=1e-4)

    # Fast path (bf16 MXU operands, f32 accumulate + f32 epilogue).
    fwd_bf16 = jax.jit(functools.partial(shapley_estimator_forward, use_bf16=True))
    out_bf16 = jax.block_until_ready(fwd_bf16(params, x))
    np.testing.assert_allclose(np.asarray(out_bf16), np.asarray(ref),
                               rtol=2e-2, atol=2e-3)

    assert out_f32.shape == (batch, output_size)
    assert out_bf16.shape == (batch, output_size)
    print("KERNEL_OK")
</pallas_src>

<mosaic_0001>
module attributes {stable_mosaic.version = 11 : i64} {
  func.func @_fused_forward_kernel(%arg0: i32, %arg1: memref<128x256xf32, #tpu.memory_space<vmem>>, %arg2: memref<256x32xf32, #tpu.memory_space<vmem>>, %arg3: memref<1x32xf32, #tpu.memory_space<vmem>>, %arg4: memref<16x18x128xf32, #tpu.memory_space<vmem>>, %arg5: memref<16x32x64xf32, #tpu.memory_space<vmem>>, %arg6: memref<1x64xf32, #tpu.memory_space<vmem>>, %arg7: memref<9x2x18xf32, #tpu.memory_space<vmem>>, %arg8: memref<9x64x64xf32, #tpu.memory_space<vmem>>, %arg9: memref<1x64xf32, #tpu.memory_space<vmem>>, %arg10: memref<1x2x2xf32, #tpu.memory_space<vmem>>, %arg11: memref<1x64x256xf32, #tpu.memory_space<vmem>>, %arg12: memref<1x256xf32, #tpu.memory_space<vmem>>, %arg13: memref<256x6xf32, #tpu.memory_space<vmem>>, %arg14: memref<1x6xf32, #tpu.memory_space<vmem>>, %arg15: memref<2x6xf32, #tpu.memory_space<vmem>>) attributes {dimension_semantics = [#tpu.dimension_semantics<parallel>], iteration_bounds = array<i64: 1>, scalar_prefetch = 0 : i64, scratch_operands = 0 : i64, tpu.core_type = #tpu.core_type<tc>, window_params = [{transform_indices = @transform_0, window_bounds = array<i64: 128, 256>}, {pipeline_mode = #tpu.pipeline_mode<synchronous>, transform_indices = @transform_1, window_bounds = array<i64: 256, 32>}, {pipeline_mode = #tpu.pipeline_mode<synchronous>, transform_indices = @transform_2, window_bounds = array<i64: 1, 32>}, {pipeline_mode = #tpu.pipeline_mode<synchronous>, transform_indices = @transform_3, window_bounds = array<i64: 16, 18, 128>}, {pipeline_mode = #tpu.pipeline_mode<synchronous>, transform_indices = @transform_4, window_bounds = array<i64: 16, 32, 64>}, {pipeline_mode = #tpu.pipeline_mode<synchronous>, transform_indices = @transform_5, window_bounds = array<i64: 1, 64>}, {pipeline_mode = #tpu.pipeline_mode<synchronous>, transform_indices = @transform_6, window_bounds = array<i64: 9, 2, 18>}, {pipeline_mode = #tpu.pipeline_mode<synchronous>, transform_indices = @transform_7, window_bounds = array<i64: 9, 64, 64>}, {pipeline_mode = #tpu.pipeline_mode<synchronous>, transform_indices = @transform_8, window_bounds = array<i64: 1, 64>}, {pipeline_mode = #tpu.pipeline_mode<synchronous>, transform_indices = @transform_9, window_bounds = array<i64: 1, 2, 2>}, {pipeline_mode = #tpu.pipeline_mode<synchronous>, transform_indices = @transform_10, window_bounds = array<i64: 1, 64, 256>}, {pipeline_mode = #tpu.pipeline_mode<synchronous>, transform_indices = @transform_11, window_bounds = array<i64: 1, 256>}, {pipeline_mode = #tpu.pipeline_mode<synchronous>, transform_indices = @transform_12, window_bounds = array<i64: 256, 6>}, {pipeline_mode = #tpu.pipeline_mode<synchronous>, transform_indices = @transform_13, window_bounds = array<i64: 1, 6>}, {transform_indices = @transform_14, window_bounds = array<i64: 2, 6>}]} {
    %c0 = arith.constant 0 : index
    %c0_0 = arith.constant 0 : index
    %0 = vector.load %arg1[%c0, %c0_0] : memref<128x256xf32, #tpu.memory_space<vmem>>, vector<128x256xf32>
    %c0_1 = arith.constant 0 : index
    %c0_2 = arith.constant 0 : index
    %1 = vector.load %arg2[%c0_1, %c0_2] : memref<256x32xf32, #tpu.memory_space<vmem>>, vector<256x32xf32>
    %cst = arith.constant dense<0.000000e+00> : vector<128x32xf32>
    %2 = tpu.matmul %0, %1, %cst {dimension_numbers = #tpu.dot_dimension_numbers<[1], [0], [0], [1], [0, 0, 1, 1], [], []>} : vector<128x256xf32>, vector<256x32xf32>, vector<128x32xf32> -> vector<128x32xf32>
    %c0_3 = arith.constant 0 : index
    %c0_4 = arith.constant 0 : index
    %3 = vector.load %arg3[%c0_3, %c0_4] : memref<1x32xf32, #tpu.memory_space<vmem>>, vector<1x32xf32>
    %4 = vector.broadcast %3 : vector<1x32xf32> to vector<128x32xf32>
    %5 = arith.addf %2, %4 : vector<128x32xf32>
    %cst_5 = arith.constant 0.000000e+00 : f32
    %6 = vector.broadcast %cst_5 : f32 to vector<128x32xf32>
    %7 = arith.maximumf %5, %6 : vector<128x32xf32>
    %c0_6 = arith.constant 0 : index
    %c0_7 = arith.constant 0 : index
    %c0_8 = arith.constant 0 : index
    %8 = vector.load %arg4[%c0_6, %c0_7, %c0_8] : memref<16x18x128xf32, #tpu.memory_space<vmem>>, vector<1x18x128xf32>
    %9 = vector.shape_cast %8 : vector<1x18x128xf32> to vector<18x128xf32>
    %cst_9 = arith.constant dense<0.000000e+00> : vector<18x32xf32>
    %10 = tpu.matmul %9, %7, %cst_9 {dimension_numbers = #tpu.dot_dimension_numbers<[1], [0], [0], [1], [0, 0, 1, 1], [], []>} : vector<18x128xf32>, vector<128x32xf32>, vector<18x32xf32> -> vector<18x32xf32>
    %c0_10 = arith.constant 0 : index
    %c0_11 = arith.constant 0 : index
    %c0_12 = arith.constant 0 : index
    %11 = vector.load %arg5[%c0_10, %c0_11, %c0_12] : memref<16x32x64xf32, #tpu.memory_space<vmem>>, vector<1x32x64xf32>
    %12 = vector.shape_cast %11 : vector<1x32x64xf32> to vector<32x64xf32>
    %cst_13 = arith.constant dense<0.000000e+00> : vector<18x64xf32>
    %13 = tpu.matmul %10, %12, %cst_13 {dimension_numbers = #tpu.dot_dimension_numbers<[1], [0], [0], [1], [0, 0, 1, 1], [], []>} : vector<18x32xf32>, vector<32x64xf32>, vector<18x64xf32> -> vector<18x64xf32>
    %c1 = arith.constant 1 : index
    %c0_14 = arith.constant 0 : index
    %c0_15 = arith.constant 0 : index
    %14 = vector.load %arg4[%c1, %c0_14, %c0_15] : memref<16x18x128xf32, #tpu.memory_space<vmem>>, vector<1x18x128xf32>
    %15 = vector.shape_cast %14 : vector<1x18x128xf32> to vector<18x128xf32>
    %cst_16 = arith.constant dense<0.000000e+00> : vector<18x32xf32>
    %16 = tpu.matmul %15, %7, %cst_16 {dimension_numbers = #tpu.dot_dimension_numbers<[1], [0], [0], [1], [0, 0, 1, 1], [], []>} : vector<18x128xf32>, vector<128x32xf32>, vector<18x32xf32> -> vector<18x32xf32>
    %c1_17 = arith.constant 1 : index
    %c0_18 = arith.constant 0 : index
    %c0_19 = arith.constant 0 : index
    %17 = vector.load %arg5[%c1_17, %c0_18, %c0_19] : memref<16x32x64xf32, #tpu.memory_space<vmem>>, vector<1x32x64xf32>
    %18 = vector.shape_cast %17 : vector<1x32x64xf32> to vector<32x64xf32>
    %cst_20 = arith.constant dense<0.000000e+00> : vector<18x64xf32>
    %19 = tpu.matmul %16, %18, %cst_20 {dimension_numbers = #tpu.dot_dimension_numbers<[1], [0], [0], [1], [0, 0, 1, 1], [], []>} : vector<18x32xf32>, vector<32x64xf32>, vector<18x64xf32> -> vector<18x64xf32>
    %20 = arith.addf %13, %19 : vector<18x64xf32>
    %c2 = arith.constant 2 : index
    %c0_21 = arith.constant 0 : index
    %c0_22 = arith.constant 0 : index
    %21 = vector.load %arg4[%c2, %c0_21, %c0_22] : memref<16x18x128xf32, #tpu.memory_space<vmem>>, vector<1x18x128xf32>
    %22 = vector.shape_cast %21 : vector<1x18x128xf32> to vector<18x128xf32>
    %cst_23 = arith.constant dense<0.000000e+00> : vector<18x32xf32>
    %23 = tpu.matmul %22, %7, %cst_23 {dimension_numbers = #tpu.dot_dimension_numbers<[1], [0], [0], [1], [0, 0, 1, 1], [], []>} : vector<18x128xf32>, vector<128x32xf32>, vector<18x32xf32> -> vector<18x32xf32>
    %c2_24 = arith.constant 2 : index
    %c0_25 = arith.constant 0 : index
    %c0_26 = arith.constant 0 : index
    %24 = vector.load %arg5[%c2_24, %c0_25, %c0_26] : memref<16x32x64xf32, #tpu.memory_space<vmem>>, vector<1x32x64xf32>
    %25 = vector.shape_cast %24 : vector<1x32x64xf32> to vector<32x64xf32>
    %cst_27 = arith.constant dense<0.000000e+00> : vector<18x64xf32>
    %26 = tpu.matmul %23, %25, %cst_27 {dimension_numbers = #tpu.dot_dimension_numbers<[1], [0], [0], [1], [0, 0, 1, 1], [], []>} : vector<18x32xf32>, vector<32x64xf32>, vector<18x64xf32> -> vector<18x64xf32>
    %27 = arith.addf %20, %26 : vector<18x64xf32>
    %c3 = arith.constant 3 : index
    %c0_28 = arith.constant 0 : index
    %c0_29 = arith.constant 0 : index
    %28 = vector.load %arg4[%c3, %c0_28, %c0_29] : memref<16x18x128xf32, #tpu.memory_space<vmem>>, vector<1x18x128xf32>
    %29 = vector.shape_cast %28 : vector<1x18x128xf32> to vector<18x128xf32>
    %cst_30 = arith.constant dense<0.000000e+00> : vector<18x32xf32>
    %30 = tpu.matmul %29, %7, %cst_30 {dimension_numbers = #tpu.dot_dimension_numbers<[1], [0], [0], [1], [0, 0, 1, 1], [], []>} : vector<18x128xf32>, vector<128x32xf32>, vector<18x32xf32> -> vector<18x32xf32>
    %c3_31 = arith.constant 3 : index
    %c0_32 = arith.constant 0 : index
    %c0_33 = arith.constant 0 : index
    %31 = vector.load %arg5[%c3_31, %c0_32, %c0_33] : memref<16x32x64xf32, #tpu.memory_space<vmem>>, vector<1x32x64xf32>
    %32 = vector.shape_cast %31 : vector<1x32x64xf32> to vector<32x64xf32>
    %cst_34 = arith.constant dense<0.000000e+00> : vector<18x64xf32>
    %33 = tpu.matmul %30, %32, %cst_34 {dimension_numbers = #tpu.dot_dimension_numbers<[1], [0], [0], [1], [0, 0, 1, 1], [], []>} : vector<18x32xf32>, vector<32x64xf32>, vector<18x64xf32> -> vector<18x64xf32>
    %34 = arith.addf %27, %33 : vector<18x64xf32>
    %c4 = arith.constant 4 : index
    %c0_35 = arith.constant 0 : index
    %c0_36 = arith.constant 0 : index
    %35 = vector.load %arg4[%c4, %c0_35, %c0_36] : memref<16x18x128xf32, #tpu.memory_space<vmem>>, vector<1x18x128xf32>
    %36 = vector.shape_cast %35 : vector<1x18x128xf32> to vector<18x128xf32>
    %cst_37 = arith.constant dense<0.000000e+00> : vector<18x32xf32>
    %37 = tpu.matmul %36, %7, %cst_37 {dimension_numbers = #tpu.dot_dimension_numbers<[1], [0], [0], [1], [0, 0, 1, 1], [], []>} : vector<18x128xf32>, vector<128x32xf32>, vector<18x32xf32> -> vector<18x32xf32>
    %c4_38 = arith.constant 4 : index
    %c0_39 = arith.constant 0 : index
    %c0_40 = arith.constant 0 : index
    %38 = vector.load %arg5[%c4_38, %c0_39, %c0_40] : memref<16x32x64xf32, #tpu.memory_space<vmem>>, vector<1x32x64xf32>
    %39 = vector.shape_cast %38 : vector<1x32x64xf32> to vector<32x64xf32>
    %cst_41 = arith.constant dense<0.000000e+00> : vector<18x64xf32>
    %40 = tpu.matmul %37, %39, %cst_41 {dimension_numbers = #tpu.dot_dimension_numbers<[1], [0], [0], [1], [0, 0, 1, 1], [], []>} : vector<18x32xf32>, vector<32x64xf32>, vector<18x64xf32> -> vector<18x64xf32>
    %41 = arith.addf %34, %40 : vector<18x64xf32>
    %c5 = arith.constant 5 : index
    %c0_42 = arith.constant 0 : index
    %c0_43 = arith.constant 0 : index
    %42 = vector.load %arg4[%c5, %c0_42, %c0_43] : memref<16x18x128xf32, #tpu.memory_space<vmem>>, vector<1x18x128xf32>
    %43 = vector.shape_cast %42 : vector<1x18x128xf32> to vector<18x128xf32>
    %cst_44 = arith.constant dense<0.000000e+00> : vector<18x32xf32>
    %44 = tpu.matmul %43, %7, %cst_44 {dimension_numbers = #tpu.dot_dimension_numbers<[1], [0], [0], [1], [0, 0, 1, 1], [], []>} : vector<18x128xf32>, vector<128x32xf32>, vector<18x32xf32> -> vector<18x32xf32>
    %c5_45 = arith.constant 5 : index
    %c0_46 = arith.constant 0 : index
    %c0_47 = arith.constant 0 : index
    %45 = vector.load %arg5[%c5_45, %c0_46, %c0_47] : memref<16x32x64xf32, #tpu.memory_space<vmem>>, vector<1x32x64xf32>
    %46 = vector.shape_cast %45 : vector<1x32x64xf32> to vector<32x64xf32>
    %cst_48 = arith.constant dense<0.000000e+00> : vector<18x64xf32>
    %47 = tpu.matmul %44, %46, %cst_48 {dimension_numbers = #tpu.dot_dimension_numbers<[1], [0], [0], [1], [0, 0, 1, 1], [], []>} : vector<18x32xf32>, vector<32x64xf32>, vector<18x64xf32> -> vector<18x64xf32>
    %48 = arith.addf %41, %47 : vector<18x64xf32>
    %c6 = arith.constant 6 : index
    %c0_49 = arith.constant 0 : index
    %c0_50 = arith.constant 0 : index
    %49 = vector.load %arg4[%c6, %c0_49, %c0_50] : memref<16x18x128xf32, #tpu.memory_space<vmem>>, vector<1x18x128xf32>
    %50 = vector.shape_cast %49 : vector<1x18x128xf32> to vector<18x128xf32>
    %cst_51 = arith.constant dense<0.000000e+00> : vector<18x32xf32>
    %51 = tpu.matmul %50, %7, %cst_51 {dimension_numbers = #tpu.dot_dimension_numbers<[1], [0], [0], [1], [0, 0, 1, 1], [], []>} : vector<18x128xf32>, vector<128x32xf32>, vector<18x32xf32> -> vector<18x32xf32>
    %c6_52 = arith.constant 6 : index
    %c0_53 = arith.constant 0 : index
    %c0_54 = arith.constant 0 : index
    %52 = vector.load %arg5[%c6_52, %c0_53, %c0_54] : memref<16x32x64xf32, #tpu.memory_space<vmem>>, vector<1x32x64xf32>
    %53 = vector.shape_cast %52 : vector<1x32x64xf32> to vector<32x64xf32>
    %cst_55 = arith.constant dense<0.000000e+00> : vector<18x64xf32>
    %54 = tpu.matmul %51, %53, %cst_55 {dimension_numbers = #tpu.dot_dimension_numbers<[1], [0], [0], [1], [0, 0, 1, 1], [], []>} : vector<18x32xf32>, vector<32x64xf32>, vector<18x64xf32> -> vector<18x64xf32>
    %55 = arith.addf %48, %54 : vector<18x64xf32>
    %c7 = arith.constant 7 : index
    %c0_56 = arith.constant 0 : index
    %c0_57 = arith.constant 0 : index
    %56 = vector.load %arg4[%c7, %c0_56, %c0_57] : memref<16x18x128xf32, #tpu.memory_space<vmem>>, vector<1x18x128xf32>
    %57 = vector.shape_cast %56 : vector<1x18x128xf32> to vector<18x128xf32>
    %cst_58 = arith.constant dense<0.000000e+00> : vector<18x32xf32>
    %58 = tpu.matmul %57, %7, %cst_58 {dimension_numbers = #tpu.dot_dimension_numbers<[1], [0], [0], [1], [0, 0, 1, 1], [], []>} : vector<18x128xf32>, vector<128x32xf32>, vector<18x32xf32> -> vector<18x32xf32>
    %c7_59 = arith.constant 7 : index
    %c0_60 = arith.constant 0 : index
    %c0_61 = arith.constant 0 : index
    %59 = vector.load %arg5[%c7_59, %c0_60, %c0_61] : memref<16x32x64xf32, #tpu.memory_space<vmem>>, vector<1x32x64xf32>
    %60 = vector.shape_cast %59 : vector<1x32x64xf32> to vector<32x64xf32>
    %cst_62 = arith.constant dense<0.000000e+00> : vector<18x64xf32>
    %61 = tpu.matmul %58, %60, %cst_62 {dimension_numbers = #tpu.dot_dimension_numbers<[1], [0], [0], [1], [0, 0, 1, 1], [], []>} : vector<18x32xf32>, vector<32x64xf32>, vector<18x64xf32> -> vector<18x64xf32>
    %62 = arith.addf %55, %61 : vector<18x64xf32>
    %c8 = arith.constant 8 : index
    %c0_63 = arith.constant 0 : index
    %c0_64 = arith.constant 0 : index
    %63 = vector.load %arg4[%c8, %c0_63, %c0_64] : memref<16x18x128xf32, #tpu.memory_space<vmem>>, vector<1x18x128xf32>
    %64 = vector.shape_cast %63 : vector<1x18x128xf32> to vector<18x128xf32>
    %cst_65 = arith.constant dense<0.000000e+00> : vector<18x32xf32>
    %65 = tpu.matmul %64, %7, %cst_65 {dimension_numbers = #tpu.dot_dimension_numbers<[1], [0], [0], [1], [0, 0, 1, 1], [], []>} : vector<18x128xf32>, vector<128x32xf32>, vector<18x32xf32> -> vector<18x32xf32>
    %c8_66 = arith.constant 8 : index
    %c0_67 = arith.constant 0 : index
    %c0_68 = arith.constant 0 : index
    %66 = vector.load %arg5[%c8_66, %c0_67, %c0_68] : memref<16x32x64xf32, #tpu.memory_space<vmem>>, vector<1x32x64xf32>
    %67 = vector.shape_cast %66 : vector<1x32x64xf32> to vector<32x64xf32>
    %cst_69 = arith.constant dense<0.000000e+00> : vector<18x64xf32>
    %68 = tpu.matmul %65, %67, %cst_69 {dimension_numbers = #tpu.dot_dimension_numbers<[1], [0], [0], [1], [0, 0, 1, 1], [], []>} : vector<18x32xf32>, vector<32x64xf32>, vector<18x64xf32> -> vector<18x64xf32>
    %69 = arith.addf %62, %68 : vector<18x64xf32>
    %c9 = arith.constant 9 : index
    %c0_70 = arith.constant 0 : index
    %c0_71 = arith.constant 0 : index
    %70 = vector.load %arg4[%c9, %c0_70, %c0_71] : memref<16x18x128xf32, #tpu.memory_space<vmem>>, vector<1x18x128xf32>
    %71 = vector.shape_cast %70 : vector<1x18x128xf32> to vector<18x128xf32>
    %cst_72 = arith.constant dense<0.000000e+00> : vector<18x32xf32>
    %72 = tpu.matmul %71, %7, %cst_72 {dimension_numbers = #tpu.dot_dimension_numbers<[1], [0], [0], [1], [0, 0, 1, 1], [], []>} : vector<18x128xf32>, vector<128x32xf32>, vector<18x32xf32> -> vector<18x32xf32>
    %c9_73 = arith.constant 9 : index
    %c0_74 = arith.constant 0 : index
    %c0_75 = arith.constant 0 : index
    %73 = vector.load %arg5[%c9_73, %c0_74, %c0_75] : memref<16x32x64xf32, #tpu.memory_space<vmem>>, vector<1x32x64xf32>
    %74 = vector.shape_cast %73 : vector<1x32x64xf32> to vector<32x64xf32>
    %cst_76 = arith.constant dense<0.000000e+00> : vector<18x64xf32>
    %75 = tpu.matmul %72, %74, %cst_76 {dimension_numbers = #tpu.dot_dimension_numbers<[1], [0], [0], [1], [0, 0, 1, 1], [], []>} : vector<18x32xf32>, vector<32x64xf32>, vector<18x64xf32> -> vector<18x64xf32>
    %76 = arith.addf %69, %75 : vector<18x64xf32>
    %c10 = arith.constant 10 : index
    %c0_77 = arith.constant 0 : index
    %c0_78 = arith.constant 0 : index
    %77 = vector.load %arg4[%c10, %c0_77, %c0_78] : memref<16x18x128xf32, #tpu.memory_space<vmem>>, vector<1x18x128xf32>
    %78 = vector.shape_cast %77 : vector<1x18x128xf32> to vector<18x128xf32>
    %cst_79 = arith.constant dense<0.000000e+00> : vector<18x32xf32>
    %79 = tpu.matmul %78, %7, %cst_79 {dimension_numbers = #tpu.dot_dimension_numbers<[1], [0], [0], [1], [0, 0, 1, 1], [], []>} : vector<18x128xf32>, vector<128x32xf32>, vector<18x32xf32> -> vector<18x32xf32>
    %c10_80 = arith.constant 10 : index
    %c0_81 = arith.constant 0 : index
    %c0_82 = arith.constant 0 : index
    %80 = vector.load %arg5[%c10_80, %c0_81, %c0_82] : memref<16x32x64xf32, #tpu.memory_space<vmem>>, vector<1x32x64xf32>
    %81 = vector.shape_cast %80 : vector<1x32x64xf32> to vector<32x64xf32>
    %cst_83 = arith.constant dense<0.000000e+00> : vector<18x64xf32>
    %82 = tpu.matmul %79, %81, %cst_83 {dimension_numbers = #tpu.dot_dimension_numbers<[1], [0], [0], [1], [0, 0, 1, 1], [], []>} : vector<18x32xf32>, vector<32x64xf32>, vector<18x64xf32> -> vector<18x64xf32>
    %83 = arith.addf %76, %82 : vector<18x64xf32>
    %c11 = arith.constant 11 : index
    %c0_84 = arith.constant 0 : index
    %c0_85 = arith.constant 0 : index
    %84 = vector.load %arg4[%c11, %c0_84, %c0_85] : memref<16x18x128xf32, #tpu.memory_space<vmem>>, vector<1x18x128xf32>
    %85 = vector.shape_cast %84 : vector<1x18x128xf32> to vector<18x128xf32>
    %cst_86 = arith.constant dense<0.000000e+00> : vector<18x32xf32>
    %86 = tpu.matmul %85, %7, %cst_86 {dimension_numbers = #tpu.dot_dimension_numbers<[1], [0], [0], [1], [0, 0, 1, 1], [], []>} : vector<18x128xf32>, vector<128x32xf32>, vector<18x32xf32> -> vector<18x32xf32>
    %c11_87 = arith.constant 11 : index
    %c0_88 = arith.constant 0 : index
    %c0_89 = arith.constant 0 : index
    %87 = vector.load %arg5[%c11_87, %c0_88, %c0_89] : memref<16x32x64xf32, #tpu.memory_space<vmem>>, vector<1x32x64xf32>
    %88 = vector.shape_cast %87 : vector<1x32x64xf32> to vector<32x64xf32>
    %cst_90 = arith.constant dense<0.000000e+00> : vector<18x64xf32>
    %89 = tpu.matmul %86, %88, %cst_90 {dimension_numbers = #tpu.dot_dimension_numbers<[1], [0], [0], [1], [0, 0, 1, 1], [], []>} : vector<18x32xf32>, vector<32x64xf32>, vector<18x64xf32> -> vector<18x64xf32>
    %90 = arith.addf %83, %89 : vector<18x64xf32>
    %c12 = arith.constant 12 : index
    %c0_91 = arith.constant 0 : index
    %c0_92 = arith.constant 0 : index
    %91 = vector.load %arg4[%c12, %c0_91, %c0_92] : memref<16x18x128xf32, #tpu.memory_space<vmem>>, vector<1x18x128xf32>
    %92 = vector.shape_cast %91 : vector<1x18x128xf32> to vector<18x128xf32>
    %cst_93 = arith.constant dense<0.000000e+00> : vector<18x32xf32>
    %93 = tpu.matmul %92, %7, %cst_93 {dimension_numbers = #tpu.dot_dimension_numbers<[1], [0], [0], [1], [0, 0, 1, 1], [], []>} : vector<18x128xf32>, vector<128x32xf32>, vector<18x32xf32> -> vector<18x32xf32>
    %c12_94 = arith.constant 12 : index
    %c0_95 = arith.constant 0 : index
    %c0_96 = arith.constant 0 : index
    %94 = vector.load %arg5[%c12_94, %c0_95, %c0_96] : memref<16x32x64xf32, #tpu.memory_space<vmem>>, vector<1x32x64xf32>
    %95 = vector.shape_cast %94 : vector<1x32x64xf32> to vector<32x64xf32>
    %cst_97 = arith.constant dense<0.000000e+00> : vector<18x64xf32>
    %96 = tpu.matmul %93, %95, %cst_97 {dimension_numbers = #tpu.dot_dimension_numbers<[1], [0], [0], [1], [0, 0, 1, 1], [], []>} : vector<18x32xf32>, vector<32x64xf32>, vector<18x64xf32> -> vector<18x64xf32>
    %97 = arith.addf %90, %96 : vector<18x64xf32>
    %c13 = arith.constant 13 : index
    %c0_98 = arith.constant 0 : index
    %c0_99 = arith.constant 0 : index
    %98 = vector.load %arg4[%c13, %c0_98, %c0_99] : memref<16x18x128xf32, #tpu.memory_space<vmem>>, vector<1x18x128xf32>
    %99 = vector.shape_cast %98 : vector<1x18x128xf32> to vector<18x128xf32>
    %cst_100 = arith.constant dense<0.000000e+00> : vector<18x32xf32>
    %100 = tpu.matmul %99, %7, %cst_100 {dimension_numbers = #tpu.dot_dimension_numbers<[1], [0], [0], [1], [0, 0, 1, 1], [], []>} : vector<18x128xf32>, vector<128x32xf32>, vector<18x32xf32> -> vector<18x32xf32>
    %c13_101 = arith.constant 13 : index
    %c0_102 = arith.constant 0 : index
    %c0_103 = arith.constant 0 : index
    %101 = vector.load %arg5[%c13_101, %c0_102, %c0_103] : memref<16x32x64xf32, #tpu.memory_space<vmem>>, vector<1x32x64xf32>
    %102 = vector.shape_cast %101 : vector<1x32x64xf32> to vector<32x64xf32>
    %cst_104 = arith.constant dense<0.000000e+00> : vector<18x64xf32>
    %103 = tpu.matmul %100, %102, %cst_104 {dimension_numbers = #tpu.dot_dimension_numbers<[1], [0], [0], [1], [0, 0, 1, 1], [], []>} : vector<18x32xf32>, vector<32x64xf32>, vector<18x64xf32> -> vector<18x64xf32>
    %104 = arith.addf %97, %103 : vector<18x64xf32>
    %c14 = arith.constant 14 : index
    %c0_105 = arith.constant 0 : index
    %c0_106 = arith.constant 0 : index
    %105 = vector.load %arg4[%c14, %c0_105, %c0_106] : memref<16x18x128xf32, #tpu.memory_space<vmem>>, vector<1x18x128xf32>
    %106 = vector.shape_cast %105 : vector<1x18x128xf32> to vector<18x128xf32>
    %cst_107 = arith.constant dense<0.000000e+00> : vector<18x32xf32>
    %107 = tpu.matmul %106, %7, %cst_107 {dimension_numbers = #tpu.dot_dimension_numbers<[1], [0], [0], [1], [0, 0, 1, 1], [], []>} : vector<18x128xf32>, vector<128x32xf32>, vector<18x32xf32> -> vector<18x32xf32>
    %c14_108 = arith.constant 14 : index
    %c0_109 = arith.constant 0 : index
    %c0_110 = arith.constant 0 : index
    %108 = vector.load %arg5[%c14_108, %c0_109, %c0_110] : memref<16x32x64xf32, #tpu.memory_space<vmem>>, vector<1x32x64xf32>
    %109 = vector.shape_cast %108 : vector<1x32x64xf32> to vector<32x64xf32>
    %cst_111 = arith.constant dense<0.000000e+00> : vector<18x64xf32>
    %110 = tpu.matmul %107, %109, %cst_111 {dimension_numbers = #tpu.dot_dimension_numbers<[1], [0], [0], [1], [0, 0, 1, 1], [], []>} : vector<18x32xf32>, vector<32x64xf32>, vector<18x64xf32> -> vector<18x64xf32>
    %111 = arith.addf %104, %110 : vector<18x64xf32>
    %c15 = arith.constant 15 : index
    %c0_112 = arith.constant 0 : index
    %c0_113 = arith.constant 0 : index
    %112 = vector.load %arg4[%c15, %c0_112, %c0_113] : memref<16x18x128xf32, #tpu.memory_space<vmem>>, vector<1x18x128xf32>
    %113 = vector.shape_cast %112 : vector<1x18x128xf32> to vector<18x128xf32>
    %cst_114 = arith.constant dense<0.000000e+00> : vector<18x32xf32>
    %114 = tpu.matmul %113, %7, %cst_114 {dimension_numbers = #tpu.dot_dimension_numbers<[1], [0], [0], [1], [0, 0, 1, 1], [], []>} : vector<18x128xf32>, vector<128x32xf32>, vector<18x32xf32> -> vector<18x32xf32>
    %c15_115 = arith.constant 15 : index
    %c0_116 = arith.constant 0 : index
    %c0_117 = arith.constant 0 : index
    %115 = vector.load %arg5[%c15_115, %c0_116, %c0_117] : memref<16x32x64xf32, #tpu.memory_space<vmem>>, vector<1x32x64xf32>
    %116 = vector.shape_cast %115 : vector<1x32x64xf32> to vector<32x64xf32>
    %cst_118 = arith.constant dense<0.000000e+00> : vector<18x64xf32>
    %117 = tpu.matmul %114, %116, %cst_118 {dimension_numbers = #tpu.dot_dimension_numbers<[1], [0], [0], [1], [0, 0, 1, 1], [], []>} : vector<18x32xf32>, vector<32x64xf32>, vector<18x64xf32> -> vector<18x64xf32>
    %118 = arith.addf %111, %117 : vector<18x64xf32>
    %c0_119 = arith.constant 0 : index
    %c0_120 = arith.constant 0 : index
    %119 = vector.load %arg6[%c0_119, %c0_120] : memref<1x64xf32, #tpu.memory_space<vmem>>, vector<1x64xf32>
    %120 = vector.broadcast %119 : vector<1x64xf32> to vector<18x64xf32>
    %121 = arith.addf %118, %120 : vector<18x64xf32>
    %cst_121 = arith.constant 0.000000e+00 : f32
    %122 = vector.broadcast %cst_121 : f32 to vector<18x64xf32>
    %123 = arith.maximumf %121, %122 : vector<18x64xf32>
    %c0_122 = arith.constant 0 : index
    %c0_123 = arith.constant 0 : index
    %c0_124 = arith.constant 0 : index
    %124 = vector.load %arg7[%c0_122, %c0_123, %c0_124] : memref<9x2x18xf32, #tpu.memory_space<vmem>>, vector<1x2x18xf32>
    %125 = vector.shape_cast %124 : vector<1x2x18xf32> to vector<2x18xf32>
    %cst_125 = arith.constant dense<0.000000e+00> : vector<2x64xf32>
    %126 = tpu.matmul %125, %123, %cst_125 {dimension_numbers = #tpu.dot_dimension_numbers<[1], [0], [0], [1], [0, 0, 1, 1], [], []>} : vector<2x18xf32>, vector<18x64xf32>, vector<2x64xf32> -> vector<2x64xf32>
    %c0_126 = arith.constant 0 : index
    %c0_127 = arith.constant 0 : index
    %c0_128 = arith.constant 0 : index
    %127 = vector.load %arg8[%c0_126, %c0_127, %c0_128] : memref<9x64x64xf32, #tpu.memory_space<vmem>>, vector<1x64x64xf32>
    %128 = vector.shape_cast %127 : vector<1x64x64xf32> to vector<64x64xf32>
    %cst_129 = arith.constant dense<0.000000e+00> : vector<2x64xf32>
    %129 = tpu.matmul %126, %128, %cst_129 {dimension_numbers = #tpu.dot_dimension_numbers<[1], [0], [0], [1], [0, 0, 1, 1], [], []>} : vector<2x64xf32>, vector<64x64xf32>, vector<2x64xf32> -> vector<2x64xf32>
    %c1_130 = arith.constant 1 : index
    %c0_131 = arith.constant 0 : index
    %c0_132 = arith.constant 0 : index
    %130 = vector.load %arg7[%c1_130, %c0_131, %c0_132] : memref<9x2x18xf32, #tpu.memory_space<vmem>>, vector<1x2x18xf32>
    %131 = vector.shape_cast %130 : vector<1x2x18xf32> to vector<2x18xf32>
    %cst_133 = arith.constant dense<0.000000e+00> : vector<2x64xf32>
    %132 = tpu.matmul %131, %123, %cst_133 {dimension_numbers = #tpu.dot_dimension_numbers<[1], [0], [0], [1], [0, 0, 1, 1], [], []>} : vector<2x18xf32>, vector<18x64xf32>, vector<2x64xf32> -> vector<2x64xf32>
    %c1_134 = arith.constant 1 : index
    %c0_135 = arith.constant 0 : index
    %c0_136 = arith.constant 0 : index
    %133 = vector.load %arg8[%c1_134, %c0_135, %c0_136] : memref<9x64x64xf32, #tpu.memory_space<vmem>>, vector<1x64x64xf32>
    %134 = vector.shape_cast %133 : vector<1x64x64xf32> to vector<64x64xf32>
    %cst_137 = arith.constant dense<0.000000e+00> : vector<2x64xf32>
    %135 = tpu.matmul %132, %134, %cst_137 {dimension_numbers = #tpu.dot_dimension_numbers<[1], [0], [0], [1], [0, 0, 1, 1], [], []>} : vector<2x64xf32>, vector<64x64xf32>, vector<2x64xf32> -> vector<2x64xf32>
    %136 = arith.addf %129, %135 : vector<2x64xf32>
    %c2_138 = arith.constant 2 : index
    %c0_139 = arith.constant 0 : index
    %c0_140 = arith.constant 0 : index
    %137 = vector.load %arg7[%c2_138, %c0_139, %c0_140] : memref<9x2x18xf32, #tpu.memory_space<vmem>>, vector<1x2x18xf32>
    %138 = vector.shape_cast %137 : vector<1x2x18xf32> to vector<2x18xf32>
    %cst_141 = arith.constant dense<0.000000e+00> : vector<2x64xf32>
    %139 = tpu.matmul %138, %123, %cst_141 {dimension_numbers = #tpu.dot_dimension_numbers<[1], [0], [0], [1], [0, 0, 1, 1], [], []>} : vector<2x18xf32>, vector<18x64xf32>, vector<2x64xf32> -> vector<2x64xf32>
    %c2_142 = arith.constant 2 : index
    %c0_143 = arith.constant 0 : index
    %c0_144 = arith.constant 0 : index
    %140 = vector.load %arg8[%c2_142, %c0_143, %c0_144] : memref<9x64x64xf32, #tpu.memory_space<vmem>>, vector<1x64x64xf32>
    %141 = vector.shape_cast %140 : vector<1x64x64xf32> to vector<64x64xf32>
    %cst_145 = arith.constant dense<0.000000e+00> : vector<2x64xf32>
    %142 = tpu.matmul %139, %141, %cst_145 {dimension_numbers = #tpu.dot_dimension_numbers<[1], [0], [0], [1], [0, 0, 1, 1], [], []>} : vector<2x64xf32>, vector<64x64xf32>, vector<2x64xf32> -> vector<2x64xf32>
    %143 = arith.addf %136, %142 : vector<2x64xf32>
    %c3_146 = arith.constant 3 : index
    %c0_147 = arith.constant 0 : index
    %c0_148 = arith.constant 0 : index
    %144 = vector.load %arg7[%c3_146, %c0_147, %c0_148] : memref<9x2x18xf32, #tpu.memory_space<vmem>>, vector<1x2x18xf32>
    %145 = vector.shape_cast %144 : vector<1x2x18xf32> to vector<2x18xf32>
    %cst_149 = arith.constant dense<0.000000e+00> : vector<2x64xf32>
    %146 = tpu.matmul %145, %123, %cst_149 {dimension_numbers = #tpu.dot_dimension_numbers<[1], [0], [0], [1], [0, 0, 1, 1], [], []>} : vector<2x18xf32>, vector<18x64xf32>, vector<2x64xf32> -> vector<2x64xf32>
    %c3_150 = arith.constant 3 : index
    %c0_151 = arith.constant 0 : index
    %c0_152 = arith.constant 0 : index
    %147 = vector.load %arg8[%c3_150, %c0_151, %c0_152] : memref<9x64x64xf32, #tpu.memory_space<vmem>>, vector<1x64x64xf32>
    %148 = vector.shape_cast %147 : vector<1x64x64xf32> to vector<64x64xf32>
    %cst_153 = arith.constant dense<0.000000e+00> : vector<2x64xf32>
    %149 = tpu.matmul %146, %148, %cst_153 {dimension_numbers = #tpu.dot_dimension_numbers<[1], [0], [0], [1], [0, 0, 1, 1], [], []>} : vector<2x64xf32>, vector<64x64xf32>, vector<2x64xf32> -> vector<2x64xf32>
    %150 = arith.addf %143, %149 : vector<2x64xf32>
    %c4_154 = arith.constant 4 : index
    %c0_155 = arith.constant 0 : index
    %c0_156 = arith.constant 0 : index
    %151 = vector.load %arg7[%c4_154, %c0_155, %c0_156] : memref<9x2x18xf32, #tpu.memory_space<vmem>>, vector<1x2x18xf32>
    %152 = vector.shape_cast %151 : vector<1x2x18xf32> to vector<2x18xf32>
    %cst_157 = arith.constant dense<0.000000e+00> : vector<2x64xf32>
    %153 = tpu.matmul %152, %123, %cst_157 {dimension_numbers = #tpu.dot_dimension_numbers<[1], [0], [0], [1], [0, 0, 1, 1], [], []>} : vector<2x18xf32>, vector<18x64xf32>, vector<2x64xf32> -> vector<2x64xf32>
    %c4_158 = arith.constant 4 : index
    %c0_159 = arith.constant 0 : index
    %c0_160 = arith.constant 0 : index
    %154 = vector.load %arg8[%c4_158, %c0_159, %c0_160] : memref<9x64x64xf32, #tpu.memory_space<vmem>>, vector<1x64x64xf32>
    %155 = vector.shape_cast %154 : vector<1x64x64xf32> to vector<64x64xf32>
    %cst_161 = arith.constant dense<0.000000e+00> : vector<2x64xf32>
    %156 = tpu.matmul %153, %155, %cst_161 {dimension_numbers = #tpu.dot_dimension_numbers<[1], [0], [0], [1], [0, 0, 1, 1], [], []>} : vector<2x64xf32>, vector<64x64xf32>, vector<2x64xf32> -> vector<2x64xf32>
    %157 = arith.addf %150, %156 : vector<2x64xf32>
    %c5_162 = arith.constant 5 : index
    %c0_163 = arith.constant 0 : index
    %c0_164 = arith.constant 0 : index
    %158 = vector.load %arg7[%c5_162, %c0_163, %c0_164] : memref<9x2x18xf32, #tpu.memory_space<vmem>>, vector<1x2x18xf32>
    %159 = vector.shape_cast %158 : vector<1x2x18xf32> to vector<2x18xf32>
    %cst_165 = arith.constant dense<0.000000e+00> : vector<2x64xf32>
    %160 = tpu.matmul %159, %123, %cst_165 {dimension_numbers = #tpu.dot_dimension_numbers<[1], [0], [0], [1], [0, 0, 1, 1], [], []>} : vector<2x18xf32>, vector<18x64xf32>, vector<2x64xf32> -> vector<2x64xf32>
    %c5_166 = arith.constant 5 : index
    %c0_167 = arith.constant 0 : index
    %c0_168 = arith.constant 0 : index
    %161 = vector.load %arg8[%c5_166, %c0_167, %c0_168] : memref<9x64x64xf32, #tpu.memory_space<vmem>>, vector<1x64x64xf32>
    %162 = vector.shape_cast %161 : vector<1x64x64xf32> to vector<64x64xf32>
    %cst_169 = arith.constant dense<0.000000e+00> : vector<2x64xf32>
    %163 = tpu.matmul %160, %162, %cst_169 {dimension_numbers = #tpu.dot_dimension_numbers<[1], [0], [0], [1], [0, 0, 1, 1], [], []>} : vector<2x64xf32>, vector<64x64xf32>, vector<2x64xf32> -> vector<2x64xf32>
    %164 = arith.addf %157, %163 : vector<2x64xf32>
    %c6_170 = arith.constant 6 : index
    %c0_171 = arith.constant 0 : index
    %c0_172 = arith.constant 0 : index
    %165 = vector.load %arg7[%c6_170, %c0_171, %c0_172] : memref<9x2x18xf32, #tpu.memory_space<vmem>>, vector<1x2x18xf32>
    %166 = vector.shape_cast %165 : vector<1x2x18xf32> to vector<2x18xf32>
    %cst_173 = arith.constant dense<0.000000e+00> : vector<2x64xf32>
    %167 = tpu.matmul %166, %123, %cst_173 {dimension_numbers = #tpu.dot_dimension_numbers<[1], [0], [0], [1], [0, 0, 1, 1], [], []>} : vector<2x18xf32>, vector<18x64xf32>, vector<2x64xf32> -> vector<2x64xf32>
    %c6_174 = arith.constant 6 : index
    %c0_175 = arith.constant 0 : index
    %c0_176 = arith.constant 0 : index
    %168 = vector.load %arg8[%c6_174, %c0_175, %c0_176] : memref<9x64x64xf32, #tpu.memory_space<vmem>>, vector<1x64x64xf32>
    %169 = vector.shape_cast %168 : vector<1x64x64xf32> to vector<64x64xf32>
    %cst_177 = arith.constant dense<0.000000e+00> : vector<2x64xf32>
    %170 = tpu.matmul %167, %169, %cst_177 {dimension_numbers = #tpu.dot_dimension_numbers<[1], [0], [0], [1], [0, 0, 1, 1], [], []>} : vector<2x64xf32>, vector<64x64xf32>, vector<2x64xf32> -> vector<2x64xf32>
    %171 = arith.addf %164, %170 : vector<2x64xf32>
    %c7_178 = arith.constant 7 : index
    %c0_179 = arith.constant 0 : index
    %c0_180 = arith.constant 0 : index
    %172 = vector.load %arg7[%c7_178, %c0_179, %c0_180] : memref<9x2x18xf32, #tpu.memory_space<vmem>>, vector<1x2x18xf32>
    %173 = vector.shape_cast %172 : vector<1x2x18xf32> to vector<2x18xf32>
    %cst_181 = arith.constant dense<0.000000e+00> : vector<2x64xf32>
    %174 = tpu.matmul %173, %123, %cst_181 {dimension_numbers = #tpu.dot_dimension_numbers<[1], [0], [0], [1], [0, 0, 1, 1], [], []>} : vector<2x18xf32>, vector<18x64xf32>, vector<2x64xf32> -> vector<2x64xf32>
    %c7_182 = arith.constant 7 : index
    %c0_183 = arith.constant 0 : index
    %c0_184 = arith.constant 0 : index
    %175 = vector.load %arg8[%c7_182, %c0_183, %c0_184] : memref<9x64x64xf32, #tpu.memory_space<vmem>>, vector<1x64x64xf32>
    %176 = vector.shape_cast %175 : vector<1x64x64xf32> to vector<64x64xf32>
    %cst_185 = arith.constant dense<0.000000e+00> : vector<2x64xf32>
    %177 = tpu.matmul %174, %176, %cst_185 {dimension_numbers = #tpu.dot_dimension_numbers<[1], [0], [0], [1], [0, 0, 1, 1], [], []>} : vector<2x64xf32>, vector<64x64xf32>, vector<2x64xf32> -> vector<2x64xf32>
    %178 = arith.addf %171, %177 : vector<2x64xf32>
    %c8_186 = arith.constant 8 : index
    %c0_187 = arith.constant 0 : index
    %c0_188 = arith.constant 0 : index
    %179 = vector.load %arg7[%c8_186, %c0_187, %c0_188] : memref<9x2x18xf32, #tpu.memory_space<vmem>>, vector<1x2x18xf32>
    %180 = vector.shape_cast %179 : vector<1x2x18xf32> to vector<2x18xf32>
    %cst_189 = arith.constant dense<0.000000e+00> : vector<2x64xf32>
    %181 = tpu.matmul %180, %123, %cst_189 {dimension_numbers = #tpu.dot_dimension_numbers<[1], [0], [0], [1], [0, 0, 1, 1], [], []>} : vector<2x18xf32>, vector<18x64xf32>, vector<2x64xf32> -> vector<2x64xf32>
    %c8_190 = arith.constant 8 : index
    %c0_191 = arith.constant 0 : index
    %c0_192 = arith.constant 0 : index
    %182 = vector.load %arg8[%c8_190, %c0_191, %c0_192] : memref<9x64x64xf32, #tpu.memory_space<vmem>>, vector<1x64x64xf32>
    %183 = vector.shape_cast %182 : vector<1x64x64xf32> to vector<64x64xf32>
    %cst_193 = arith.constant dense<0.000000e+00> : vector<2x64xf32>
    %184 = tpu.matmul %181, %183, %cst_193 {dimension_numbers = #tpu.dot_dimension_numbers<[1], [0], [0], [1], [0, 0, 1, 1], [], []>} : vector<2x64xf32>, vector<64x64xf32>, vector<2x64xf32> -> vector<2x64xf32>
    %185 = arith.addf %178, %184 : vector<2x64xf32>
    %c0_194 = arith.constant 0 : index
    %c0_195 = arith.constant 0 : index
    %186 = vector.load %arg9[%c0_194, %c0_195] : memref<1x64xf32, #tpu.memory_space<vmem>>, vector<1x64xf32>
    %187 = vector.broadcast %186 : vector<1x64xf32> to vector<2x64xf32>
    %188 = arith.addf %185, %187 : vector<2x64xf32>
    %cst_196 = arith.constant 0.000000e+00 : f32
    %189 = vector.broadcast %cst_196 : f32 to vector<2x64xf32>
    %190 = arith.maximumf %188, %189 : vector<2x64xf32>
    %c0_197 = arith.constant 0 : index
    %c0_198 = arith.constant 0 : index
    %c0_199 = arith.constant 0 : index
    %191 = vector.load %arg11[%c0_197, %c0_198, %c0_199] : memref<1x64x256xf32, #tpu.memory_space<vmem>>, vector<1x64x256xf32>
    %192 = vector.shape_cast %191 : vector<1x64x256xf32> to vector<64x256xf32>
    %cst_200 = arith.constant dense<0.000000e+00> : vector<2x256xf32>
    %193 = tpu.matmul %190, %192, %cst_200 {dimension_numbers = #tpu.dot_dimension_numbers<[1], [0], [0], [1], [0, 0, 1, 1], [], []>} : vector<2x64xf32>, vector<64x256xf32>, vector<2x256xf32> -> vector<2x256xf32>
    %c0_201 = arith.constant 0 : index
    %c0_202 = arith.constant 0 : index
    %194 = vector.load %arg12[%c0_201, %c0_202] : memref<1x256xf32, #tpu.memory_space<vmem>>, vector<1x256xf32>
    %195 = vector.broadcast %194 : vector<1x256xf32> to vector<2x256xf32>
    %196 = arith.addf %193, %195 : vector<2x256xf32>
    %cst_203 = arith.constant 0.000000e+00 : f32
    %197 = vector.broadcast %cst_203 : f32 to vector<2x256xf32>
    %198 = arith.maximumf %196, %197 : vector<2x256xf32>
    %c0_204 = arith.constant 0 : index
    %c0_205 = arith.constant 0 : index
    %199 = vector.load %arg13[%c0_204, %c0_205] : memref<256x6xf32, #tpu.memory_space<vmem>>, vector<256x6xf32>
    %cst_206 = arith.constant dense<0.000000e+00> : vector<2x6xf32>
    %200 = tpu.matmul %198, %199, %cst_206 {dimension_numbers = #tpu.dot_dimension_numbers<[1], [0], [0], [1], [0, 0, 1, 1], [], []>} : vector<2x256xf32>, vector<256x6xf32>, vector<2x6xf32> -> vector<2x6xf32>
    %c0_207 = arith.constant 0 : index
    %c0_208 = arith.constant 0 : index
    %201 = vector.load %arg14[%c0_207, %c0_208] : memref<1x6xf32, #tpu.memory_space<vmem>>, vector<1x6xf32>
    %202 = vector.broadcast %201 : vector<1x6xf32> to vector<2x6xf32>
    %203 = arith.addf %200, %202 : vector<2x6xf32>
    %cst_209 = arith.constant dense<0xFF800000> : vector<2xf32>
    %204 = vector.multi_reduction <maximumf>, %203, %cst_209 [1] : vector<2x6xf32> to vector<2xf32>
    %205 = vector.shape_cast %204 : vector<2xf32> to vector<2x1xf32>
    %206 = vector.broadcast %205 : vector<2x1xf32> to vector<2x6xf32>
    %207 = arith.subf %203, %206 : vector<2x6xf32>
    %208 = math.exp %207 : vector<2x6xf32>
    %cst_210 = arith.constant dense<0.000000e+00> : vector<2xf32>
    %209 = vector.multi_reduction <add>, %208, %cst_210 [1] : vector<2x6xf32> to vector<2xf32>
    %210 = vector.shape_cast %209 : vector<2xf32> to vector<2x1xf32>
    %211 = vector.broadcast %210 : vector<2x1xf32> to vector<2x6xf32>
    %212 = arith.divf %208, %211 : vector<2x6xf32>
    %c0_211 = arith.constant 0 : index
    %c0_212 = arith.constant 0 : index
    %213 = vector.load %arg15[%c0_211, %c0_212] : memref<2x6xf32, #tpu.memory_space<vmem>>, vector<2x6xf32>
    tpu.vector_store %arg15[%c0_211, %c0_212], %212 {strides = array<i32>} : memref<2x6xf32, #tpu.memory_space<vmem>>, vector<2x6xf32>,
    return
  }
  func.func @transform_0(%arg0: i32) -> (i32, i32) {
    %c0_i32 = arith.constant 0 : i32
    %c0_i32_0 = arith.constant 0 : i32
    return %arg0, %c0_i32 : i32, i32
  }
  func.func @transform_1(%arg0: i32) -> (i32, i32) {
    %c0_i32 = arith.constant 0 : i32
    %c0_i32_0 = arith.constant 0 : i32
    %c0_i32_1 = arith.constant 0 : i32
    return %c0_i32, %c0_i32_0 : i32, i32
  }
  func.func @transform_2(%arg0: i32) -> (i32, i32) {
    %c0_i32 = arith.constant 0 : i32
    %c0_i32_0 = arith.constant 0 : i32
    %c0_i32_1 = arith.constant 0 : i32
    return %c0_i32, %c0_i32_0 : i32, i32
  }
  func.func @transform_3(%arg0: i32) -> (i32, i32, i32) {
    %c0_i32 = arith.constant 0 : i32
    %c0_i32_0 = arith.constant 0 : i32
    %c0_i32_1 = arith.constant 0 : i32
    %c0_i32_2 = arith.constant 0 : i32
    return %c0_i32, %c0_i32_0, %c0_i32_1 : i32, i32, i32
  }
  func.func @transform_4(%arg0: i32) -> (i32, i32, i32) {
    %c0_i32 = arith.constant 0 : i32
    %c0_i32_0 = arith.constant 0 : i32
    %c0_i32_1 = arith.constant 0 : i32
    %c0_i32_2 = arith.constant 0 : i32
    return %c0_i32, %c0_i32_0, %c0_i32_1 : i32, i32, i32
  }
  func.func @transform_5(%arg0: i32) -> (i32, i32) {
    %c0_i32 = arith.constant 0 : i32
    %c0_i32_0 = arith.constant 0 : i32
    %c0_i32_1 = arith.constant 0 : i32
    return %c0_i32, %c0_i32_0 : i32, i32
  }
  func.func @transform_6(%arg0: i32) -> (i32, i32, i32) {
    %c0_i32 = arith.constant 0 : i32
    %c0_i32_0 = arith.constant 0 : i32
    %c0_i32_1 = arith.constant 0 : i32
    %c0_i32_2 = arith.constant 0 : i32
    return %c0_i32, %c0_i32_0, %c0_i32_1 : i32, i32, i32
  }
  func.func @transform_7(%arg0: i32) -> (i32, i32, i32) {
    %c0_i32 = arith.constant 0 : i32
    %c0_i32_0 = arith.constant 0 : i32
    %c0_i32_1 = arith.constant 0 : i32
    %c0_i32_2 = arith.constant 0 : i32
    return %c0_i32, %c0_i32_0, %c0_i32_1 : i32, i32, i32
  }
  func.func @transform_8(%arg0: i32) -> (i32, i32) {
    %c0_i32 = arith.constant 0 : i32
    %c0_i32_0 = arith.constant 0 : i32
    %c0_i32_1 = arith.constant 0 : i32
    return %c0_i32, %c0_i32_0 : i32, i32
  }
  func.func @transform_9(%arg0: i32) -> (i32, i32, i32) {
    %c0_i32 = arith.constant 0 : i32
    %c0_i32_0 = arith.constant 0 : i32
    %c0_i32_1 = arith.constant 0 : i32
    %c0_i32_2 = arith.constant 0 : i32
    return %c0_i32, %c0_i32_0, %c0_i32_1 : i32, i32, i32
  }
  func.func @transform_10(%arg0: i32) -> (i32, i32, i32) {
    %c0_i32 = arith.constant 0 : i32
    %c0_i32_0 = arith.constant 0 : i32
    %c0_i32_1 = arith.constant 0 : i32
    %c0_i32_2 = arith.constant 0 : i32
    return %c0_i32, %c0_i32_0, %c0_i32_1 : i32, i32, i32
  }
  func.func @transform_11(%arg0: i32) -> (i32, i32) {
    %c0_i32 = arith.constant 0 : i32
    %c0_i32_0 = arith.constant 0 : i32
    %c0_i32_1 = arith.constant 0 : i32
    return %c0_i32, %c0_i32_0 : i32, i32
  }
  func.func @transform_12(%arg0: i32) -> (i32, i32) {
    %c0_i32 = arith.constant 0 : i32
    %c0_i32_0 = arith.constant 0 : i32
    %c0_i32_1 = arith.constant 0 : i32
    return %c0_i32, %c0_i32_0 : i32, i32
  }
  func.func @transform_13(%arg0: i32) -> (i32, i32) {
    %c0_i32 = arith.constant 0 : i32
    %c0_i32_0 = arith.constant 0 : i32
    %c0_i32_1 = arith.constant 0 : i32
    return %c0_i32, %c0_i32_0 : i32, i32
  }
  func.func @transform_14(%arg0: i32) -> (i32, i32) {
    %c0_i32 = arith.constant 0 : i32
    %c0_i32_0 = arith.constant 0 : i32
    return %arg0, %c0_i32 : i32, i32
  }
}

</mosaic_0001>

<bundles_post_ra>
// kernel: shapley_estimator_forward.1
= control target key start
LH: loop header
LB: loop body
LE: loop exit
PB: predicated region body
PF: predicated region fallthrough
CT: control target
= control target key end

     0   :  { %s9406_s0 = inlined_call_operand.vmem [shape: f32[128,256], index: 0, kind: input, shape index: {}]   ;;  %s9407_s1 = inlined_call_operand.vmem [shape: f32[256,32], index: 1, kind: input, shape index: {}]   ;;  %s9408_s2 = inlined_call_operand.vmem [shape: f32[1,32], index: 2, kind: input, shape index: {}]   ;;  %s9409_s3 = inlined_call_operand.vmem [shape: f32[16,18,128], index: 3, kind: input, shape index: {}]   ;;  %s9410_s4 = inlined_call_operand.vmem [shape: f32[16,32,64], index: 4, kind: input, shape index: {}]   ;;  %s9411_s5 = inlined_call_operand.vmem [shape: f32[1,64], index: 5, kind: input, shape index: {}]   ;;  %s9412_s6 = inlined_call_operand.vmem [shape: f32[9,2,18], index: 6, kind: input, shape index: {}]   ;;  %s9413_s7 = inlined_call_operand.vmem [shape: f32[9,64,64], index: 7, kind: input, shape index: {}]   ;;  %s9414_s8 = inlined_call_operand.vmem [shape: f32[1,64], index: 8, kind: input, shape index: {}]   ;;  %s9415_s9 = inlined_call_operand.vmem [shape: f32[1,2,2], index: 9, kind: input, shape index: {}]   ;;  %s9416_s10 = inlined_call_operand.vmem [shape: f32[1,64,256], index: 10, kind: input, shape index: {}]   ;;  %s9417_s11 = inlined_call_operand.vmem [shape: f32[1,256], index: 11, kind: input, shape index: {}]   ;;  %s9418_s12 = inlined_call_operand.vmem [shape: f32[256,6], index: 12, kind: input, shape index: {}]   ;;  %s9419_s13 = inlined_call_operand.vmem [shape: f32[1,6], index: 13, kind: input, shape index: {}]   ;;  %s9420_s14 = inlined_call_operand.hbm [shape: f32[2,6], index: 14, kind: output, shape index: {}]  }
   0x1   :  { %v96_v0 = vld [vmem:[%s9407_s1 + $0x80] sm:$0xff]  ;;  %v97_v1 = vld [vmem:[%s9407_s1 + $0x88] sm:$0xff]  ;;  %v98_v5 = vld [vmem:[%s9407_s1 + $0x90] sm:$0xff] }
   0x2   :  { %v80_v2 = vld [vmem:[%s9407_s1] sm:$0xff]  ;;  %v6940_v3 = vpack.c.bf16 %v97_v1, %v96_v0  ;;  %v81_v4 = vld [vmem:[%s9407_s1 + $0x8] sm:$0xff]  ;;  %v99_v6 = vld [vmem:[%s9407_s1 + $0x98] sm:$0xff] }
   0x3   :  { %v6942_v7 = vpack.c.bf16 %v81_v4, %v80_v2  ;;  %v6944_v8 = vpack.c.bf16 %v99_v6, %v98_v5  ;;  %v82_v9 = vld [vmem:[%s9407_s1 + $0x10] sm:$0xff]  ;;  %v83_v10 = vld [vmem:[%s9407_s1 + $0x18] sm:$0xff]  ;;  %v100_v11 = vld [vmem:[%s9407_s1 + $0xa0] sm:$0xff] }
   0x4   :  { %6941 = vmatprep.subr.bf16.mxu0 %v6940_v3  ;;  %v101_v12 = vld [vmem:[%s9407_s1 + $0xa8] sm:$0xff]  ;;  %v6946_v13 = vpack.c.bf16 %v83_v10, %v82_v9  ;;  %v84_v15 = vld [vmem:[%s9407_s1 + $0x20] sm:$0xff]  ;;  %v102_v17 = vld [vmem:[%s9407_s1 + $0xb0] sm:$0xff] }
   0x5   :  { %6943 = vmatpush3.bf16.msra.mxu0 %v6942_v7  ;;  %v6948_v14 = vpack.c.bf16 %v101_v12, %v100_v11  ;;  %v85_v16 = vld [vmem:[%s9407_s1 + $0x28] sm:$0xff]  ;;  %v103_v18 = vld [vmem:[%s9407_s1 + $0xb8] sm:$0xff]  ;;  %v86_v21 = vld [vmem:[%s9407_s1 + $0x30] sm:$0xff] }
   0x6   :  { %6945 = vmatprep.subr.bf16.mxu0 %v6944_v8  ;;  %v6950_v19 = vpack.c.bf16 %v85_v16, %v84_v15  ;;  %v6952_v20 = vpack.c.bf16 %v103_v18, %v102_v17  ;;  %v87_v22 = vld [vmem:[%s9407_s1 + $0x38] sm:$0xff]  ;;  %v104_v23 = vld [vmem:[%s9407_s1 + $0xc0] sm:$0xff]  ;;  %v105_v24 = vld [vmem:[%s9407_s1 + $0xc8] sm:$0xff] }
   0x7   :  { %v49_v25 = vld [vmem:[%s9406_s0 + $0x8] sm:$0xff]  ;;  %v6954_v26 = vpack.c.bf16 %v87_v22, %v86_v21  ;;  %v6956_v27 = vpack.c.bf16 %v105_v24, %v104_v23  ;;  %v88_v28 = vld [vmem:[%s9407_s1 + $0x40] sm:$0xff]  ;;  %v106_v30 = vld [vmem:[%s9407_s1 + $0xd0] sm:$0xff] }
   0x8   :  { %183 = vmatprep.mubr.f32.mxu0 %v49_v25  ;;  %v89_v29 = vld [vmem:[%s9407_s1 + $0x48] sm:$0xff]  ;;  %v107_v31 = vld [vmem:[%s9407_s1 + $0xd8] sm:$0xff]  ;;  %v90_v34 = vld [vmem:[%s9407_s1 + $0x50] sm:$0xff] }
   0x9   :  { %6947 = vmatpush3.bf16.msra.mxu0 %v6946_v13  ;;  %v6958_v32 = vpack.c.bf16 %v89_v29, %v88_v28  ;;  %v6960_v33 = vpack.c.bf16 %v107_v31, %v106_v30  ;;  %v91_v35 = vld [vmem:[%s9407_s1 + $0x58] sm:$0xff]  ;;  %v108_v36 = vld [vmem:[%s9407_s1 + $0xe0] sm:$0xff]  ;;  %v109_v37 = vld [vmem:[%s9407_s1 + $0xe8] sm:$0xff] }
   0xa   :  { %6949 = vmatprep.subr.bf16.mxu0 %v6948_v14  ;;  %v6962_v38 = vpack.c.bf16 %v91_v35, %v90_v34  ;;  %v6964_v39 = vpack.c.bf16 %v109_v37, %v108_v36  ;;  %v92_v40 = vld [vmem:[%s9407_s1 + $0x60] sm:$0xff]  ;;  %v93_v41 = vld [vmem:[%s9407_s1 + $0x68] sm:$0xff] }
   0xd   :  { %6951 = vmatpush3.bf16.msra.mxu0 %v6950_v19 }
   0xe   :  { %6953 = vmatprep.subr.bf16.mxu0 %v6952_v20 }
  0x11   :  { %6955 = vmatpush3.bf16.msra.mxu0 %v6954_v26 }
  0x12   :  { %6957 = vmatprep.subr.bf16.mxu0 %v6956_v27 }
  0x15   :  { %6959 = vmatpush3.bf16.msra.mxu0 %v6958_v32 }
  0x16   :  { %6961 = vmatprep.subr.bf16.mxu0 %v6960_v33 }
  0x17   :  { %19 = vsyncpa [#allocation3], 0  ;;  %v110_v42 = vld [vmem:[%s9407_s1 + $0xf0] sm:$0xff]  ;;  %v111_v43 = vld [vmem:[%s9407_s1 + $0xf8] sm:$0xff]  ;;  %v6966_v44 = vpack.c.bf16 %v93_v41, %v92_v40  ;;  %v7667_v16 = vmov 0.0|0.0   ;;  %vm7668_vm0 = vmmov 0  }
  0x18   :  { %v6968_v45 = vpack.c.bf16 %v111_v43, %v110_v42  ;;  %v94_v46 = vld [vmem:[%s9407_s1 + $0x70] sm:$0xff]  ;;  %v95_v47 = vld [vmem:[%s9407_s1 + $0x78] sm:$0xff]  ;;  %v48_v49 = vld [vmem:[%s9406_s0] sm:$0xff]  ;;  %6972 = vmatprep.subr.bf16.mxu1 %v7667_v16  ;;  %v7669_v17 = vmov 0.0   ;;  %vm456_vm1 = vcmask 261120   ;;  %vm3187_vm2 = vcmask 1041408  }
  0x19   :  { %6963 = vmatpush3.bf16.msra.mxu0 %v6962_v38  ;;  %v6970_v48 = vpack.c.bf16 %v95_v47, %v94_v46  ;;  %v51_v50 = vld [vmem:[%s9406_s0 + $0x18] sm:$0xff]  ;;  %v50_v51 = vld [vmem:[%s9406_s0 + $0x10] sm:$0xff]  ;;  %v53_v52 = vld [vmem:[%s9406_s0 + $0x28] sm:$0xff]  ;;  %5792 = vmatprep.mubr.msk.f32.mxu1 %vm7668_vm0, %v7669_v17  ;;  %vm3183_vm3 = vcmask 146432   ;;  %vm3353_vm4 = vcmask 523264   ;;  %vm4828_vm5 = vcmask 41984  }
  0x1a   :  { %6965 = vmatprep.subr.bf16.mxu0 %v6964_v39  ;;  %v52_v53 = vld [vmem:[%s9406_s0 + $0x20] sm:$0xff]  ;;  %v55_v54 = vld [vmem:[%s9406_s0 + $0x38] sm:$0xff]  ;;  %v54_v55 = vld [vmem:[%s9406_s0 + $0x30] sm:$0xff] }
  0x1b   :  { %v57_v56 = vld [vmem:[%s9406_s0 + $0x48] sm:$0xff]  ;;  %v56_v57 = vld [vmem:[%s9406_s0 + $0x40] sm:$0xff]  ;;  %v59_v58 = vld [vmem:[%s9406_s0 + $0x58] sm:$0xff] }
  0x1c   :  { %v58_v59 = vld [vmem:[%s9406_s0 + $0x50] sm:$0xff]  ;;  %v61_v60 = vld [vmem:[%s9406_s0 + $0x68] sm:$0xff]  ;;  %v60_v61 = vld [vmem:[%s9406_s0 + $0x60] sm:$0xff] }
  0x1d   :  { %6967 = vmatpush3.bf16.msra.mxu0 %v6966_v44  ;;  %v63_v62 = vld [vmem:[%s9406_s0 + $0x78] sm:$0xff]  ;;  %v62_v63 = vld [vmem:[%s9406_s0 + $0x70] sm:$0xff]  ;;  %v65_v0 = vld [vmem:[%s9406_s0 + $0x88] sm:$0xff] }
  0x1e   :  { %6969 = vmatprep.subr.bf16.mxu0 %v6968_v45  ;;  %v64_v1 = vld [vmem:[%s9406_s0 + $0x80] sm:$0xff]  ;;  %v67_v2 = vld [vmem:[%s9406_s0 + $0x98] sm:$0xff]  ;;  %v66_v3 = vld [vmem:[%s9406_s0 + $0x90] sm:$0xff] }
  0x1f   :  { %v69_v4 = vld [vmem:[%s9406_s0 + $0xa8] sm:$0xff]  ;;  %v68_v5 = vld [vmem:[%s9406_s0 + $0xa0] sm:$0xff]  ;;  %v71_v6 = vld [vmem:[%s9406_s0 + $0xb8] sm:$0xff] }
  0x20   :  { %v70_v7 = vld [vmem:[%s9406_s0 + $0xb0] sm:$0xff]  ;;  %v73_v8 = vld [vmem:[%s9406_s0 + $0xc8] sm:$0xff]  ;;  %v72_v9 = vld [vmem:[%s9406_s0 + $0xc0] sm:$0xff] }
  0x21   :  { %6971 = vmatpush3.bf16.msra.mxu0 %v6970_v48  ;;  %v75_v10 = vld [vmem:[%s9406_s0 + $0xd8] sm:$0xff]  ;;  %v74_v11 = vld [vmem:[%s9406_s0 + $0xd0] sm:$0xff]  ;;  %v77_v12 = vld [vmem:[%s9406_s0 + $0xe8] sm:$0xff] }
  0x22   :  { %v76_v13 = vld [vmem:[%s9406_s0 + $0xe0] sm:$0xff]  ;;  %v79_v14 = vld [vmem:[%s9406_s0 + $0xf8] sm:$0xff]  ;;  %v78_v15 = vld [vmem:[%s9406_s0 + $0xf0] sm:$0xff]  ;;  %7032 = vmatprep.subr.bf16.mxu0 %v7667_v16 }
  0x23   :  { %v7947_v21 = vld [vmem:[%s9408_s2] ss:$0 sm:$0xff] }
  0x24   :  { %184 = vmatmul.mubr.f32.vlgmr.msra.gmra.mrb[0].mxu0 %v48_v49 }
  0x25   :  { %188 = vmatprep.mubr.f32.mxu0 %v51_v50 }
  0x28   :  { %189 = vmatmul.mubr.f32.gmra.mrb[2].mxu0 %v50_v51 }
  0x29   :  { %193 = vmatprep.mubr.f32.mxu0 %v53_v52 }
  0x2c   :  { %194 = vmatmul.mubr.f32.gmra.mrb[4].mxu0 %v52_v53 }
  0x2d   :  { %198 = vmatprep.mubr.f32.mxu0 %v55_v54 }
  0x30   :  { %199 = vmatmul.mubr.f32.gmra.mrb[6].mxu0 %v54_v55 }
  0x31   :  { %203 = vmatprep.mubr.f32.mxu0 %v57_v56 }
  0x34   :  { %204 = vmatmul.mubr.f32.gmra.mrb[8].mxu0 %v56_v57 }
  0x35   :  { %208 = vmatprep.mubr.f32.mxu0 %v59_v58 }
  0x38   :  { %209 = vmatmul.mubr.f32.gmra.mrb[10].mxu0 %v58_v59 }
  0x39   :  { %213 = vmatprep.mubr.f32.mxu0 %v61_v60 }
  0x3c   :  { %214 = vmatmul.mubr.f32.gmra.mrb[12].mxu0 %v60_v61 }
  0x3d   :  { %218 = vmatprep.mubr.f32.mxu0 %v63_v62 }
  0x40   :  { %219 = vmatmul.mubr.f32.gmra.mrb[14].mxu0 %v62_v63 }
  0x41   :  { %223 = vmatprep.mubr.f32.mxu0 %v65_v0 }
  0x44   :  { %224 = vmatmul.mubr.f32.gmra.mrb[16].mxu0 %v64_v1 }
  0x45   :  { %228 = vmatprep.mubr.f32.mxu0 %v67_v2 }
  0x48   :  { %229 = vmatmul.mubr.f32.gmra.mrb[18].mxu0 %v66_v3 }
  0x49   :  { %233 = vmatprep.mubr.f32.mxu0 %v69_v4 }
  0x4c   :  { %234 = vmatmul.mubr.f32.gmra.mrb[20].mxu0 %v68_v5 }
  0x4d   :  { %238 = vmatprep.mubr.f32.mxu0 %v71_v6 }
  0x50   :  { %239 = vmatmul.mubr.f32.gmra.mrb[22].mxu0 %v70_v7 }
  0x51   :  { %243 = vmatprep.mubr.f32.mxu0 %v73_v8 }
  0x54   :  { %244 = vmatmul.mubr.f32.gmra.mrb[24].mxu0 %v72_v9 }
  0x55   :  { %248 = vmatprep.mubr.f32.mxu0 %v75_v10 }
  0x58   :  { %249 = vmatmul.mubr.f32.gmra.mrb[26].mxu0 %v74_v11 }
  0x59   :  { %253 = vmatprep.mubr.f32.mxu0 %v77_v12 }
  0x5c   :  { %254 = vmatmul.mubr.f32.gmra.mrb[28].mxu0 %v76_v13 }
  0x5d   :  { %258 = vmatprep.mubr.f32.mxu0 %v79_v14 }
  0x60   :  { %259 = vmatmul.mubr.f32.gmra.mrb[30].mxu0 %v78_v15 }
  0x61   :  { %5908 = vmatprep.mubr.msk.f32.mxu0 %vm7668_vm0, %v7669_v17 }
  0xf7   :  { %v5144_v18 = vpop.f32.mrb[0].mxu0 }
  0xf8   :  { %v5145_v19 = vpop.f32.mrb[1].mxu0 }
  0xf9   :  { %v5146_v20 = vadd.f32 %v5145_v19, %v5144_v18 }
  0xfb   :  { %v5147_v22 = vpop.f32.mrb[2].mxu0  ;;  %v186_v24 = vadd.f32 %v5146_v20, %v7947_v21 }
  0xfc   :  { %v5148_v23 = vpop.f32.mrb[3].mxu0 }
  0xfd   :  { %v5149_v25 = vadd.f32 %v5148_v23, %v5147_v22  ;;  %v264_v29 = vmax.f32 %v186_v24, 0.0 }
  0xff   :  { %v191_v26 = vadd.f32 %v5149_v25, %v7947_v21  ;;  %v5150_v27 = vpop.f32.mrb[4].mxu0 }
 0x100   :  { %v5151_v28 = vpop.f32.mrb[5].mxu0 }
 0x101   :  { %v265_v30 = vmax.f32 %v191_v26, 0.0  ;;  %v5152_v31 = vadd.f32 %v5151_v28, %v5150_v27 }
 0x103   :  { %v7951_v32 = vpack.c.bf16 %v265_v30, %v264_v29  ;;  %v5153_v33 = vpop.f32.mrb[6].mxu0  ;;  %v196_v35 = vadd.f32 %v5152_v31, %v7947_v21 }
 0x104   :  { %v5154_v34 = vpop.f32.mrb[7].mxu0 }
 0x105   :  { %v5155_v36 = vadd.f32 %v5154_v34, %v5153_v33  ;;  %6974 = vmatpush3.bf16.msra.mxu1 %v7951_v32  ;;  %7034 = vmatpush3.bf16.msra.mxu0 %v7951_v32  ;;  %v266_v40 = vmax.f32 %v196_v35, 0.0 }
 0x106   :  { %6975 = vmatprep.subr.bf16.mxu1 %v7667_v16  ;;  %7035 = vmatprep.subr.bf16.mxu0 %v7667_v16 }
 0x107   :  { %v201_v37 = vadd.f32 %v5155_v36, %v7947_v21  ;;  %v5156_v38 = vpop.f32.mrb[8].mxu0 }
 0x108   :  { %v5157_v39 = vpop.f32.mrb[9].mxu0 }
 0x109   :  { %v267_v41 = vmax.f32 %v201_v37, 0.0  ;;  %v5158_v42 = vadd.f32 %v5157_v39, %v5156_v38 }
 0x10b   :  { %v7959_v43 = vpack.c.bf16 %v267_v41, %v266_v40  ;;  %v5159_v44 = vpop.f32.mrb[10].mxu0  ;;  %v206_v46 = vadd.f32 %v5158_v42, %v7947_v21 }
 0x10c   :  { %v5160_v45 = vpop.f32.mrb[11].mxu0 }
 0x10d   :  { %v5161_v47 = vadd.f32 %v5160_v45, %v5159_v44  ;;  %6977 = vmatpush3.bf16.msra.mxu1 %v7959_v43  ;;  %7037 = vmatpush3.bf16.msra.mxu0 %v7959_v43  ;;  %v268_v51 = vmax.f32 %v206_v46, 0.0 }
 0x10e   :  { %6978 = vmatprep.subr.bf16.mxu1 %v7667_v16  ;;  %7038 = vmatprep.subr.bf16.mxu0 %v7667_v16 }
 0x10f   :  { %v211_v48 = vadd.f32 %v5161_v47, %v7947_v21  ;;  %v5162_v49 = vpop.f32.mrb[12].mxu0 }
 0x110   :  { %v5163_v50 = vpop.f32.mrb[13].mxu0 }
 0x111   :  { %v269_v52 = vmax.f32 %v211_v48, 0.0  ;;  %v5164_v53 = vadd.f32 %v5163_v50, %v5162_v49  ;;  %v4872_v48 = vld [vmem:[%s9410_s4 + $0x40] sm:$0xff]  ;;  %v4873_v49 = vld [vmem:[%s9410_s4 + $0x48] sm:$0xff] }
 0x112   :  { %v280_v50 = vld [vmem:[%s9409_s3] sm:$0xff] }
 0x113   :  { %v7967_v54 = vpack.c.bf16 %v269_v52, %v268_v51  ;;  %v5165_v55 = vpop.f32.mrb[14].mxu0  ;;  %v216_v57 = vadd.f32 %v5164_v53, %v7947_v21  ;;  %v7057_v51 = vpack.c.bf16 %v4873_v49, %v4872_v48  ;;  %v4870_v52 = vld [vmem:[%s9409_s3 + $0x38] sm:$0xff]  ;;  %v281_v53 = vld [vmem:[%s9409_s3 + $0x8] sm:$0xff] }
 0x114   :  { %v5166_v56 = vpop.f32.mrb[15].mxu0 }
 0x115   :  { %v5167_v58 = vadd.f32 %v5166_v56, %v5165_v55  ;;  %6980 = vmatpush3.bf16.msra.mxu1 %v7967_v54  ;;  %7040 = vmatpush3.bf16.msra.mxu0 %v7967_v54  ;;  %v270_v62 = vmax.f32 %v216_v57, 0.0  ;;  %v4874_v55 = vld [vmem:[%s9410_s4 + $0x50] sm:$0xff]  ;;  %v4875_v56 = vld [vmem:[%s9410_s4 + $0x58] sm:$0xff]  ;;  %v4871_v57 = vld [vmem:[%s9409_s3 + $0x40] sm:$0x3] }
 0x116   :  { %6981 = vmatprep.subr.bf16.mxu1 %v7667_v16  ;;  %7041 = vmatprep.subr.bf16.mxu0 %v7667_v16 }
 0x117   :  { %v221_v59 = vadd.f32 %v5167_v58, %v7947_v21  ;;  %v5168_v60 = vpop.f32.mrb[16].mxu0  ;;  %v282_v58 = vld [vmem:[%s9409_s3 + $0x10] sm:$0x3] }
 0x118   :  { %v5169_v61 = vpop.f32.mrb[17].mxu0 }
 0x119   :  { %v271_v63 = vmax.f32 %v221_v59, 0.0  ;;  %v5170_v0 = vadd.f32 %v5169_v61, %v5168_v60  ;;  %v7060_v59 = vpack.c.bf16 %v4875_v56, %v4874_v55  ;;  %v4856_v60 = vld [vmem:[%s9409_s3 + $0x18] sm:$0xff]  ;;  %v4857_v61 = vld [vmem:[%s9409_s3 + $0x20] sm:$0xff] }
 0x11b   :  { %v7975_v1 = vpack.c.bf16 %v271_v63, %v270_v62  ;;  %v5171_v2 = vpop.f32.mrb[18].mxu0  ;;  %v226_v4 = vadd.f32 %v5170_v0, %v7947_v21  ;;  %v4858_v62 = vld [vmem:[%s9409_s3 + $0x28] sm:$0x3]  ;;  %v4859_v63 = vld [vmem:[%s9410_s4 + $0x20] sm:$0xff] }
 0x11c   :  { %v5172_v3 = vpop.f32.mrb[19].mxu0  ;;  %v4860_v0 = vld [vmem:[%s9410_s4 + $0x28] sm:$0xff] }
 0x11d   :  { %v5173_v5 = vadd.f32 %v5172_v3, %v5171_v2  ;;  %6983 = vmatpush3.bf16.msra.mxu1 %v7975_v1  ;;  %7043 = vmatpush3.bf16.msra.mxu0 %v7975_v1  ;;  %v272_v9 = vmax.f32 %v226_v4, 0.0  ;;  %v7021_v2 = vpack.c.bf16 %v4860_v0, %v4859_v63  ;;  %v4861_v3 = vld [vmem:[%s9410_s4 + $0x30] sm:$0xff]  ;;  %v4862_v4 = vld [vmem:[%s9410_s4 + $0x38] sm:$0xff] }
 0x11e   :  { %6984 = vmatprep.subr.bf16.mxu1 %v7667_v16  ;;  %7044 = vmatprep.subr.bf16.mxu0 %v7667_v16 }
 0x11f   :  { %v231_v6 = vadd.f32 %v5173_v5, %v7947_v21  ;;  %v5174_v7 = vpop.f32.mrb[20].mxu0  ;;  %v7024_v5 = vpack.c.bf16 %v4862_v4, %v4861_v3 }
 0x120   :  { %v5175_v8 = vpop.f32.mrb[21].mxu0 }
 0x121   :  { %v273_v10 = vmax.f32 %v231_v6, 0.0  ;;  %v5176_v11 = vadd.f32 %v5175_v8, %v5174_v7 }
 0x123   :  { %v7983_v12 = vpack.c.bf16 %v273_v10, %v272_v9  ;;  %v5177_v13 = vpop.f32.mrb[22].mxu0  ;;  %v236_v15 = vadd.f32 %v5176_v11, %v7947_v21 }
 0x124   :  { %v5178_v14 = vpop.f32.mrb[23].mxu0 }
 0x125   :  { %v5179_v18 = vadd.f32 %v5178_v14, %v5177_v13  ;;  %6986 = vmatpush3.bf16.msra.mxu1 %v7983_v12  ;;  %7046 = vmatpush3.bf16.msra.mxu0 %v7983_v12  ;;  %v274_v23 = vmax.f32 %v236_v15, 0.0 }
 0x126   :  { %6987 = vmatprep.subr.bf16.mxu1 %v7667_v16  ;;  %7047 = vmatprep.subr.bf16.mxu0 %v7667_v16 }
 0x127   :  { %v241_v19 = vadd.f32 %v5179_v18, %v7947_v21  ;;  %v5180_v20 = vpop.f32.mrb[24].mxu0 }
 0x128   :  { %v5181_v22 = vpop.f32.mrb[25].mxu0 }
 0x129   :  { %v275_v24 = vmax.f32 %v241_v19, 0.0  ;;  %v5182_v25 = vadd.f32 %v5181_v22, %v5180_v20  ;;  %v363_v22 = vld [vmem:[%s9410_s4] sm:$0xff] }
 0x12b   :  { %v7991_v26 = vpack.c.bf16 %v275_v24, %v274_v23  ;;  %v5183_v27 = vpop.f32.mrb[26].mxu0  ;;  %v246_v29 = vadd.f32 %v5182_v25, %v7947_v21  ;;  %v364_v23 = vld [vmem:[%s9410_s4 + $0x8] sm:$0xff] }
 0x12c   :  { %v5184_v28 = vpop.f32.mrb[27].mxu0  ;;  %v4879_v24 = vld [vmem:[%s9409_s3 + $0x48] sm:$0xff]  ;;  %v7027_v25 = vpack.c.bf16 %v364_v23, %v363_v22  ;;  %v4892_v22 = vld [vmem:[%s9410_s4 + $0x80] sm:$0xff] }
 0x12d   :  { %v5185_v30 = vadd.f32 %v5184_v28, %v5183_v27  ;;  %6989 = vmatpush3.bf16.msra.mxu1 %v7991_v26  ;;  %7049 = vmatpush3.bf16.msra.mxu0 %v7991_v26  ;;  %v276_v35 = vmax.f32 %v246_v29, 0.0  ;;  %v365_v28 = vld [vmem:[%s9410_s4 + $0x10] sm:$0xff]  ;;  %v366_v29 = vld [vmem:[%s9410_s4 + $0x18] sm:$0xff]  ;;  %v4893_v23 = vld [vmem:[%s9410_s4 + $0x88] sm:$0xff] }
 0x12e   :  { %6990 = vmatprep.subr.bf16.mxu1 %v7667_v16  ;;  %7050 = vmatprep.subr.bf16.mxu0 %v7667_v16 }
 0x12f   :  { %v251_v31 = vadd.f32 %v5185_v30, %v7947_v21  ;;  %v5186_v33 = vpop.f32.mrb[28].mxu0 }
 0x130   :  { %v5187_v34 = vpop.f32.mrb[29].mxu0 }
 0x131   :  { %v277_v36 = vmax.f32 %v251_v31, 0.0  ;;  %v5188_v37 = vadd.f32 %v5187_v34, %v5186_v33  ;;  %v4880_v31 = vld [vmem:[%s9409_s3 + $0x50] sm:$0xff]  ;;  %v7030_v33 = vpack.c.bf16 %v366_v29, %v365_v28 }
 0x133   :  { %v7999_v38 = vpack.c.bf16 %v277_v36, %v276_v35  ;;  %v5189_v39 = vpop.f32.mrb[30].mxu0  ;;  %v256_v41 = vadd.f32 %v5188_v37, %v7947_v21  ;;  %v4881_v36 = vld [vmem:[%s9409_s3 + $0x58] sm:$0x3] }
 0x134   :  { %v5190_v40 = vpop.f32.mrb[31].mxu0 }
 0x135   :  { %v5191_v42 = vadd.f32 %v5190_v40, %v5189_v39  ;;  %6992 = vmatpush3.bf16.msra.mxu1 %v7999_v38  ;;  %7052 = vmatpush3.bf16.msra.mxu0 %v7999_v38  ;;  %v278_v45 = vmax.f32 %v256_v41, 0.0  ;;  %v4882_v40 = vld [vmem:[%s9410_s4 + $0x60] sm:$0xff]  ;;  %v4883_v41 = vld [vmem:[%s9410_s4 + $0x68] sm:$0xff] }
 0x136   :  { %6993 = vmatprep.subr.bf16.mxu1 %v7667_v16  ;;  %7053 = vmatprep.subr.bf16.mxu0 %v7667_v16 }
 0x137   :  { %v261_v44 = vadd.f32 %v5191_v42, %v7947_v21  ;;  %v4869_v21 = vld [vmem:[%s9409_s3 + $0x30] sm:$0xff]  ;;  %v7087_v42 = vpack.c.bf16 %v4883_v41, %v4882_v40 }
 0x139   :  { %v279_v46 = vmax.f32 %v261_v44, 0.0  ;;  %v4884_v44 = vld [vmem:[%s9410_s4 + $0x70] sm:$0xff] }
 0x13b   :  { %v8007_v47 = vpack.c.bf16 %v279_v46, %v278_v45  ;;  %v4885_v45 = vld [vmem:[%s9410_s4 + $0x78] sm:$0xff] }
 0x13c   :  { %v7090_v46 = vpack.c.bf16 %v4885_v45, %v4884_v44 }
 0x13d   :  { %6995 = vmatpush3.bf16.msra.mxu1 %v8007_v47  ;;  %7055 = vmatpush3.bf16.msra.mxu0 %v8007_v47 }
 0x13e   :  { %6996 = vmatprep.subr.bf16.mxu1 %v7667_v16  ;;  %7056 = vmatprep.subr.bf16.mxu0 %v7667_v16 }
 0x140   :  { %5909 = vmatmul.mubr.f32.vlgmr.msra.gmra.mrb[32].mxu0 %v4869_v21  ;;  %5793 = vmatmul.mubr.f32.vlgmr.msra.gmra.mrb[0].mxu1 %v280_v50 }
 0x141   :  { %6998 = vmatpush3.bf16.msra.mxu1 %v7951_v32  ;;  %5911 = vmatprep.mubr.msk.f32.mxu0 %vm7668_vm0, %v7669_v17 }
 0x142   :  { %6999 = vmatprep.subr.bf16.mxu1 %v7667_v16  ;;  %5795 = vmatprep.mubr.msk.f32.mxu1 %vm7668_vm0, %v7669_v17 }
 0x143   :  { %7058 = vmatpush3.bf16.msra.mxu0 %v7057_v51 }
 0x144   :  { %5912 = vmatmul.mubr.f32.gmra.mrb[34].mxu0 %v4870_v52  ;;  %5796 = vmatmul.mubr.f32.gmra.mrb[2].mxu1 %v281_v53 }
 0x145   :  { %7001 = vmatpush3.bf16.msra.mxu1 %v7959_v43  ;;  %5914 = vmatprep.mubr.msk.f32.mxu0 %vm7668_vm0, %v7669_v17 }
 0x146   :  { %7002 = vmatprep.subr.bf16.mxu1 %v7667_v16  ;;  %5798 = vmatprep.mubr.msk.f32.mxu1 %vm7668_vm0, %v7669_v17 }
 0x147   :  { %7059 = vmatprep.subr.bf16.mxu0 %v7667_v16 }
 0x148   :  { %5915 = vmatmul.mubr.f32.gmra.mrb[36].mxu0 %v4871_v57  ;;  %5799 = vmatmul.mubr.f32.gmra.mrb[4].mxu1 %v282_v58 }
 0x149   :  { %7004 = vmatpush3.bf16.msra.mxu1 %v7967_v54  ;;  %5833 = vmatprep.mubr.msk.f32.mxu1 %vm7668_vm0, %v7669_v17 }
 0x14a   :  { %7005 = vmatprep.subr.bf16.mxu1 %v7667_v16  ;;  %7061 = vmatpush3.bf16.msra.mxu0 %v7060_v59 }
 0x14b   :  { %5925 = vmatprep.mubr.msk.f32.mxu0 %vm7668_vm0, %v7669_v17  ;;  %7062 = vmatprep.subr.bf16.mxu0 %v7667_v16 }
 0x14d   :  { %7007 = vmatpush3.bf16.msra.mxu1 %v7975_v1 }
 0x14e   :  { %7008 = vmatprep.subr.bf16.mxu1 %v7667_v16 }
 0x151   :  { %7010 = vmatpush3.bf16.msra.mxu1 %v7983_v12 }
 0x152   :  { %7011 = vmatprep.subr.bf16.mxu1 %v7667_v16 }
 0x155   :  { %7013 = vmatpush3.bf16.msra.mxu1 %v7991_v26 }
 0x156   :  { %7014 = vmatprep.subr.bf16.mxu1 %v7667_v16 }
 0x159   :  { %7016 = vmatpush3.bf16.msra.mxu1 %v7999_v38 }
 0x15a   :  { %7017 = vmatprep.subr.bf16.mxu1 %v7667_v16 }
 0x15d   :  { %7019 = vmatpush3.bf16.msra.mxu1 %v8007_v47 }
 0x15e   :  { %7020 = vmatprep.subr.bf16.mxu1 %v7667_v16 }
 0x160   :  { %5834 = vmatmul.mubr.f32.vlgmr.msra.gmra.mrb[6].mxu1 %v4856_v60 }
 0x161   :  { %5836 = vmatprep.mubr.msk.f32.mxu1 %vm7668_vm0, %v7669_v17  ;;  %7022 = vmatpush3.bf16.msra.mxu1 %v7021_v2 }
 0x162   :  { %7023 = vmatprep.subr.bf16.mxu1 %v7667_v16 }
 0x164   :  { %5837 = vmatmul.mubr.f32.gmra.mrb[8].mxu1 %v4857_v61 }
 0x165   :  { %5839 = vmatprep.mubr.msk.f32.mxu1 %vm7668_vm0, %v7669_v17  ;;  %7025 = vmatpush3.bf16.msra.mxu1 %v7024_v5 }
 0x166   :  { %7026 = vmatprep.subr.bf16.mxu1 %v7667_v16 }
 0x168   :  { %5840 = vmatmul.mubr.f32.gmra.mrb[10].mxu1 %v4858_v62 }
 0x169   :  { %5850 = vmatprep.mubr.msk.f32.mxu1 %vm7668_vm0, %v7669_v17 }
 0x213   :  { %v705_v6 = vpop.f32.mrb[32].mxu0  ;;  %v8102_v7 = vpop.f32.mrb[0].mxu1 }
 0x214   :  { %v5910_v8 = vpop.f32.mrb[33].mxu0  ;;  %5926 = vmatmul.mubr.msk.f32.vlgmr.msra.gmra.mrb[38].mxu0 %vm456_vm1, %v705_v6  ;;  %v5794_v9 = vpop.f32.mrb[1].mxu1 }
 0x215   :  { %7064 = vmatpush3.bf16.msra.mxu0 %v7951_v32  ;;  %5928 = vmatprep.mubr.msk.f32.mxu0 %vm7668_vm0, %v7669_v17 }
 0x216   :  { %7065 = vmatprep.subr.bf16.mxu0 %v7667_v16 }
 0x217   :  { %v710_v10 = vpop.f32.mrb[34].mxu0  ;;  %v354_v11 = vpop.f32.mrb[2].mxu1 }
 0x218   :  { %v5913_v13 = vpop.f32.mrb[35].mxu0  ;;  %5929 = vmatmul.mubr.msk.f32.gmra.mrb[40].mxu0 %vm456_vm1, %v710_v10  ;;  %v5797_v14 = vpop.f32.mrb[3].mxu1 }
 0x219   :  { %7067 = vmatpush3.bf16.msra.mxu0 %v7959_v43  ;;  %5931 = vmatprep.mubr.msk.f32.mxu0 %vm7668_vm0, %v7669_v17 }
 0x21a   :  { %7068 = vmatprep.subr.bf16.mxu0 %v7667_v16 }
 0x21b   :  { %v715_v15 = vpop.f32.mrb[36].mxu0  ;;  %v359_v18 = vpop.f32.mrb[4].mxu1 }
 0x21c   :  { %v5916_v19 = vpop.f32.mrb[37].mxu0  ;;  %5932 = vmatmul.mubr.msk.f32.gmra.mrb[42].mxu0 %vm456_vm1, %v715_v15  ;;  %v5800_v20 = vpop.f32.mrb[5].mxu1 }
 0x21d   :  { %7070 = vmatpush3.bf16.msra.mxu0 %v7967_v54  ;;  %5966 = vmatprep.mubr.msk.f32.mxu0 %vm7668_vm0, %v7669_v17  ;;  %v4890_v19 = vld [vmem:[%s9409_s3 + $0x68] sm:$0xff]  ;;  %v4891_v20 = vld [vmem:[%s9409_s3 + $0x70] sm:$0x3] }
 0x21e   :  { %7071 = vmatprep.subr.bf16.mxu0 %v7667_v16 }
 0x221   :  { %7073 = vmatpush3.bf16.msra.mxu0 %v7975_v1 }
 0x222   :  { %7074 = vmatprep.subr.bf16.mxu0 %v7667_v16 }
 0x225   :  { %7076 = vmatpush3.bf16.msra.mxu0 %v7983_v12 }
 0x226   :  { %7077 = vmatprep.subr.bf16.mxu0 %v7667_v16 }
 0x229   :  { %7079 = vmatpush3.bf16.msra.mxu0 %v7991_v26 }
 0x22a   :  { %7080 = vmatprep.subr.bf16.mxu0 %v7667_v16 }
 0x22d   :  { %7082 = vmatpush3.bf16.msra.mxu0 %v7999_v38 }
 0x22e   :  { %7083 = vmatprep.subr.bf16.mxu0 %v7667_v16 }
 0x231   :  { %7085 = vmatpush3.bf16.msra.mxu0 %v8007_v47 }
 0x232   :  { %7116 = vmatprep.subr.bf16.mxu0 %v7667_v16 }
 0x233   :  { %v437_v27 = vpop.f32.mrb[6].mxu1 }
 0x234   :  { %5967 = vmatmul.mubr.f32.vlgmr.msra.gmra.mrb[44].mxu0 %v4879_v24  ;;  %5851 = vmatmul.mubr.msk.f32.vlgmr.msra.gmra.mrb[12].mxu1 %vm456_vm1, %v437_v27  ;;  %v5835_v30 = vpop.f32.mrb[7].mxu1  ;;  %v4894_v24 = vld [vmem:[%s9410_s4 + $0x90] sm:$0xff]  ;;  %v4895_v27 = vld [vmem:[%s9410_s4 + $0x98] sm:$0xff] }
 0x235   :  { %5969 = vmatprep.mubr.msk.f32.mxu0 %vm7668_vm0, %v7669_v17  ;;  %5853 = vmatprep.mubr.msk.f32.mxu1 %vm7668_vm0, %v7669_v17  ;;  %v7120_v28 = vpack.c.bf16 %v4895_v27, %v4894_v24 }
 0x236   :  { %7028 = vmatpush3.bf16.msra.mxu1 %v7027_v25  ;;  %v7117_v25 = vpack.c.bf16 %v4893_v23, %v4892_v22 }
 0x237   :  { %v442_v34 = vpop.f32.mrb[8].mxu1  ;;  %7029 = vmatprep.subr.bf16.mxu1 %v7667_v16 }
 0x238   :  { %5970 = vmatmul.mubr.f32.gmra.mrb[46].mxu0 %v4880_v31  ;;  %5854 = vmatmul.mubr.msk.f32.gmra.mrb[14].mxu1 %vm456_vm1, %v442_v34  ;;  %v5838_v35 = vpop.f32.mrb[9].mxu1 }
 0x239   :  { %5972 = vmatprep.mubr.msk.f32.mxu0 %vm7668_vm0, %v7669_v17  ;;  %5856 = vmatprep.mubr.msk.f32.mxu1 %vm7668_vm0, %v7669_v17 }
 0x23a   :  { %7031 = vmatpush3.bf16.msra.mxu1 %v7030_v33  ;;  %7118 = vmatpush3.bf16.msra.mxu0 %v7117_v25 }
 0x23b   :  { %v447_v37 = vpop.f32.mrb[10].mxu1  ;;  %7086 = vmatprep.subr.bf16.mxu1 %v7667_v16  ;;  %7119 = vmatprep.subr.bf16.mxu0 %v7667_v16 }
 0x23c   :  { %5973 = vmatmul.mubr.f32.gmra.mrb[48].mxu0 %v4881_v36  ;;  %5857 = vmatmul.mubr.msk.f32.gmra.mrb[16].mxu1 %vm456_vm1, %v447_v37  ;;  %v5841_v39 = vpop.f32.mrb[11].mxu1 }
 0x23d   :  { %5867 = vmatprep.mubr.msk.f32.mxu1 %vm7668_vm0, %v7669_v17  ;;  %6041 = vmatprep.mubr.msk.f32.mxu0 %vm7668_vm0, %v7669_v17 }
 0x23e   :  { %7121 = vmatpush3.bf16.msra.mxu0 %v7120_v28 }
 0x23f   :  { %7122 = vmatprep.subr.bf16.mxu0 %v7667_v16 }
 0x240   :  { %5868 = vmatmul.mubr.msk.f32.vlgmr.msra.gmra.mrb[18].mxu1 %vm456_vm1, %v8102_v7 }
 0x241   :  { %5870 = vmatprep.mubr.msk.f32.mxu1 %vm7668_vm0, %v7669_v17  ;;  %7088 = vmatpush3.bf16.msra.mxu1 %v7087_v42 }
 0x242   :  { %7089 = vmatprep.subr.bf16.mxu1 %v7667_v16 }
 0x244   :  { %5871 = vmatmul.mubr.msk.f32.gmra.mrb[20].mxu1 %vm456_vm1, %v354_v11 }
 0x245   :  { %5873 = vmatprep.mubr.msk.f32.mxu1 %vm7668_vm0, %v7669_v17  ;;  %7091 = vmatpush3.bf16.msra.mxu1 %v7090_v46 }
 0x246   :  { %7092 = vmatprep.subr.bf16.mxu1 %v7667_v16 }
 0x248   :  { %5874 = vmatmul.mubr.msk.f32.gmra.mrb[22].mxu1 %vm456_vm1, %v359_v18  ;;  %v4889_v18 = vld [vmem:[%s9409_s3 + $0x60] sm:$0xff] }
 0x249   :  { %5983 = vmatprep.mubr.msk.f32.mxu1 %vm7668_vm0, %v7669_v17 }
 0x2e7   :  { %v799_v48 = vpop.f32.mrb[38].mxu0 }
 0x2e8   :  { %v5927_v49 = vpop.f32.mrb[39].mxu0 }
 0x2e9   :  { %v4900_v49 = vld [vmem:[%s9409_s3 + $0x80] sm:$0xff] }
 0x2eb   :  { %v804_v21 = vpop.f32.mrb[40].mxu0 }
 0x2ec   :  { %v5930_v50 = vpop.f32.mrb[41].mxu0 }
 0x2ed   :  { %v4902_v50 = vld [vmem:[%s9410_s4 + $0xa0] sm:$0xff] }
 0x2ef   :  { %v809_v51 = vpop.f32.mrb[42].mxu0 }
 0x2f0   :  { %v5933_v52 = vpop.f32.mrb[43].mxu0 }
 0x2f1   :  { %v4904_v52 = vld [vmem:[%s9410_s4 + $0xb0] sm:$0xff] }
 0x307   :  { %v886_v53 = vpop.f32.mrb[44].mxu0  ;;  %v532_v55 = vpop.f32.mrb[12].mxu1 }
 0x308   :  { %v5968_v56 = vpop.f32.mrb[45].mxu0  ;;  %5984 = vmatmul.mubr.msk.f32.vlgmr.msra.gmra.mrb[24].mxu1 %vm456_vm1, %v886_v53  ;;  %v5852_v57 = vpop.f32.mrb[13].mxu1 }
 0x309   :  { %7094 = vmatpush3.bf16.msra.mxu1 %v7951_v32  ;;  %5986 = vmatprep.mubr.msk.f32.mxu1 %vm7668_vm0, %v7669_v17 }
 0x30a   :  { %7095 = vmatprep.subr.bf16.mxu1 %v7667_v16 }
 0x30b   :  { %v891_v58 = vpop.f32.mrb[46].mxu0  ;;  %v537_v59 = vpop.f32.mrb[14].mxu1 }
 0x30c   :  { %5987 = vmatmul.mubr.msk.f32.gmra.mrb[26].mxu1 %vm456_vm1, %v891_v58  ;;  %v5971_v60 = vpop.f32.mrb[47].mxu0  ;;  %v5855_v61 = vpop.f32.mrb[15].mxu1 }
 0x30d   :  { %7097 = vmatpush3.bf16.msra.mxu1 %v7959_v43  ;;  %5989 = vmatprep.mubr.msk.f32.mxu1 %vm7668_vm0, %v7669_v17 }
 0x30e   :  { %7098 = vmatprep.subr.bf16.mxu1 %v7667_v16 }
 0x30f   :  { %v896_v62 = vpop.f32.mrb[48].mxu0  ;;  %v542_v63 = vpop.f32.mrb[16].mxu1 }
 0x310   :  { %5990 = vmatmul.mubr.msk.f32.gmra.mrb[28].mxu1 %vm456_vm1, %v896_v62  ;;  %v5858_v0 = vpop.f32.mrb[17].mxu1  ;;  %v5974_v2 = vpop.f32.mrb[49].mxu0 }
 0x311   :  { %7100 = vmatpush3.bf16.msra.mxu1 %v7967_v54  ;;  %6024 = vmatprep.mubr.msk.f32.mxu1 %vm7668_vm0, %v7669_v17 }
 0x312   :  { %7101 = vmatprep.subr.bf16.mxu1 %v7667_v16 }
 0x313   :  { %v621_v3 = vpop.f32.mrb[18].mxu1 }
 0x314   :  { %v622_v4 = vadd.f32 %v621_v3, %v532_v55  ;;  %v5869_v5 = vpop.f32.mrb[19].mxu1  ;;  %v4905_v55 = vld [vmem:[%s9410_s4 + $0xb8] sm:$0xff] }
 0x315   :  { %7103 = vmatpush3.bf16.msra.mxu1 %v7975_v1  ;;  %v7150_v56 = vpack.c.bf16 %v4905_v55, %v4904_v52 }
 0x316   :  { %7104 = vmatprep.subr.bf16.mxu1 %v7667_v16  ;;  %v813_v6 = vadd.f32 %v799_v48, %v622_v4  ;;  %v4899_v48 = vld [vmem:[%s9409_s3 + $0x78] sm:$0xff] }
 0x317   :  { %v626_v7 = vpop.f32.mrb[20].mxu1 }
 0x318   :  { %v627_v8 = vadd.f32 %v626_v7, %v537_v59  ;;  %v5872_v9 = vpop.f32.mrb[21].mxu1 }
 0x319   :  { %7106 = vmatpush3.bf16.msra.mxu1 %v7983_v12  ;;  %v4909_v9 = vld [vmem:[%s9409_s3 + $0x90] sm:$0xff] }
 0x31a   :  { %7107 = vmatprep.subr.bf16.mxu1 %v7667_v16  ;;  %v814_v10 = vadd.f32 %v804_v21, %v627_v8  ;;  %v4901_v21 = vld [vmem:[%s9409_s3 + $0x88] sm:$0x3] }
 0x31b   :  { %v631_v11 = vpop.f32.mrb[22].mxu1 }
 0x31c   :  { %v632_v13 = vadd.f32 %v631_v11, %v542_v63  ;;  %v5875_v14 = vpop.f32.mrb[23].mxu1  ;;  %v4911_v11 = vld [vmem:[%s9409_s3 + $0xa0] sm:$0x3] }
 0x31d   :  { %7109 = vmatpush3.bf16.msra.mxu1 %v7991_v26  ;;  %v4913_v14 = vld [vmem:[%s9410_s4 + $0xc8] sm:$0xff] }
 0x31e   :  { %7110 = vmatprep.subr.bf16.mxu1 %v7667_v16  ;;  %v815_v15 = vadd.f32 %v809_v51, %v632_v13  ;;  %v4903_v51 = vld [vmem:[%s9410_s4 + $0xa8] sm:$0xff]  ;;  %v4912_v13 = vld [vmem:[%s9410_s4 + $0xc0] sm:$0xff] }
 0x31f   :  { %v7147_v53 = vpack.c.bf16 %v4903_v51, %v4902_v50 }
 0x321   :  { %7112 = vmatpush3.bf16.msra.mxu1 %v7999_v38 }
 0x322   :  { %7113 = vmatprep.subr.bf16.mxu1 %v7667_v16 }
 0x325   :  { %7115 = vmatpush3.bf16.msra.mxu1 %v8007_v47 }
 0x326   :  { %7146 = vmatprep.subr.bf16.mxu1 %v7667_v16 }
 0x328   :  { %6025 = vmatmul.mubr.f32.vlgmr.msra.gmra.mrb[30].mxu1 %v4889_v18  ;;  %v7177_v18 = vpack.c.bf16 %v4913_v14, %v4912_v13 }
 0x329   :  { %6027 = vmatprep.mubr.msk.f32.mxu1 %vm7668_vm0, %v7669_v17  ;;  %7148 = vmatpush3.bf16.msra.mxu1 %v7147_v53 }
 0x32a   :  { %7149 = vmatprep.subr.bf16.mxu1 %v7667_v16 }
 0x32c   :  { %6028 = vmatmul.mubr.f32.gmra.mrb[32].mxu1 %v4890_v19  ;;  %v4915_v19 = vld [vmem:[%s9410_s4 + $0xd8] sm:$0xff] }
 0x32d   :  { %6030 = vmatprep.mubr.msk.f32.mxu1 %vm7668_vm0, %v7669_v17  ;;  %7151 = vmatpush3.bf16.msra.mxu1 %v7150_v56 }
 0x32e   :  { %7152 = vmatprep.subr.bf16.mxu1 %v7667_v16 }
 0x330   :  { %6031 = vmatmul.mubr.f32.gmra.mrb[34].mxu1 %v4891_v20 }
 0x331   :  { %6099 = vmatprep.mubr.msk.f32.mxu1 %vm7668_vm0, %v7669_v17 }
 0x3db   :  { %v980_v29 = vpop.f32.mrb[24].mxu1 }
 0x3dc   :  { %v994_v30 = vadd.f32 %v980_v29, %v813_v6  ;;  %v5985_v31 = vpop.f32.mrb[25].mxu1 }
 0x3df   :  { %v985_v33 = vpop.f32.mrb[26].mxu1 }
 0x3e0   :  { %v995_v34 = vadd.f32 %v985_v33, %v814_v10  ;;  %v5988_v35 = vpop.f32.mrb[27].mxu1  ;;  %v4910_v10 = vld [vmem:[%s9409_s3 + $0x98] sm:$0xff] }
 0x3e3   :  { %v990_v36 = vpop.f32.mrb[28].mxu1 }
 0x3e4   :  { %v996_v37 = vadd.f32 %v990_v36, %v815_v15  ;;  %v5991_v39 = vpop.f32.mrb[29].mxu1  ;;  %v4914_v15 = vld [vmem:[%s9410_s4 + $0xd0] sm:$0xff] }
 0x3e5   :  { %v7180_v20 = vpack.c.bf16 %v4915_v19, %v4914_v15 }
 0x3fb   :  { %v1067_v40 = vpop.f32.mrb[30].mxu1 }
 0x3fc   :  { %v6026_v41 = vpop.f32.mrb[31].mxu1  ;;  %6042 = vmatmul.mubr.msk.f32.vlgmr.msra.gmra.mrb[50].mxu0 %vm456_vm1, %v1067_v40  ;;  %v4919_v40 = vld [vmem:[%s9409_s3 + $0xa8] sm:$0xff] }
 0x3fd   :  { %7124 = vmatpush3.bf16.msra.mxu0 %v7951_v32  ;;  %6044 = vmatprep.mubr.msk.f32.mxu0 %vm7668_vm0, %v7669_v17  ;;  %v4920_v41 = vld [vmem:[%s9409_s3 + $0xb0] sm:$0xff] }
 0x3fe   :  { %7125 = vmatprep.subr.bf16.mxu0 %v7667_v16 }
 0x3ff   :  { %v1072_v42 = vpop.f32.mrb[32].mxu1 }
 0x400   :  { %6045 = vmatmul.mubr.msk.f32.gmra.mrb[52].mxu0 %vm456_vm1, %v1072_v42  ;;  %v6029_v44 = vpop.f32.mrb[33].mxu1  ;;  %v4921_v42 = vld [vmem:[%s9409_s3 + $0xb8] sm:$0x3] }
 0x401   :  { %7127 = vmatpush3.bf16.msra.mxu0 %v7959_v43  ;;  %6047 = vmatprep.mubr.msk.f32.mxu0 %vm7668_vm0, %v7669_v17  ;;  %v4922_v44 = vld [vmem:[%s9410_s4 + $0xe0] sm:$0xff] }
 0x402   :  { %7128 = vmatprep.subr.bf16.mxu0 %v7667_v16 }
 0x403   :  { %v1077_v45 = vpop.f32.mrb[34].mxu1 }
 0x404   :  { %6048 = vmatmul.mubr.msk.f32.gmra.mrb[54].mxu0 %vm456_vm1, %v1077_v45  ;;  %v6032_v46 = vpop.f32.mrb[35].mxu1  ;;  %v4923_v45 = vld [vmem:[%s9410_s4 + $0xe8] sm:$0xff] }
 0x405   :  { %7130 = vmatpush3.bf16.msra.mxu0 %v7967_v54  ;;  %6082 = vmatprep.mubr.msk.f32.mxu0 %vm7668_vm0, %v7669_v17  ;;  %v4924_v46 = vld [vmem:[%s9410_s4 + $0xf0] sm:$0xff] }
 0x406   :  { %7131 = vmatprep.subr.bf16.mxu0 %v7667_v16 }
 0x409   :  { %7133 = vmatpush3.bf16.msra.mxu0 %v7975_v1 }
 0x40a   :  { %7134 = vmatprep.subr.bf16.mxu0 %v7667_v16 }
 0x40d   :  { %7136 = vmatpush3.bf16.msra.mxu0 %v7983_v12 }
 0x40e   :  { %7137 = vmatprep.subr.bf16.mxu0 %v7667_v16 }
 0x411   :  { %7139 = vmatpush3.bf16.msra.mxu0 %v7991_v26 }
 0x412   :  { %7140 = vmatprep.subr.bf16.mxu0 %v7667_v16 }
 0x415   :  { %7142 = vmatpush3.bf16.msra.mxu0 %v7999_v38 }
 0x416   :  { %7143 = vmatprep.subr.bf16.mxu0 %v7667_v16 }
 0x419   :  { %7145 = vmatpush3.bf16.msra.mxu0 %v8007_v47 }
 0x41a   :  { %7176 = vmatprep.subr.bf16.mxu0 %v7667_v16 }
 0x41c   :  { %6083 = vmatmul.mubr.f32.vlgmr.msra.gmra.mrb[56].mxu0 %v4899_v48  ;;  %v7207_v48 = vpack.c.bf16 %v4923_v45, %v4922_v44 }
 0x41d   :  { %6085 = vmatprep.mubr.msk.f32.mxu0 %vm7668_vm0, %v7669_v17  ;;  %7178 = vmatpush3.bf16.msra.mxu0 %v7177_v18 }
 0x41e   :  { %7179 = vmatprep.subr.bf16.mxu0 %v7667_v16 }
 0x420   :  { %6086 = vmatmul.mubr.f32.gmra.mrb[58].mxu0 %v4900_v49  ;;  %v4925_v49 = vld [vmem:[%s9410_s4 + $0xf8] sm:$0xff] }
 0x421   :  { %6088 = vmatprep.mubr.msk.f32.mxu0 %vm7668_vm0, %v7669_v17  ;;  %7181 = vmatpush3.bf16.msra.mxu0 %v7180_v20 }
 0x422   :  { %7182 = vmatprep.subr.bf16.mxu0 %v7667_v16 }
 0x424   :  { %6089 = vmatmul.mubr.f32.gmra.mrb[60].mxu0 %v4901_v21  ;;  %v7210_v21 = vpack.c.bf16 %v4925_v49, %v4924_v46 }
 0x425   :  { %6157 = vmatprep.mubr.msk.f32.mxu0 %vm7668_vm0, %v7669_v17 }
 0x4cf   :  { %v1161_v57 = vpop.f32.mrb[50].mxu0 }
 0x4d0   :  { %v1175_v58 = vadd.f32 %v1161_v57, %v994_v30  ;;  %v6043_v59 = vpop.f32.mrb[51].mxu0 }
 0x4d3   :  { %v1166_v60 = vpop.f32.mrb[52].mxu0 }
 0x4d4   :  { %v1176_v61 = vadd.f32 %v1166_v60, %v995_v34  ;;  %v6046_v62 = vpop.f32.mrb[53].mxu0 }
 0x4d7   :  { %v1171_v63 = vpop.f32.mrb[54].mxu0 }
 0x4d8   :  { %v1177_v0 = vadd.f32 %v1171_v63, %v996_v37  ;;  %v6049_v2 = vpop.f32.mrb[55].mxu0 }
 0x4ef   :  { %v1248_v3 = vpop.f32.mrb[56].mxu0 }
 0x4f0   :  { %v6084_v4 = vpop.f32.mrb[57].mxu0  ;;  %6100 = vmatmul.mubr.msk.f32.vlgmr.msra.gmra.mrb[36].mxu1 %vm456_vm1, %v1248_v3  ;;  %v4929_v3 = vld [vmem:[%s9409_s3 + $0xc0] sm:$0xff] }
 0x4f1   :  { %7154 = vmatpush3.bf16.msra.mxu1 %v7951_v32  ;;  %6102 = vmatprep.mubr.msk.f32.mxu1 %vm7668_vm0, %v7669_v17  ;;  %v4930_v4 = vld [vmem:[%s9409_s3 + $0xc8] sm:$0xff] }
 0x4f2   :  { %7155 = vmatprep.subr.bf16.mxu1 %v7667_v16 }
 0x4f3   :  { %v1253_v5 = vpop.f32.mrb[58].mxu0 }
 0x4f4   :  { %6103 = vmatmul.mubr.msk.f32.gmra.mrb[38].mxu1 %vm456_vm1, %v1253_v5  ;;  %v6087_v6 = vpop.f32.mrb[59].mxu0  ;;  %v4931_v5 = vld [vmem:[%s9409_s3 + $0xd0] sm:$0x3] }
 0x4f5   :  { %7157 = vmatpush3.bf16.msra.mxu1 %v7959_v43  ;;  %6105 = vmatprep.mubr.msk.f32.mxu1 %vm7668_vm0, %v7669_v17  ;;  %v4932_v6 = vld [vmem:[%s9410_s4 + $0x100] sm:$0xff] }
 0x4f6   :  { %7158 = vmatprep.subr.bf16.mxu1 %v7667_v16 }
 0x4f7   :  { %v1258_v7 = vpop.f32.mrb[60].mxu0 }
 0x4f8   :  { %6106 = vmatmul.mubr.msk.f32.gmra.mrb[40].mxu1 %vm456_vm1, %v1258_v7  ;;  %v6090_v8 = vpop.f32.mrb[61].mxu0  ;;  %v4933_v7 = vld [vmem:[%s9410_s4 + $0x108] sm:$0xff] }
 0x4f9   :  { %7160 = vmatpush3.bf16.msra.mxu1 %v7967_v54  ;;  %6140 = vmatprep.mubr.msk.f32.mxu1 %vm7668_vm0, %v7669_v17  ;;  %v4934_v8 = vld [vmem:[%s9410_s4 + $0x110] sm:$0xff] }
 0x4fa   :  { %7161 = vmatprep.subr.bf16.mxu1 %v7667_v16 }
 0x4fd   :  { %7163 = vmatpush3.bf16.msra.mxu1 %v7975_v1 }
 0x4fe   :  { %7164 = vmatprep.subr.bf16.mxu1 %v7667_v16 }
 0x501   :  { %7166 = vmatpush3.bf16.msra.mxu1 %v7983_v12 }
 0x502   :  { %7167 = vmatprep.subr.bf16.mxu1 %v7667_v16 }
 0x505   :  { %7169 = vmatpush3.bf16.msra.mxu1 %v7991_v26 }
 0x506   :  { %7170 = vmatprep.subr.bf16.mxu1 %v7667_v16 }
 0x509   :  { %7172 = vmatpush3.bf16.msra.mxu1 %v7999_v38 }
 0x50a   :  { %7173 = vmatprep.subr.bf16.mxu1 %v7667_v16 }
 0x50d   :  { %7175 = vmatpush3.bf16.msra.mxu1 %v8007_v47 }
 0x50e   :  { %7206 = vmatprep.subr.bf16.mxu1 %v7667_v16 }
 0x510   :  { %6141 = vmatmul.mubr.f32.vlgmr.msra.gmra.mrb[42].mxu1 %v4909_v9  ;;  %v7237_v9 = vpack.c.bf16 %v4933_v7, %v4932_v6 }
 0x511   :  { %6143 = vmatprep.mubr.msk.f32.mxu1 %vm7668_vm0, %v7669_v17  ;;  %7208 = vmatpush3.bf16.msra.mxu1 %v7207_v48 }
 0x512   :  { %7209 = vmatprep.subr.bf16.mxu1 %v7667_v16 }
 0x514   :  { %6144 = vmatmul.mubr.f32.gmra.mrb[44].mxu1 %v4910_v10  ;;  %v4935_v10 = vld [vmem:[%s9410_s4 + $0x118] sm:$0xff] }
 0x515   :  { %6146 = vmatprep.mubr.msk.f32.mxu1 %vm7668_vm0, %v7669_v17  ;;  %7211 = vmatpush3.bf16.msra.mxu1 %v7210_v21 }
 0x516   :  { %7212 = vmatprep.subr.bf16.mxu1 %v7667_v16 }
 0x518   :  { %6147 = vmatmul.mubr.f32.gmra.mrb[46].mxu1 %v4911_v11  ;;  %v7240_v11 = vpack.c.bf16 %v4935_v10, %v4934_v8 }
 0x519   :  { %6215 = vmatprep.mubr.msk.f32.mxu1 %vm7668_vm0, %v7669_v17 }
 0x5c3   :  { %v1342_v22 = vpop.f32.mrb[36].mxu1 }
 0x5c4   :  { %v1356_v23 = vadd.f32 %v1342_v22, %v1175_v58  ;;  %v6101_v24 = vpop.f32.mrb[37].mxu1 }
 0x5c7   :  { %v1347_v25 = vpop.f32.mrb[38].mxu1 }
 0x5c8   :  { %v1357_v27 = vadd.f32 %v1347_v25, %v1176_v61  ;;  %v6104_v28 = vpop.f32.mrb[39].mxu1 }
 0x5cb   :  { %v1352_v29 = vpop.f32.mrb[40].mxu1 }
 0x5cc   :  { %v1358_v30 = vadd.f32 %v1352_v29, %v1177_v0  ;;  %v6107_v31 = vpop.f32.mrb[41].mxu1 }
 0x5e3   :  { %v1429_v33 = vpop.f32.mrb[42].mxu1 }
 0x5e4   :  { %v6142_v34 = vpop.f32.mrb[43].mxu1  ;;  %6158 = vmatmul.mubr.msk.f32.vlgmr.msra.gmra.mrb[62].mxu0 %vm456_vm1, %v1429_v33  ;;  %v4939_v33 = vld [vmem:[%s9409_s3 + $0xd8] sm:$0xff] }
 0x5e5   :  { %7184 = vmatpush3.bf16.msra.mxu0 %v7951_v32  ;;  %6160 = vmatprep.mubr.msk.f32.mxu0 %vm7668_vm0, %v7669_v17  ;;  %v4940_v34 = vld [vmem:[%s9409_s3 + $0xe0] sm:$0xff] }
 0x5e6   :  { %7185 = vmatprep.subr.bf16.mxu0 %v7667_v16 }
 0x5e7   :  { %v1434_v35 = vpop.f32.mrb[44].mxu1 }
 0x5e8   :  { %6161 = vmatmul.mubr.msk.f32.gmra.mrb[64].mxu0 %vm456_vm1, %v1434_v35  ;;  %v6145_v36 = vpop.f32.mrb[45].mxu1  ;;  %v4941_v35 = vld [vmem:[%s9409_s3 + $0xe8] sm:$0x3] }
 0x5e9   :  { %7187 = vmatpush3.bf16.msra.mxu0 %v7959_v43  ;;  %6163 = vmatprep.mubr.msk.f32.mxu0 %vm7668_vm0, %v7669_v17  ;;  %v4942_v36 = vld [vmem:[%s9410_s4 + $0x120] sm:$0xff] }
 0x5ea   :  { %7188 = vmatprep.subr.bf16.mxu0 %v7667_v16 }
 0x5eb   :  { %v1439_v37 = vpop.f32.mrb[46].mxu1 }
 0x5ec   :  { %6164 = vmatmul.mubr.msk.f32.gmra.mrb[66].mxu0 %vm456_vm1, %v1439_v37  ;;  %v6148_v39 = vpop.f32.mrb[47].mxu1  ;;  %v4943_v37 = vld [vmem:[%s9410_s4 + $0x128] sm:$0xff] }
 0x5ed   :  { %7190 = vmatpush3.bf16.msra.mxu0 %v7967_v54  ;;  %6198 = vmatprep.mubr.msk.f32.mxu0 %vm7668_vm0, %v7669_v17  ;;  %v4944_v39 = vld [vmem:[%s9410_s4 + $0x130] sm:$0xff] }
 0x5ee   :  { %7191 = vmatprep.subr.bf16.mxu0 %v7667_v16 }
 0x5f1   :  { %7193 = vmatpush3.bf16.msra.mxu0 %v7975_v1 }
 0x5f2   :  { %7194 = vmatprep.subr.bf16.mxu0 %v7667_v16 }
 0x5f5   :  { %7196 = vmatpush3.bf16.msra.mxu0 %v7983_v12 }
 0x5f6   :  { %7197 = vmatprep.subr.bf16.mxu0 %v7667_v16 }
 0x5f9   :  { %7199 = vmatpush3.bf16.msra.mxu0 %v7991_v26 }
 0x5fa   :  { %7200 = vmatprep.subr.bf16.mxu0 %v7667_v16 }
 0x5fd   :  { %7202 = vmatpush3.bf16.msra.mxu0 %v7999_v38 }
 0x5fe   :  { %7203 = vmatprep.subr.bf16.mxu0 %v7667_v16 }
 0x601   :  { %7205 = vmatpush3.bf16.msra.mxu0 %v8007_v47 }
 0x602   :  { %7236 = vmatprep.subr.bf16.mxu0 %v7667_v16 }
 0x604   :  { %6199 = vmatmul.mubr.f32.vlgmr.msra.gmra.mrb[68].mxu0 %v4919_v40  ;;  %v7267_v40 = vpack.c.bf16 %v4943_v37, %v4942_v36 }
 0x605   :  { %6201 = vmatprep.mubr.msk.f32.mxu0 %vm7668_vm0, %v7669_v17  ;;  %7238 = vmatpush3.bf16.msra.mxu0 %v7237_v9 }
 0x606   :  { %7239 = vmatprep.subr.bf16.mxu0 %v7667_v16 }
 0x608   :  { %6202 = vmatmul.mubr.f32.gmra.mrb[70].mxu0 %v4920_v41  ;;  %v4945_v41 = vld [vmem:[%s9410_s4 + $0x138] sm:$0xff] }
 0x609   :  { %6204 = vmatprep.mubr.msk.f32.mxu0 %vm7668_vm0, %v7669_v17  ;;  %7241 = vmatpush3.bf16.msra.mxu0 %v7240_v11 }
 0x60a   :  { %7242 = vmatprep.subr.bf16.mxu0 %v7667_v16 }
 0x60c   :  { %6205 = vmatmul.mubr.f32.gmra.mrb[72].mxu0 %v4921_v42  ;;  %v7270_v42 = vpack.c.bf16 %v4945_v41, %v4944_v39 }
 0x60d   :  { %6273 = vmatprep.mubr.msk.f32.mxu0 %vm7668_vm0, %v7669_v17 }
 0x6b7   :  { %v1523_v50 = vpop.f32.mrb[62].mxu0 }
 0x6b8   :  { %v1537_v51 = vadd.f32 %v1523_v50, %v1356_v23  ;;  %v6159_v52 = vpop.f32.mrb[63].mxu0 }
 0x6bb   :  { %v1528_v53 = vpop.f32.mrb[64].mxu0 }
 0x6bc   :  { %v1538_v55 = vadd.f32 %v1528_v53, %v1357_v27  ;;  %v6162_v56 = vpop.f32.mrb[65].mxu0 }
 0x6bf   :  { %v1533_v57 = vpop.f32.mrb[66].mxu0 }
 0x6c0   :  { %v1539_v58 = vadd.f32 %v1533_v57, %v1358_v30  ;;  %v6165_v59 = vpop.f32.mrb[67].mxu0 }
 0x6d7   :  { %v1610_v60 = vpop.f32.mrb[68].mxu0 }
 0x6d8   :  { %v6200_v61 = vpop.f32.mrb[69].mxu0  ;;  %6216 = vmatmul.mubr.msk.f32.vlgmr.msra.gmra.mrb[48].mxu1 %vm456_vm1, %v1610_v60  ;;  %v4949_v60 = vld [vmem:[%s9409_s3 + $0xf0] sm:$0xff] }
 0x6d9   :  { %7214 = vmatpush3.bf16.msra.mxu1 %v7951_v32  ;;  %6218 = vmatprep.mubr.msk.f32.mxu1 %vm7668_vm0, %v7669_v17  ;;  %v4950_v61 = vld [vmem:[%s9409_s3 + $0xf8] sm:$0xff] }
 0x6da   :  { %7215 = vmatprep.subr.bf16.mxu1 %v7667_v16 }
 0x6db   :  { %v1615_v62 = vpop.f32.mrb[70].mxu0 }
 0x6dc   :  { %6219 = vmatmul.mubr.msk.f32.gmra.mrb[50].mxu1 %vm456_vm1, %v1615_v62  ;;  %v6203_v63 = vpop.f32.mrb[71].mxu0  ;;  %v4951_v62 = vld [vmem:[%s9409_s3 + $0x100] sm:$0x3] }
 0x6dd   :  { %7217 = vmatpush3.bf16.msra.mxu1 %v7959_v43  ;;  %6221 = vmatprep.mubr.msk.f32.mxu1 %vm7668_vm0, %v7669_v17  ;;  %v4952_v63 = vld [vmem:[%s9410_s4 + $0x140] sm:$0xff] }
 0x6de   :  { %7218 = vmatprep.subr.bf16.mxu1 %v7667_v16 }
 0x6df   :  { %v1620_v0 = vpop.f32.mrb[72].mxu0 }
 0x6e0   :  { %6222 = vmatmul.mubr.msk.f32.gmra.mrb[52].mxu1 %vm456_vm1, %v1620_v0  ;;  %v6206_v2 = vpop.f32.mrb[73].mxu0  ;;  %v4953_v0 = vld [vmem:[%s9410_s4 + $0x148] sm:$0xff] }
 0x6e1   :  { %7220 = vmatpush3.bf16.msra.mxu1 %v7967_v54  ;;  %6256 = vmatprep.mubr.msk.f32.mxu1 %vm7668_vm0, %v7669_v17  ;;  %v4954_v2 = vld [vmem:[%s9410_s4 + $0x150] sm:$0xff] }
 0x6e2   :  { %7221 = vmatprep.subr.bf16.mxu1 %v7667_v16 }
 0x6e5   :  { %7223 = vmatpush3.bf16.msra.mxu1 %v7975_v1 }
 0x6e6   :  { %7224 = vmatprep.subr.bf16.mxu1 %v7667_v16 }
 0x6e9   :  { %7226 = vmatpush3.bf16.msra.mxu1 %v7983_v12 }
 0x6ea   :  { %7227 = vmatprep.subr.bf16.mxu1 %v7667_v16 }
 0x6ed   :  { %7229 = vmatpush3.bf16.msra.mxu1 %v7991_v26 }
 0x6ee   :  { %7230 = vmatprep.subr.bf16.mxu1 %v7667_v16 }
 0x6f1   :  { %7232 = vmatpush3.bf16.msra.mxu1 %v7999_v38 }
 0x6f2   :  { %7233 = vmatprep.subr.bf16.mxu1 %v7667_v16 }
 0x6f5   :  { %7235 = vmatpush3.bf16.msra.mxu1 %v8007_v47 }
 0x6f6   :  { %7266 = vmatprep.subr.bf16.mxu1 %v7667_v16 }
 0x6f8   :  { %6257 = vmatmul.mubr.f32.vlgmr.msra.gmra.mrb[54].mxu1 %v4929_v3  ;;  %v7297_v3 = vpack.c.bf16 %v4953_v0, %v4952_v63 }
 0x6f9   :  { %6259 = vmatprep.mubr.msk.f32.mxu1 %vm7668_vm0, %v7669_v17  ;;  %7268 = vmatpush3.bf16.msra.mxu1 %v7267_v40 }
 0x6fa   :  { %7269 = vmatprep.subr.bf16.mxu1 %v7667_v16 }
 0x6fc   :  { %6260 = vmatmul.mubr.f32.gmra.mrb[56].mxu1 %v4930_v4  ;;  %v4955_v4 = vld [vmem:[%s9410_s4 + $0x158] sm:$0xff] }
 0x6fd   :  { %6262 = vmatprep.mubr.msk.f32.mxu1 %vm7668_vm0, %v7669_v17  ;;  %7271 = vmatpush3.bf16.msra.mxu1 %v7270_v42 }
 0x6fe   :  { %7272 = vmatprep.subr.bf16.mxu1 %v7667_v16 }
 0x700   :  { %6263 = vmatmul.mubr.f32.gmra.mrb[58].mxu1 %v4931_v5  ;;  %v7300_v5 = vpack.c.bf16 %v4955_v4, %v4954_v2 }
 0x701   :  { %6331 = vmatprep.mubr.msk.f32.mxu1 %vm7668_vm0, %v7669_v17 }
 0x7ab   :  { %v1704_v13 = vpop.f32.mrb[48].mxu1 }
 0x7ac   :  { %v1718_v14 = vadd.f32 %v1704_v13, %v1537_v51  ;;  %v6217_v15 = vpop.f32.mrb[49].mxu1 }
 0x7af   :  { %v1709_v18 = vpop.f32.mrb[50].mxu1 }
 0x7b0   :  { %v1719_v19 = vadd.f32 %v1709_v18, %v1538_v55  ;;  %v6220_v20 = vpop.f32.mrb[51].mxu1 }
 0x7b3   :  { %v1714_v22 = vpop.f32.mrb[52].mxu1 }
 0x7b4   :  { %v1720_v23 = vadd.f32 %v1714_v22, %v1539_v58  ;;  %v6223_v24 = vpop.f32.mrb[53].mxu1 }
 0x7cb   :  { %v1791_v25 = vpop.f32.mrb[54].mxu1 }
 0x7cc   :  { %v6258_v27 = vpop.f32.mrb[55].mxu1  ;;  %6274 = vmatmul.mubr.msk.f32.vlgmr.msra.gmra.mrb[74].mxu0 %vm456_vm1, %v1791_v25  ;;  %v4959_v25 = vld [vmem:[%s9409_s3 + $0x108] sm:$0xff] }
 0x7cd   :  { %7244 = vmatpush3.bf16.msra.mxu0 %v7951_v32  ;;  %6276 = vmatprep.mubr.msk.f32.mxu0 %vm7668_vm0, %v7669_v17  ;;  %v4960_v27 = vld [vmem:[%s9409_s3 + $0x110] sm:$0xff] }
 0x7ce   :  { %7245 = vmatprep.subr.bf16.mxu0 %v7667_v16 }
 0x7cf   :  { %v1796_v28 = vpop.f32.mrb[56].mxu1 }
 0x7d0   :  { %6277 = vmatmul.mubr.msk.f32.gmra.mrb[76].mxu0 %vm456_vm1, %v1796_v28  ;;  %v6261_v29 = vpop.f32.mrb[57].mxu1  ;;  %v4961_v28 = vld [vmem:[%s9409_s3 + $0x118] sm:$0x3] }
 0x7d1   :  { %7247 = vmatpush3.bf16.msra.mxu0 %v7959_v43  ;;  %6279 = vmatprep.mubr.msk.f32.mxu0 %vm7668_vm0, %v7669_v17  ;;  %v4962_v29 = vld [vmem:[%s9410_s4 + $0x160] sm:$0xff] }
 0x7d2   :  { %7248 = vmatprep.subr.bf16.mxu0 %v7667_v16 }
 0x7d3   :  { %v1801_v30 = vpop.f32.mrb[58].mxu1 }
 0x7d4   :  { %6280 = vmatmul.mubr.msk.f32.gmra.mrb[78].mxu0 %vm456_vm1, %v1801_v30  ;;  %v6264_v31 = vpop.f32.mrb[59].mxu1  ;;  %v4963_v30 = vld [vmem:[%s9410_s4 + $0x168] sm:$0xff] }
 0x7d5   :  { %7250 = vmatpush3.bf16.msra.mxu0 %v7967_v54  ;;  %6314 = vmatprep.mubr.msk.f32.mxu0 %vm7668_vm0, %v7669_v17  ;;  %v4964_v31 = vld [vmem:[%s9410_s4 + $0x170] sm:$0xff] }
 0x7d6   :  { %7251 = vmatprep.subr.bf16.mxu0 %v7667_v16 }
 0x7d9   :  { %7253 = vmatpush3.bf16.msra.mxu0 %v7975_v1 }
 0x7da   :  { %7254 = vmatprep.subr.bf16.mxu0 %v7667_v16 }
 0x7dd   :  { %7256 = vmatpush3.bf16.msra.mxu0 %v7983_v12 }
 0x7de   :  { %7257 = vmatprep.subr.bf16.mxu0 %v7667_v16 }
 0x7e1   :  { %7259 = vmatpush3.bf16.msra.mxu0 %v7991_v26 }
 0x7e2   :  { %7260 = vmatprep.subr.bf16.mxu0 %v7667_v16 }
 0x7e5   :  { %7262 = vmatpush3.bf16.msra.mxu0 %v7999_v38 }
 0x7e6   :  { %7263 = vmatprep.subr.bf16.mxu0 %v7667_v16 }
 0x7e9   :  { %7265 = vmatpush3.bf16.msra.mxu0 %v8007_v47 }
 0x7ea   :  { %7296 = vmatprep.subr.bf16.mxu0 %v7667_v16 }
 0x7ec   :  { %6315 = vmatmul.mubr.f32.vlgmr.msra.gmra.mrb[80].mxu0 %v4939_v33  ;;  %v7327_v33 = vpack.c.bf16 %v4963_v30, %v4962_v29 }
 0x7ed   :  { %6317 = vmatprep.mubr.msk.f32.mxu0 %vm7668_vm0, %v7669_v17  ;;  %7298 = vmatpush3.bf16.msra.mxu0 %v7297_v3 }
 0x7ee   :  { %7299 = vmatprep.subr.bf16.mxu0 %v7667_v16 }
 0x7f0   :  { %6318 = vmatmul.mubr.f32.gmra.mrb[82].mxu0 %v4940_v34  ;;  %v4965_v34 = vld [vmem:[%s9410_s4 + $0x178] sm:$0xff] }
 0x7f1   :  { %6320 = vmatprep.mubr.msk.f32.mxu0 %vm7668_vm0, %v7669_v17  ;;  %7301 = vmatpush3.bf16.msra.mxu0 %v7300_v5 }
 0x7f2   :  { %7302 = vmatprep.subr.bf16.mxu0 %v7667_v16 }
 0x7f4   :  { %6321 = vmatmul.mubr.f32.gmra.mrb[84].mxu0 %v4941_v35  ;;  %v7330_v35 = vpack.c.bf16 %v4965_v34, %v4964_v31 }
 0x7f5   :  { %6389 = vmatprep.mubr.msk.f32.mxu0 %vm7668_vm0, %v7669_v17 }
 0x89f   :  { %v1885_v44 = vpop.f32.mrb[74].mxu0 }
 0x8a0   :  { %v1899_v45 = vadd.f32 %v1885_v44, %v1718_v14  ;;  %v6275_v46 = vpop.f32.mrb[75].mxu0 }
 0x8a3   :  { %v1890_v48 = vpop.f32.mrb[76].mxu0 }
 0x8a4   :  { %v1900_v49 = vadd.f32 %v1890_v48, %v1719_v19  ;;  %v6278_v21 = vpop.f32.mrb[77].mxu0 }
 0x8a7   :  { %v1895_v50 = vpop.f32.mrb[78].mxu0 }
 0x8a8   :  { %v1901_v51 = vadd.f32 %v1895_v50, %v1720_v23  ;;  %v6281_v52 = vpop.f32.mrb[79].mxu0 }
 0x8bf   :  { %v1972_v53 = vpop.f32.mrb[80].mxu0 }
 0x8c0   :  { %v6316_v55 = vpop.f32.mrb[81].mxu0  ;;  %6332 = vmatmul.mubr.msk.f32.vlgmr.msra.gmra.mrb[60].mxu1 %vm456_vm1, %v1972_v53  ;;  %v4969_v53 = vld [vmem:[%s9409_s3 + $0x120] sm:$0xff] }
 0x8c1   :  { %7274 = vmatpush3.bf16.msra.mxu1 %v7951_v32  ;;  %6334 = vmatprep.mubr.msk.f32.mxu1 %vm7668_vm0, %v7669_v17  ;;  %v4970_v55 = vld [vmem:[%s9409_s3 + $0x128] sm:$0xff] }
 0x8c2   :  { %7275 = vmatprep.subr.bf16.mxu1 %v7667_v16 }
 0x8c3   :  { %v1977_v56 = vpop.f32.mrb[82].mxu0 }
 0x8c4   :  { %6335 = vmatmul.mubr.msk.f32.gmra.mrb[62].mxu1 %vm456_vm1, %v1977_v56  ;;  %v6319_v57 = vpop.f32.mrb[83].mxu0  ;;  %v4971_v56 = vld [vmem:[%s9409_s3 + $0x130] sm:$0x3] }
 0x8c5   :  { %7277 = vmatpush3.bf16.msra.mxu1 %v7959_v43  ;;  %6337 = vmatprep.mubr.msk.f32.mxu1 %vm7668_vm0, %v7669_v17  ;;  %v4972_v57 = vld [vmem:[%s9410_s4 + $0x180] sm:$0xff] }
 0x8c6   :  { %7278 = vmatprep.subr.bf16.mxu1 %v7667_v16 }
 0x8c7   :  { %v1982_v58 = vpop.f32.mrb[84].mxu0 }
 0x8c8   :  { %6338 = vmatmul.mubr.msk.f32.gmra.mrb[64].mxu1 %vm456_vm1, %v1982_v58  ;;  %v6322_v59 = vpop.f32.mrb[85].mxu0  ;;  %v4973_v58 = vld [vmem:[%s9410_s4 + $0x188] sm:$0xff] }
 0x8c9   :  { %7280 = vmatpush3.bf16.msra.mxu1 %v7967_v54  ;;  %6372 = vmatprep.mubr.msk.f32.mxu1 %vm7668_vm0, %v7669_v17  ;;  %v4974_v59 = vld [vmem:[%s9410_s4 + $0x190] sm:$0xff] }
 0x8ca   :  { %7281 = vmatprep.subr.bf16.mxu1 %v7667_v16 }
 0x8cd   :  { %7283 = vmatpush3.bf16.msra.mxu1 %v7975_v1 }
 0x8ce   :  { %7284 = vmatprep.subr.bf16.mxu1 %v7667_v16 }
 0x8d1   :  { %7286 = vmatpush3.bf16.msra.mxu1 %v7983_v12 }
 0x8d2   :  { %7287 = vmatprep.subr.bf16.mxu1 %v7667_v16 }
 0x8d5   :  { %7289 = vmatpush3.bf16.msra.mxu1 %v7991_v26 }
 0x8d6   :  { %7290 = vmatprep.subr.bf16.mxu1 %v7667_v16 }
 0x8d9   :  { %7292 = vmatpush3.bf16.msra.mxu1 %v7999_v38 }
 0x8da   :  { %7293 = vmatprep.subr.bf16.mxu1 %v7667_v16 }
 0x8dd   :  { %7295 = vmatpush3.bf16.msra.mxu1 %v8007_v47 }
 0x8de   :  { %7326 = vmatprep.subr.bf16.mxu1 %v7667_v16 }
 0x8e0   :  { %6373 = vmatmul.mubr.f32.vlgmr.msra.gmra.mrb[66].mxu1 %v4949_v60  ;;  %v7357_v60 = vpack.c.bf16 %v4973_v58, %v4972_v57 }
 0x8e1   :  { %6375 = vmatprep.mubr.msk.f32.mxu1 %vm7668_vm0, %v7669_v17  ;;  %7328 = vmatpush3.bf16.msra.mxu1 %v7327_v33 }
 0x8e2   :  { %7329 = vmatprep.subr.bf16.mxu1 %v7667_v16 }
 0x8e4   :  { %6376 = vmatmul.mubr.f32.gmra.mrb[68].mxu1 %v4950_v61  ;;  %v4975_v61 = vld [vmem:[%s9410_s4 + $0x198] sm:$0xff] }
 0x8e5   :  { %6378 = vmatprep.mubr.msk.f32.mxu1 %vm7668_vm0, %v7669_v17  ;;  %7331 = vmatpush3.bf16.msra.mxu1 %v7330_v35 }
 0x8e6   :  { %7332 = vmatprep.subr.bf16.mxu1 %v7667_v16 }
 0x8e8   :  { %6379 = vmatmul.mubr.f32.gmra.mrb[70].mxu1 %v4951_v62  ;;  %v7360_v62 = vpack.c.bf16 %v4975_v61, %v4974_v59 }
 0x8e9   :  { %6447 = vmatprep.mubr.msk.f32.mxu1 %vm7668_vm0, %v7669_v17 }
 0x993   :  { %v2066_v6 = vpop.f32.mrb[60].mxu1 }
 0x994   :  { %v2080_v7 = vadd.f32 %v2066_v6, %v1899_v45  ;;  %v6333_v8 = vpop.f32.mrb[61].mxu1 }
 0x997   :  { %v2071_v9 = vpop.f32.mrb[62].mxu1 }
 0x998   :  { %v2081_v10 = vadd.f32 %v2071_v9, %v1900_v49  ;;  %v6336_v11 = vpop.f32.mrb[63].mxu1 }
 0x99b   :  { %v2076_v13 = vpop.f32.mrb[64].mxu1 }
 0x99c   :  { %v2082_v14 = vadd.f32 %v2076_v13, %v1901_v51  ;;  %v6339_v15 = vpop.f32.mrb[65].mxu1 }
 0x9b3   :  { %v2153_v18 = vpop.f32.mrb[66].mxu1 }
 0x9b4   :  { %v6374_v19 = vpop.f32.mrb[67].mxu1  ;;  %6390 = vmatmul.mubr.msk.f32.vlgmr.msra.gmra.mrb[86].mxu0 %vm456_vm1, %v2153_v18  ;;  %v4979_v18 = vld [vmem:[%s9409_s3 + $0x138] sm:$0xff] }
 0x9b5   :  { %7304 = vmatpush3.bf16.msra.mxu0 %v7951_v32  ;;  %6392 = vmatprep.mubr.msk.f32.mxu0 %vm7668_vm0, %v7669_v17  ;;  %v4980_v19 = vld [vmem:[%s9409_s3 + $0x140] sm:$0xff] }
 0x9b6   :  { %7305 = vmatprep.subr.bf16.mxu0 %v7667_v16 }
 0x9b7   :  { %v2158_v20 = vpop.f32.mrb[68].mxu1 }
 0x9b8   :  { %6393 = vmatmul.mubr.msk.f32.gmra.mrb[88].mxu0 %vm456_vm1, %v2158_v20  ;;  %v6377_v22 = vpop.f32.mrb[69].mxu1  ;;  %v4981_v20 = vld [vmem:[%s9409_s3 + $0x148] sm:$0x3] }
 0x9b9   :  { %7307 = vmatpush3.bf16.msra.mxu0 %v7959_v43  ;;  %6395 = vmatprep.mubr.msk.f32.mxu0 %vm7668_vm0, %v7669_v17  ;;  %v4982_v22 = vld [vmem:[%s9410_s4 + $0x1a0] sm:$0xff] }
 0x9ba   :  { %7308 = vmatprep.subr.bf16.mxu0 %v7667_v16 }
 0x9bb   :  { %v2163_v23 = vpop.f32.mrb[70].mxu1 }
 0x9bc   :  { %6396 = vmatmul.mubr.msk.f32.gmra.mrb[90].mxu0 %vm456_vm1, %v2163_v23  ;;  %v6380_v24 = vpop.f32.mrb[71].mxu1  ;;  %v4983_v23 = vld [vmem:[%s9410_s4 + $0x1a8] sm:$0xff] }
 0x9bd   :  { %7310 = vmatpush3.bf16.msra.mxu0 %v7967_v54  ;;  %6430 = vmatprep.mubr.msk.f32.mxu0 %vm7668_vm0, %v7669_v17  ;;  %v4984_v24 = vld [vmem:[%s9410_s4 + $0x1b0] sm:$0xff] }
 0x9be   :  { %7311 = vmatprep.subr.bf16.mxu0 %v7667_v16 }
 0x9c1   :  { %7313 = vmatpush3.bf16.msra.mxu0 %v7975_v1 }
 0x9c2   :  { %7314 = vmatprep.subr.bf16.mxu0 %v7667_v16 }
 0x9c5   :  { %7316 = vmatpush3.bf16.msra.mxu0 %v7983_v12 }
 0x9c6   :  { %7317 = vmatprep.subr.bf16.mxu0 %v7667_v16 }
 0x9c9   :  { %7319 = vmatpush3.bf16.msra.mxu0 %v7991_v26 }
 0x9ca   :  { %7320 = vmatprep.subr.bf16.mxu0 %v7667_v16 }
 0x9cd   :  { %7322 = vmatpush3.bf16.msra.mxu0 %v7999_v38 }
 0x9ce   :  { %7323 = vmatprep.subr.bf16.mxu0 %v7667_v16 }
 0x9d1   :  { %7325 = vmatpush3.bf16.msra.mxu0 %v8007_v47 }
 0x9d2   :  { %7356 = vmatprep.subr.bf16.mxu0 %v7667_v16 }
 0x9d4   :  { %6431 = vmatmul.mubr.f32.vlgmr.msra.gmra.mrb[92].mxu0 %v4959_v25  ;;  %v7387_v25 = vpack.c.bf16 %v4983_v23, %v4982_v22 }
 0x9d5   :  { %6433 = vmatprep.mubr.msk.f32.mxu0 %vm7668_vm0, %v7669_v17  ;;  %7358 = vmatpush3.bf16.msra.mxu0 %v7357_v60 }
 0x9d6   :  { %7359 = vmatprep.subr.bf16.mxu0 %v7667_v16 }
 0x9d8   :  { %6434 = vmatmul.mubr.f32.gmra.mrb[94].mxu0 %v4960_v27  ;;  %v4985_v27 = vld [vmem:[%s9410_s4 + $0x1b8] sm:$0xff] }
 0x9d9   :  { %6436 = vmatprep.mubr.msk.f32.mxu0 %vm7668_vm0, %v7669_v17  ;;  %7361 = vmatpush3.bf16.msra.mxu0 %v7360_v62 }
 0x9da   :  { %7362 = vmatprep.subr.bf16.mxu0 %v7667_v16 }
 0x9dc   :  { %6437 = vmatmul.mubr.f32.gmra.mrb[96].mxu0 %v4961_v28  ;;  %v7390_v28 = vpack.c.bf16 %v4985_v27, %v4984_v24 }
 0x9dd   :  { %6505 = vmatprep.mubr.msk.f32.mxu0 %vm7668_vm0, %v7669_v17 }
 0xa87   :  { %v2247_v36 = vpop.f32.mrb[86].mxu0 }
 0xa88   :  { %v2261_v37 = vadd.f32 %v2247_v36, %v2080_v7  ;;  %v6391_v39 = vpop.f32.mrb[87].mxu0 }
 0xa8b   :  { %v2252_v40 = vpop.f32.mrb[88].mxu0 }
 0xa8c   :  { %v2262_v41 = vadd.f32 %v2252_v40, %v2081_v10  ;;  %v6394_v42 = vpop.f32.mrb[89].mxu0 }
 0xa8f   :  { %v2257_v44 = vpop.f32.mrb[90].mxu0 }
 0xa90   :  { %v2263_v45 = vadd.f32 %v2257_v44, %v2082_v14  ;;  %v6397_v46 = vpop.f32.mrb[91].mxu0 }
 0xaa7   :  { %v2334_v48 = vpop.f32.mrb[92].mxu0 }
 0xaa8   :  { %v6432_v49 = vpop.f32.mrb[93].mxu0  ;;  %6448 = vmatmul.mubr.msk.f32.vlgmr.msra.gmra.mrb[72].mxu1 %vm456_vm1, %v2334_v48  ;;  %v4989_v48 = vld [vmem:[%s9409_s3 + $0x150] sm:$0xff] }
 0xaa9   :  { %7334 = vmatpush3.bf16.msra.mxu1 %v7951_v32  ;;  %6450 = vmatprep.mubr.msk.f32.mxu1 %vm7668_vm0, %v7669_v17  ;;  %v4990_v49 = vld [vmem:[%s9409_s3 + $0x158] sm:$0xff] }
 0xaaa   :  { %7335 = vmatprep.subr.bf16.mxu1 %v7667_v16 }
 0xaab   :  { %v2339_v21 = vpop.f32.mrb[94].mxu0 }
 0xaac   :  { %6451 = vmatmul.mubr.msk.f32.gmra.mrb[74].mxu1 %vm456_vm1, %v2339_v21  ;;  %v6435_v50 = vpop.f32.mrb[95].mxu0  ;;  %v4991_v21 = vld [vmem:[%s9409_s3 + $0x160] sm:$0x3] }
 0xaad   :  { %7337 = vmatpush3.bf16.msra.mxu1 %v7959_v43  ;;  %6453 = vmatprep.mubr.msk.f32.mxu1 %vm7668_vm0, %v7669_v17  ;;  %v4992_v50 = vld [vmem:[%s9410_s4 + $0x1c0] sm:$0xff] }
 0xaae   :  { %7338 = vmatprep.subr.bf16.mxu1 %v7667_v16 }
 0xaaf   :  { %v2344_v51 = vpop.f32.mrb[96].mxu0 }
 0xab0   :  { %6454 = vmatmul.mubr.msk.f32.gmra.mrb[76].mxu1 %vm456_vm1, %v2344_v51  ;;  %v6438_v52 = vpop.f32.mrb[97].mxu0  ;;  %v4993_v51 = vld [vmem:[%s9410_s4 + $0x1c8] sm:$0xff] }
 0xab1   :  { %7340 = vmatpush3.bf16.msra.mxu1 %v7967_v54  ;;  %6488 = vmatprep.mubr.msk.f32.mxu1 %vm7668_vm0, %v7669_v17  ;;  %v4994_v52 = vld [vmem:[%s9410_s4 + $0x1d0] sm:$0xff] }
 0xab2   :  { %7341 = vmatprep.subr.bf16.mxu1 %v7667_v16 }
 0xab5   :  { %7343 = vmatpush3.bf16.msra.mxu1 %v7975_v1 }
 0xab6   :  { %7344 = vmatprep.subr.bf16.mxu1 %v7667_v16 }
 0xab9   :  { %7346 = vmatpush3.bf16.msra.mxu1 %v7983_v12 }
 0xaba   :  { %7347 = vmatprep.subr.bf16.mxu1 %v7667_v16 }
 0xabd   :  { %7349 = vmatpush3.bf16.msra.mxu1 %v7991_v26 }
 0xabe   :  { %7350 = vmatprep.subr.bf16.mxu1 %v7667_v16 }
 0xac1   :  { %7352 = vmatpush3.bf16.msra.mxu1 %v7999_v38 }
 0xac2   :  { %7353 = vmatprep.subr.bf16.mxu1 %v7667_v16 }
 0xac5   :  { %7355 = vmatpush3.bf16.msra.mxu1 %v8007_v47 }
 0xac6   :  { %7386 = vmatprep.subr.bf16.mxu1 %v7667_v16 }
 0xac8   :  { %6489 = vmatmul.mubr.f32.vlgmr.msra.gmra.mrb[78].mxu1 %v4969_v53  ;;  %v7417_v53 = vpack.c.bf16 %v4993_v51, %v4992_v50 }
 0xac9   :  { %6491 = vmatprep.mubr.msk.f32.mxu1 %vm7668_vm0, %v7669_v17  ;;  %7388 = vmatpush3.bf16.msra.mxu1 %v7387_v25 }
 0xaca   :  { %7389 = vmatprep.subr.bf16.mxu1 %v7667_v16 }
 0xacc   :  { %6492 = vmatmul.mubr.f32.gmra.mrb[80].mxu1 %v4970_v55  ;;  %v4995_v55 = vld [vmem:[%s9410_s4 + $0x1d8] sm:$0xff] }
 0xacd   :  { %6494 = vmatprep.mubr.msk.f32.mxu1 %vm7668_vm0, %v7669_v17  ;;  %7391 = vmatpush3.bf16.msra.mxu1 %v7390_v28 }
 0xace   :  { %7392 = vmatprep.subr.bf16.mxu1 %v7667_v16 }
 0xad0   :  { %6495 = vmatmul.mubr.f32.gmra.mrb[82].mxu1 %v4971_v56  ;;  %v7420_v56 = vpack.c.bf16 %v4995_v55, %v4994_v52 }
 0xad1   :  { %6563 = vmatprep.mubr.msk.f32.mxu1 %vm7668_vm0, %v7669_v17 }
 0xb7b   :  { %v2428_v63 = vpop.f32.mrb[72].mxu1 }
 0xb7c   :  { %v2442_v0 = vadd.f32 %v2428_v63, %v2261_v37  ;;  %v6449_v2 = vpop.f32.mrb[73].mxu1 }
 0xb7f   :  { %v2433_v3 = vpop.f32.mrb[74].mxu1 }
 0xb80   :  { %v2443_v4 = vadd.f32 %v2433_v3, %v2262_v41  ;;  %v6452_v5 = vpop.f32.mrb[75].mxu1 }
 0xb83   :  { %v2438_v6 = vpop.f32.mrb[76].mxu1 }
 0xb84   :  { %v2444_v7 = vadd.f32 %v2438_v6, %v2263_v45  ;;  %v6455_v8 = vpop.f32.mrb[77].mxu1 }
 0xb85   :  { %v5005_v8 = vld [vmem:[%s9410_s4 + $0x1f8] sm:$0xff] }
 0xb9b   :  { %v2515_v9 = vpop.f32.mrb[78].mxu1 }
 0xb9c   :  { %v6490_v10 = vpop.f32.mrb[79].mxu1  ;;  %6506 = vmatmul.mubr.msk.f32.vlgmr.msra.gmra.mrb[98].mxu0 %vm456_vm1, %v2515_v9 }
 0xb9d   :  { %7364 = vmatpush3.bf16.msra.mxu0 %v7951_v32  ;;  %6508 = vmatprep.mubr.msk.f32.mxu0 %vm7668_vm0, %v7669_v17 }
 0xb9e   :  { %7365 = vmatprep.subr.bf16.mxu0 %v7667_v16 }
 0xb9f   :  { %v2520_v11 = vpop.f32.mrb[80].mxu1 }
 0xba0   :  { %6509 = vmatmul.mubr.msk.f32.gmra.mrb[100].mxu0 %vm456_vm1, %v2520_v11  ;;  %v6493_v13 = vpop.f32.mrb[81].mxu1 }
 0xba1   :  { %7367 = vmatpush3.bf16.msra.mxu0 %v7959_v43  ;;  %6511 = vmatprep.mubr.msk.f32.mxu0 %vm7668_vm0, %v7669_v17 }
 0xba2   :  { %7368 = vmatprep.subr.bf16.mxu0 %v7667_v16 }
 0xba3   :  { %v2525_v14 = vpop.f32.mrb[82].mxu1 }
 0xba4   :  { %6512 = vmatmul.mubr.msk.f32.gmra.mrb[102].mxu0 %vm456_vm1, %v2525_v14  ;;  %v6496_v15 = vpop.f32.mrb[83].mxu1 }
 0xba5   :  { %7370 = vmatpush3.bf16.msra.mxu0 %v7967_v54  ;;  %6546 = vmatprep.mubr.msk.f32.mxu0 %vm7668_vm0, %v7669_v17 }
 0xba6   :  { %7371 = vmatprep.subr.bf16.mxu0 %v7667_v16 }
 0xba9   :  { %7373 = vmatpush3.bf16.msra.mxu0 %v7975_v1 }
 0xbaa   :  { %7374 = vmatprep.subr.bf16.mxu0 %v7667_v16 }
 0xbad   :  { %7376 = vmatpush3.bf16.msra.mxu0 %v7983_v12 }
 0xbae   :  { %7377 = vmatprep.subr.bf16.mxu0 %v7667_v16 }
 0xbb1   :  { %7379 = vmatpush3.bf16.msra.mxu0 %v7991_v26 }
 0xbb2   :  { %7380 = vmatprep.subr.bf16.mxu0 %v7667_v16 }
 0xbb5   :  { %7382 = vmatpush3.bf16.msra.mxu0 %v7999_v38 }
 0xbb6   :  { %7383 = vmatprep.subr.bf16.mxu0 %v7667_v16 }
 0xbb9   :  { %7385 = vmatpush3.bf16.msra.mxu0 %v8007_v47 }
 0xbba   :  { %7416 = vmatprep.subr.bf16.mxu0 %v7667_v16 }
 0xbbc   :  { %6547 = vmatmul.mubr.f32.vlgmr.msra.gmra.mrb[104].mxu0 %v4979_v18 }
 0xbbd   :  { %6549 = vmatprep.mubr.msk.f32.mxu0 %vm7668_vm0, %v7669_v17  ;;  %7418 = vmatpush3.bf16.msra.mxu0 %v7417_v53 }
 0xbbe   :  { %7419 = vmatprep.subr.bf16.mxu0 %v7667_v16 }
 0xbc0   :  { %6550 = vmatmul.mubr.f32.gmra.mrb[106].mxu0 %v4980_v19 }
 0xbc1   :  { %6552 = vmatprep.mubr.msk.f32.mxu0 %vm7668_vm0, %v7669_v17  ;;  %7421 = vmatpush3.bf16.msra.mxu0 %v7420_v56 }
 0xbc2   :  { %7422 = vmatprep.subr.bf16.mxu0 %v7667_v16 }
 0xbc4   :  { %6553 = vmatmul.mubr.f32.gmra.mrb[108].mxu0 %v4981_v20 }
 0xbc5   :  { %6621 = vmatprep.mubr.msk.f32.mxu0 %vm7668_vm0, %v7669_v17 }
 0xc6f   :  { %v2609_v29 = vpop.f32.mrb[98].mxu0 }
 0xc70   :  { %v2623_v30 = vadd.f32 %v2609_v29, %v2442_v0  ;;  %v6507_v31 = vpop.f32.mrb[99].mxu0 }
 0xc71   :  { %v5016_v31 = vld [vmem:[%s9413_s7 + $0x48] sm:$0xff] }
 0xc73   :  { %v2614_v33 = vpop.f32.mrb[100].mxu0 }
 0xc74   :  { %v2624_v34 = vadd.f32 %v2614_v33, %v2443_v4  ;;  %v6510_v35 = vpop.f32.mrb[101].mxu0 }
 0xc75   :  { %v5018_v35 = vld [vmem:[%s9413_s7 + $0x58] sm:$0xff] }
 0xc77   :  { %v2619_v36 = vpop.f32.mrb[102].mxu0 }
 0xc78   :  { %v2625_v37 = vadd.f32 %v2619_v36, %v2444_v7  ;;  %v6513_v39 = vpop.f32.mrb[103].mxu0 }
 0xc79   :  { %v5020_v39 = vld [vmem:[%s9413_s7 + $0x68] sm:$0xff] }
 0xc8f   :  { %v2696_v40 = vpop.f32.mrb[104].mxu0 }
 0xc90   :  { %v6548_v41 = vpop.f32.mrb[105].mxu0  ;;  %6564 = vmatmul.mubr.msk.f32.vlgmr.msra.gmra.mrb[84].mxu1 %vm456_vm1, %v2696_v40 }
 0xc91   :  { %7394 = vmatpush3.bf16.msra.mxu1 %v7951_v32  ;;  %6566 = vmatprep.mubr.msk.f32.mxu1 %vm7668_vm0, %v7669_v17  ;;  %v5021_v41 = vld [vmem:[%s9413_s7 + $0x70] sm:$0xff] }
 0xc92   :  { %7395 = vmatprep.subr.bf16.mxu1 %v7667_v16 }
 0xc93   :  { %v2701_v42 = vpop.f32.mrb[106].mxu0 }
 0xc94   :  { %6567 = vmatmul.mubr.msk.f32.gmra.mrb[86].mxu1 %vm456_vm1, %v2701_v42  ;;  %v6551_v44 = vpop.f32.mrb[107].mxu0  ;;  %v5022_v42 = vld [vmem:[%s9413_s7 + $0x78] sm:$0xff] }
 0xc95   :  { %7397 = vmatpush3.bf16.msra.mxu1 %v7959_v43  ;;  %6569 = vmatprep.mubr.msk.f32.mxu1 %vm7668_vm0, %v7669_v17  ;;  %v7468_v44 = vpack.c.bf16 %v5022_v42, %v5021_v41  ;;  %v5047_v41 = vld [vmem:[%s9413_s7 + $0xf8] sm:$0xff] }
 0xc96   :  { %7398 = vmatprep.subr.bf16.mxu1 %v7667_v16 }
 0xc97   :  { %v2706_v45 = vpop.f32.mrb[108].mxu0 }
 0xc98   :  { %6570 = vmatmul.mubr.msk.f32.gmra.mrb[88].mxu1 %vm456_vm1, %v2706_v45  ;;  %v6554_v46 = vpop.f32.mrb[109].mxu0 }
 0xc99   :  { %7400 = vmatpush3.bf16.msra.mxu1 %v7967_v54  ;;  %6604 = vmatprep.mubr.msk.f32.mxu1 %vm7668_vm0, %v7669_v17 }
 0xc9a   :  { %7401 = vmatprep.subr.bf16.mxu1 %v7667_v16 }
 0xc9d   :  { %7403 = vmatpush3.bf16.msra.mxu1 %v7975_v1 }
 0xc9e   :  { %7404 = vmatprep.subr.bf16.mxu1 %v7667_v16 }
 0xca1   :  { %7406 = vmatpush3.bf16.msra.mxu1 %v7983_v12 }
 0xca2   :  { %7407 = vmatprep.subr.bf16.mxu1 %v7667_v16 }
 0xca5   :  { %7409 = vmatpush3.bf16.msra.mxu1 %v7991_v26 }
 0xca6   :  { %7410 = vmatprep.subr.bf16.mxu1 %v7667_v16 }
 0xca9   :  { %7412 = vmatpush3.bf16.msra.mxu1 %v7999_v38 }
 0xcaa   :  { %7413 = vmatprep.subr.bf16.mxu1 %v7667_v16 }
 0xcad   :  { %7415 = vmatpush3.bf16.msra.mxu1 %v8007_v47 }
 0xcae   :  { %7446 = vmatprep.subr.bf16.mxu1 %v7667_v16 }
 0xcb0   :  { %6605 = vmatmul.mubr.f32.vlgmr.msra.gmra.mrb[90].mxu1 %v4989_v48 }
 0xcb1   :  { %6607 = vmatprep.mubr.msk.f32.mxu1 %vm7668_vm0, %v7669_v17 }
 0xcb4   :  { %6608 = vmatmul.mubr.f32.gmra.mrb[92].mxu1 %v4990_v49  ;;  %v5009_v49 = vld [vmem:[%s9411_s5] ss:$0 sm:$0xff] }
 0xcb5   :  { %6610 = vmatprep.mubr.msk.f32.mxu1 %vm7668_vm0, %v7669_v17 }
 0xcb8   :  { %6611 = vmatmul.mubr.f32.gmra.mrb[94].mxu1 %v4991_v21 }
 0xcb9   :  { %6679 = vmatprep.mubr.msk.f32.mxu1 %vm7668_vm0, %v7669_v17 }
 0xd63   :  { %v2790_v57 = vpop.f32.mrb[84].mxu1 }
 0xd64   :  { %v2804_v58 = vadd.f32 %v2790_v57, %v2623_v30  ;;  %v6565_v59 = vpop.f32.mrb[85].mxu1  ;;  %v5015_v30 = vld [vmem:[%s9413_s7 + $0x40] sm:$0xff] }
 0xd65   :  { %v7459_v33 = vpack.c.bf16 %v5016_v31, %v5015_v30  ;;  %v5043_v30 = vld [vmem:[%s9413_s7 + $0xd8] sm:$0xff] }
 0xd67   :  { %v2795_v60 = vpop.f32.mrb[86].mxu1 }
 0xd68   :  { %v2805_v61 = vadd.f32 %v2795_v60, %v2624_v34  ;;  %v6568_v62 = vpop.f32.mrb[87].mxu1  ;;  %v5017_v34 = vld [vmem:[%s9413_s7 + $0x50] sm:$0xff] }
 0xd69   :  { %v7462_v36 = vpack.c.bf16 %v5018_v35, %v5017_v34  ;;  %v5035_v34 = vld [vmem:[%s9413_s7 + $0xb8] sm:$0xff] }
 0xd6b   :  { %v2800_v63 = vpop.f32.mrb[88].mxu1 }
 0xd6c   :  { %v2806_v0 = vadd.f32 %v2800_v63, %v2625_v37  ;;  %v6571_v2 = vpop.f32.mrb[89].mxu1  ;;  %v5019_v37 = vld [vmem:[%s9413_s7 + $0x60] sm:$0xff] }
 0xd6d   :  { %v7465_v40 = vpack.c.bf16 %v5020_v39, %v5019_v37  ;;  %v3182_v63 = vld [vmem:[%s9412_s6] sm:$0x3]  ;;  %v3262_v2 = vld [vmem:[%s9413_s7 + $0x8] sm:$0xff] }
 0xd6e   :  { %v5045_v37 = vld [vmem:[%s9413_s7 + $0xe8] sm:$0xff] }
 0xd83   :  { %v2877_v3 = vpop.f32.mrb[90].mxu1 }
 0xd84   :  { %v6606_v4 = vpop.f32.mrb[91].mxu1  ;;  %6622 = vmatmul.mubr.msk.f32.vlgmr.msra.gmra.mrb[110].mxu0 %vm456_vm1, %v2877_v3  ;;  %v5012_v3 = vld [vmem:[%s9412_s6 + $0x2] sm:$0x3] }
 0xd85   :  { %7424 = vmatpush3.bf16.msra.mxu0 %v7951_v32  ;;  %6624 = vmatprep.mubr.msk.f32.mxu0 %vm7668_vm0, %v7669_v17 }
 0xd86   :  { %7425 = vmatprep.subr.bf16.mxu0 %v7667_v16 }
 0xd87   :  { %v2882_v5 = vpop.f32.mrb[92].mxu1 }
 0xd88   :  { %6625 = vmatmul.mubr.msk.f32.gmra.mrb[112].mxu0 %vm456_vm1, %v2882_v5  ;;  %v6609_v6 = vpop.f32.mrb[93].mxu1  ;;  %v3263_v5 = vld [vmem:[%s9413_s7 + $0x10] sm:$0xff] }
 0xd89   :  { %7427 = vmatpush3.bf16.msra.mxu0 %v7959_v43  ;;  %6627 = vmatprep.mubr.msk.f32.mxu0 %vm7668_vm0, %v7669_v17  ;;  %v4999_v43 = vld [vmem:[%s9409_s3 + $0x168] sm:$0xff]  ;;  %v3264_v6 = vld [vmem:[%s9413_s7 + $0x18] sm:$0xff] }
 0xd8a   :  { %7428 = vmatprep.subr.bf16.mxu0 %v7667_v16 }
 0xd8b   :  { %v2887_v7 = vpop.f32.mrb[94].mxu1 }
 0xd8c   :  { %6628 = vmatmul.mubr.msk.f32.gmra.mrb[114].mxu0 %vm456_vm1, %v2887_v7  ;;  %v6612_v32 = vpop.f32.mrb[95].mxu1  ;;  %v7474_v7 = vpack.c.bf16 %v3264_v6, %v3263_v5  ;;  %v5057_v5 = vld [vmem:[%s9413_s7 + $0x128] sm:$0xff] }
 0xd8d   :  { %7430 = vmatpush3.bf16.msra.mxu0 %v7967_v54  ;;  %6662 = vmatprep.mubr.msk.f32.mxu0 %vm7668_vm0, %v7669_v17  ;;  %v5000_v54 = vld [vmem:[%s9409_s3 + $0x170] sm:$0xff]  ;;  %v3265_v32 = vld [vmem:[%s9413_s7 + $0x20] sm:$0xff] }
 0xd8e   :  { %7431 = vmatprep.subr.bf16.mxu0 %v7667_v16 }
 0xd91   :  { %7433 = vmatpush3.bf16.msra.mxu0 %v7975_v1  ;;  %v5001_v1 = vld [vmem:[%s9409_s3 + $0x178] sm:$0x3] }
 0xd92   :  { %7434 = vmatprep.subr.bf16.mxu0 %v7667_v16 }
 0xd95   :  { %7436 = vmatpush3.bf16.msra.mxu0 %v7983_v12  ;;  %v5002_v12 = vld [vmem:[%s9410_s4 + $0x1e0] sm:$0xff] }
 0xd96   :  { %7437 = vmatprep.subr.bf16.mxu0 %v7667_v16 }
 0xd99   :  { %7439 = vmatpush3.bf16.msra.mxu0 %v7991_v26  ;;  %v5003_v26 = vld [vmem:[%s9410_s4 + $0x1e8] sm:$0xff] }
 0xd9a   :  { %7440 = vmatprep.subr.bf16.mxu0 %v7667_v16 }
 0xd9d   :  { %7442 = vmatpush3.bf16.msra.mxu0 %v7999_v38  ;;  %v5004_v38 = vld [vmem:[%s9410_s4 + $0x1f0] sm:$0xff] }
 0xd9e   :  { %7443 = vmatprep.subr.bf16.mxu0 %v7667_v16  ;;  %v7450_v9 = vpack.c.bf16 %v5005_v8, %v5004_v38  ;;  %v5028_v38 = vld [vmem:[%s9413_s7 + $0x80] sm:$0xff] }
 0xda1   :  { %7445 = vmatpush3.bf16.msra.mxu0 %v8007_v47  ;;  %v7447_v47 = vpack.c.bf16 %v5003_v26, %v5002_v12  ;;  %v3268_v12 = vld [vmem:[%s9413_s7 + $0x38] sm:$0xff] }
 0xda2   :  { %7458 = vmatprep.subr.bf16.mxu0 %v7667_v16 }
 0xda3   :  { %7448 = vmatpush3.bf16.msra.mxu1 %v7447_v47  ;;  %v5029_v47 = vld [vmem:[%s9413_s7 + $0x88] sm:$0xff] }
 0xda4   :  { %6663 = vmatmul.mubr.f32.vlgmr.msra.gmra.mrb[116].mxu0 %v4999_v43  ;;  %7449 = vmatprep.subr.bf16.mxu1 %v7667_v16  ;;  %v3266_v43 = vld [vmem:[%s9413_s7 + $0x28] sm:$0xff]  ;;  %v7486_v8 = vpack.c.bf16 %v5029_v47, %v5028_v38 }
 0xda5   :  { %6665 = vmatprep.mubr.msk.f32.mxu0 %vm7668_vm0, %v7669_v17  ;;  %7460 = vmatpush3.bf16.msra.mxu0 %v7459_v33  ;;  %v5034_v33 = vld [vmem:[%s9413_s7 + $0xb0] sm:$0xff]  ;;  %v5069_v38 = vld [vmem:[%s9413_s7 + $0x168] sm:$0xff] }
 0xda6   :  { %7461 = vmatprep.subr.bf16.mxu0 %v7667_v16  ;;  %v7495_v35 = vpack.c.bf16 %v5035_v34, %v5034_v33  ;;  %v5089_v33 = vld [vmem:[%s9413_s7 + $0x1c8] sm:$0xff] }
 0xda7   :  { %7451 = vmatpush3.bf16.msra.mxu1 %v7450_v9  ;;  %v5030_v9 = vld [vmem:[%s9413_s7 + $0x90] sm:$0xff] }
 0xda8   :  { %6666 = vmatmul.mubr.f32.gmra.mrb[118].mxu0 %v5000_v54  ;;  %7452 = vmatprep.subr.bf16.mxu1 %v7667_v16  ;;  %v7477_v54 = vpack.c.bf16 %v3266_v43, %v3265_v32  ;;  %v5067_v32 = vld [vmem:[%s9413_s7 + $0x158] sm:$0xff] }
 0xda9   :  { %6668 = vmatprep.mubr.msk.f32.mxu0 %vm7668_vm0, %v7669_v17  ;;  %7463 = vmatpush3.bf16.msra.mxu0 %v7462_v36  ;;  %v5044_v36 = vld [vmem:[%s9413_s7 + $0xe0] sm:$0xff] }
 0xdaa   :  { %7464 = vmatprep.subr.bf16.mxu0 %v7667_v16  ;;  %v7507_v39 = vpack.c.bf16 %v5045_v37, %v5044_v36 }
 0xdac   :  { %6669 = vmatmul.mubr.f32.gmra.mrb[120].mxu0 %v5001_v1  ;;  %v3267_v1 = vld [vmem:[%s9413_s7 + $0x30] sm:$0xff] }
 0xdad   :  { %6722 = vmatprep.mubr.msk.f32.mxu0 %vm7668_vm0, %v7669_v17  ;;  %7466 = vmatpush3.bf16.msra.mxu0 %v7465_v40  ;;  %v7480_v26 = vpack.c.bf16 %v3268_v12, %v3267_v1  ;;  %v5046_v40 = vld [vmem:[%s9413_s7 + $0xf0] sm:$0xff]  ;;  %v5059_v1 = vld [vmem:[%s9413_s7 + $0x138] sm:$0xff] }
 0xdae   :  { %7467 = vmatprep.subr.bf16.mxu0 %v7667_v16  ;;  %v7510_v42 = vpack.c.bf16 %v5047_v41, %v5046_v40  ;;  %v5081_v40 = vld [vmem:[%s9413_s7 + $0x1a8] sm:$0xff] }
 0xdb1   :  { %7469 = vmatpush3.bf16.msra.mxu0 %v7468_v44 }
 0xdb2   :  { %7482 = vmatprep.subr.bf16.mxu0 %v7667_v16 }
 0xe57   :  { %v2971_v10 = vpop.f32.mrb[110].mxu0 }
 0xe58   :  { %v2985_v11 = vadd.f32 %v2971_v10, %v2804_v58  ;;  %v6623_v13 = vpop.f32.mrb[111].mxu0  ;;  %v5031_v10 = vld [vmem:[%s9413_s7 + $0x98] sm:$0xff] }
 0xe5b   :  { %v2976_v14 = vpop.f32.mrb[112].mxu0 }
 0xe5c   :  { %v2986_v15 = vadd.f32 %v2976_v14, %v2805_v61  ;;  %v6626_v18 = vpop.f32.mrb[113].mxu0  ;;  %v7489_v14 = vpack.c.bf16 %v5031_v10, %v5030_v9  ;;  %v5071_v9 = vld [vmem:[%s9413_s7 + $0x178] sm:$0xff] }
 0xe5d   :  { %v5033_v18 = vld [vmem:[%s9413_s7 + $0xa8] sm:$0xff] }
 0xe5f   :  { %v2981_v19 = vpop.f32.mrb[114].mxu0 }
 0xe60   :  { %v2987_v20 = vadd.f32 %v2981_v19, %v2806_v0  ;;  %v6629_v22 = vpop.f32.mrb[115].mxu0  ;;  %v3261_v0 = vld [vmem:[%s9413_s7] sm:$0xff] }
 0xe61   :  { %v7471_v4 = vpack.c.bf16 %v3262_v2, %v3261_v0  ;;  %v5061_v0 = vld [vmem:[%s9412_s6 + $0xa] sm:$0x3] }
 0xe77   :  { %v3058_v23 = vpop.f32.mrb[116].mxu0 }
 0xe78   :  { %v6664_v24 = vpop.f32.mrb[117].mxu0  ;;  %6680 = vmatmul.mubr.msk.f32.vlgmr.msra.gmra.mrb[96].mxu1 %vm456_vm1, %v3058_v23  ;;  %v5025_v23 = vld [vmem:[%s9412_s6 + $0x4] sm:$0x3] }
 0xe79   :  { %6682 = vmatprep.mubr.msk.f32.mxu1 %vm7668_vm0, %v7669_v17  ;;  %v5040_v24 = vld [vmem:[%s9413_s7 + $0xc0] sm:$0xff] }
 0xe7b   :  { %v3063_v25 = vpop.f32.mrb[118].mxu0 }
 0xe7c   :  { %v6667_v27 = vpop.f32.mrb[119].mxu0  ;;  %6683 = vmatmul.mubr.msk.f32.gmra.mrb[98].mxu1 %vm456_vm1, %v3063_v25  ;;  %v5041_v25 = vld [vmem:[%s9413_s7 + $0xc8] sm:$0xff] }
 0xe7d   :  { %6685 = vmatprep.mubr.msk.f32.mxu1 %vm7668_vm0, %v7669_v17  ;;  %v5037_v27 = vld [vmem:[%s9412_s6 + $0x6] sm:$0x3] }
 0xe7f   :  { %v3068_v28 = vpop.f32.mrb[120].mxu0 }
 0xe80   :  { %6686 = vmatmul.mubr.msk.f32.gmra.mrb[100].mxu1 %vm456_vm1, %v3068_v28  ;;  %v6670_v29 = vpop.f32.mrb[121].mxu0  ;;  %v7501_v28 = vpack.c.bf16 %v5041_v25, %v5040_v24  ;;  %v5077_v24 = vld [vmem:[%s9413_s7 + $0x188] sm:$0xff] }
 0xe81   :  { %6694 = vmatprep.mubr.msk.f32.mxu1 %vm7668_vm0, %v7669_v17  ;;  %v5042_v29 = vld [vmem:[%s9413_s7 + $0xd0] sm:$0xff]  ;;  %v5073_v25 = vld [vmem:[%s9412_s6 + $0xc] sm:$0x3] }
 0xe82   :  { %v7504_v31 = vpack.c.bf16 %v5043_v30, %v5042_v29  ;;  %v5078_v29 = vld [vmem:[%s9413_s7 + $0x190] sm:$0xff]  ;;  %v5079_v30 = vld [vmem:[%s9413_s7 + $0x198] sm:$0xff] }
 0xe83   :  { %v7549_v36 = vpack.c.bf16 %v5079_v30, %v5078_v29 }
 0xf4b   :  { %v3152_v45 = vpop.f32.mrb[96].mxu1 }
 0xf4c   :  { %v3166_v46 = vadd.f32 %v3152_v45, %v2985_v11  ;;  %v6681_v48 = vpop.f32.mrb[97].mxu1 }
 0xf4e   :  { %v3176_v50 = vadd.f32 %v5009_v49, %v3166_v46 }
 0xf4f   :  { %v3157_v21 = vpop.f32.mrb[98].mxu1 }
 0xf50   :  { %v3167_v51 = vadd.f32 %v3157_v21, %v2986_v15  ;;  %v6684_v52 = vpop.f32.mrb[99].mxu1  ;;  %v3179_v56 = vmax.f32 %v3176_v50, 0.0  ;;  %v5032_v15 = vld [vmem:[%s9413_s7 + $0xa0] sm:$0xff] }
 0xf51   :  { %v5053_v52 = vld [vmem:[%s9413_s7 + $0x108] sm:$0xff] }
 0xf52   :  { %v3177_v53 = vadd.f32 %v5009_v49, %v3167_v51  ;;  %v5052_v51 = vld [vmem:[%s9413_s7 + $0x100] sm:$0xff] }
 0xf53   :  { %v3162_v55 = vpop.f32.mrb[100].mxu1 }
 0xf54   :  { %v3180_v57 = vmax.f32 %v3177_v53, 0.0  ;;  %v3168_v58 = vadd.f32 %v3162_v55, %v2987_v20  ;;  %v6687_v59 = vpop.f32.mrb[101].mxu1  ;;  %v7492_v20 = vpack.c.bf16 %v5033_v18, %v5032_v15  ;;  %v5049_v53 = vld [vmem:[%s9412_s6 + $0x8] sm:$0x3] }
 0xf55   :  { %v5064_v59 = vld [vmem:[%s9413_s7 + $0x140] sm:$0xff] }
 0xf56   :  { %v8879_v60 = vpack.c.bf16 %v3180_v57, %v3179_v56  ;;  %v3178_v61 = vadd.f32 %v5009_v49, %v3168_v58  ;;  %v7516_v56 = vpack.c.bf16 %v5053_v52, %v5052_v51  ;;  %v5054_v57 = vld [vmem:[%s9413_s7 + $0x110] sm:$0xff]  ;;  %v5055_v58 = vld [vmem:[%s9413_s7 + $0x118] sm:$0xff] }
 0xf57   :  { %v7519_v2 = vpack.c.bf16 %v5055_v58, %v5054_v57  ;;  %v5094_v52 = vld [vmem:[%s9413_s7 + $0x1f0] sm:$0xff] }
 0xf58   :  { %7454 = vmatpush3.bf16.msra.mxu1 %v8879_v60  ;;  %v8883_v62 = vmax.f32 %v3178_v61, 0.0  ;;  %v5065_v61 = vld [vmem:[%s9413_s7 + $0x148] sm:$0xff] }
 0xf59   :  { %6692 = vmatprep.subr.mxu1 %v7669_v17 }
 0xf5c   :  { %6693 = vmatpush3.msk.msra.mxu1 %vm3187_vm2, %v8883_v62 }
 0xf5d   :  { %7455 = vmatprep.subr.bf16.mxu1 %v7667_v16  ;;  %6695 = vmatmul.mubr.msk.f32.vlgmr.msra.gmra.mrb[102].mxu1 %vm3183_vm3, %v3182_v63 }
 0xf5e   :  { %7457 = vmatpush3.bf16.msra.mxu1 %v8879_v60  ;;  %6703 = vmatprep.mubr.msk.f32.mxu1 %vm7668_vm0, %v7669_v17 }
 0xf5f   :  { %6701 = vmatprep.subr.mxu1 %v7669_v17 }
 0xf62   :  { %6702 = vmatpush3.msk.msra.mxu1 %vm3187_vm2, %v8883_v62 }
 0xf63   :  { %6704 = vmatmul.mubr.msk.f32.vlgmr.msra.gmra.mrb[104].mxu1 %vm3183_vm3, %v5012_v3  ;;  %7470 = vmatprep.subr.bf16.mxu1 %v7667_v16  ;;  %v7531_v3 = vpack.c.bf16 %v5065_v61, %v5064_v59 }
 0xf64   :  { %7472 = vmatpush3.bf16.msra.mxu1 %v7471_v4  ;;  %6741 = vmatprep.mubr.msk.f32.mxu1 %vm7668_vm0, %v7669_v17  ;;  %v5056_v4 = vld [vmem:[%s9413_s7 + $0x120] sm:$0xff] }
 0xf65   :  { %7473 = vmatprep.subr.bf16.mxu1 %v7667_v16  ;;  %v7522_v6 = vpack.c.bf16 %v5057_v5, %v5056_v4  ;;  %v5101_v4 = vld [vmem:[%s9413_s7 + $0x208] sm:$0xff]  ;;  %v5097_v5 = vld [vmem:[%s9412_s6 + $0x10] sm:$0x3] }
 0xf68   :  { %7475 = vmatpush3.bf16.msra.mxu1 %v7474_v7  ;;  %v5066_v7 = vld [vmem:[%s9413_s7 + $0x150] sm:$0xff] }
 0xf69   :  { %7476 = vmatprep.subr.bf16.mxu1 %v7667_v16  ;;  %v7534_v43 = vpack.c.bf16 %v5067_v32, %v5066_v7  ;;  %v5102_v7 = vld [vmem:[%s9413_s7 + $0x210] sm:$0xff]  ;;  %v5103_v32 = vld [vmem:[%s9413_s7 + $0x218] sm:$0xff] }
 0xf6c   :  { %7478 = vmatpush3.bf16.msra.mxu1 %v7477_v54  ;;  %v5058_v54 = vld [vmem:[%s9413_s7 + $0x130] sm:$0xff] }
 0xf6d   :  { %7479 = vmatprep.subr.bf16.mxu1 %v7667_v16  ;;  %v7525_v12 = vpack.c.bf16 %v5059_v1, %v5058_v54  ;;  %v5104_v54 = vld [vmem:[%s9413_s7 + $0x220] sm:$0xff]  ;;  %v5105_v1 = vld [vmem:[%s9413_s7 + $0x228] sm:$0xff] }
 0xf70   :  { %7481 = vmatpush3.bf16.msra.mxu1 %v7480_v26  ;;  %v5068_v26 = vld [vmem:[%s9413_s7 + $0x160] sm:$0xff] }
 0xf71   :  { %7485 = vmatprep.subr.bf16.mxu1 %v7667_v16  ;;  %v7537_v47 = vpack.c.bf16 %v5069_v38, %v5068_v26  ;;  %v5107_v26 = vld [vmem:[%s9413_s7 + $0x238] sm:$0xff] }
0x1030   :  { %v3257_v11 = vpop.f32.mrb[102].mxu1 }
0x1031   :  { %v6696_v13 = vpop.f32.mrb[103].mxu1  ;;  %6742 = vmatmul.mubr.msk.f32.vlgmr.msra.gmra.mrb[106].mxu1 %vm3353_vm4, %v3257_v11 }
0x1032   :  { %7487 = vmatpush3.bf16.msra.mxu1 %v7486_v8  ;;  %6769 = vmatprep.mubr.msk.f32.mxu1 %vm7668_vm0, %v7669_v17  ;;  %v5070_v8 = vld [vmem:[%s9413_s7 + $0x170] sm:$0xff] }
0x1033   :  { %7488 = vmatprep.subr.bf16.mxu1 %v7667_v16  ;;  %v7540_v10 = vpack.c.bf16 %v5071_v9, %v5070_v8  ;;  %v4618_v8 = vld [vmem:[%s9416_s10 + $0x18] sm:$0xff] }
0x1036   :  { %v3340_v19 = vpop.f32.mrb[104].mxu1  ;;  %7490 = vmatpush3.bf16.msra.mxu1 %v7489_v14 }
0x1037   :  { %6723 = vmatmul.mubr.msk.f32.vlgmr.msra.gmra.mrb[122].mxu0 %vm3353_vm4, %v3340_v19  ;;  %v6705_v22 = vpop.f32.mrb[105].mxu1  ;;  %7491 = vmatprep.subr.bf16.mxu1 %v7667_v16 }
0x1038   :  { %7484 = vmatpush3.bf16.msra.mxu0 %v8879_v60  ;;  %6750 = vmatprep.mubr.msk.f32.mxu0 %vm7668_vm0, %v7669_v17 }
0x1039   :  { %6748 = vmatprep.subr.mxu0 %v7669_v17 }
0x103a   :  { %7493 = vmatpush3.bf16.msra.mxu1 %v7492_v20 }
0x103b   :  { %7494 = vmatprep.subr.bf16.mxu1 %v7667_v16 }
0x103c   :  { %6749 = vmatpush3.msk.msra.mxu0 %vm3187_vm2, %v8883_v62 }
0x103d   :  { %6751 = vmatmul.mubr.msk.f32.vlgmr.msra.gmra.mrb[124].mxu0 %vm3183_vm3, %v5025_v23  ;;  %7497 = vmatprep.subr.bf16.mxu0 %v7667_v16  ;;  %v5076_v23 = vld [vmem:[%s9413_s7 + $0x180] sm:$0xff] }
0x103e   :  { %7499 = vmatpush3.bf16.msra.mxu0 %v8879_v60  ;;  %6778 = vmatprep.mubr.msk.f32.mxu0 %vm7668_vm0, %v7669_v17 }
0x103f   :  { %6776 = vmatprep.subr.mxu0 %v7669_v17  ;;  %7496 = vmatpush3.bf16.msra.mxu1 %v7495_v35  ;;  %v5085_v35 = vld [vmem:[%s9412_s6 + $0xe] sm:$0x3] }
0x1040   :  { %7512 = vmatprep.subr.bf16.mxu1 %v7667_v16 }
0x1042   :  { %6777 = vmatpush3.msk.msra.mxu0 %vm3187_vm2, %v8883_v62 }
0x1043   :  { %6779 = vmatmul.mubr.msk.f32.vlgmr.msra.gmra.mrb[126].mxu0 %vm3183_vm3, %v5037_v27  ;;  %7500 = vmatprep.subr.bf16.mxu0 %v7667_v16 }
0x1044   :  { %7502 = vmatpush3.bf16.msra.mxu0 %v7501_v28  ;;  %6797 = vmatprep.mubr.msk.f32.mxu0 %vm7668_vm0, %v7669_v17  ;;  %v7546_v28 = vpack.c.bf16 %v5077_v24, %v5076_v23 }
0x1045   :  { %7503 = vmatprep.subr.bf16.mxu0 %v7667_v16 }
0x1048   :  { %7505 = vmatpush3.bf16.msra.mxu0 %v7504_v31  ;;  %v5088_v31 = vld [vmem:[%s9413_s7 + $0x1c0] sm:$0xff] }
0x1049   :  { %7506 = vmatprep.subr.bf16.mxu0 %v7667_v16  ;;  %v7561_v37 = vpack.c.bf16 %v5089_v33, %v5088_v31 }
0x104c   :  { %7508 = vmatpush3.bf16.msra.mxu0 %v7507_v39  ;;  %v5080_v39 = vld [vmem:[%s9413_s7 + $0x1a0] sm:$0xff] }
0x104d   :  { %7509 = vmatprep.subr.bf16.mxu0 %v7667_v16  ;;  %v7552_v41 = vpack.c.bf16 %v5081_v40, %v5080_v39  ;;  %v4628_v39 = vld [vmem:[%s9416_s10 + $0x68] sm:$0xff]  ;;  %v4630_v40 = vld [vmem:[%s9416_s10 + $0x78] sm:$0xff] }
0x1050   :  { %7511 = vmatpush3.bf16.msra.mxu0 %v7510_v42  ;;  %v5090_v42 = vld [vmem:[%s9413_s7 + $0x1d0] sm:$0xff] }
0x1051   :  { %7527 = vmatprep.subr.bf16.mxu0 %v7667_v16 }
0x1104   :  { %v3496_v44 = vpop.f32.mrb[106].mxu1 }
0x1105   :  { %v6743_v45 = vpop.f32.mrb[107].mxu1 }
0x110a   :  { %v3423_v46 = vpop.f32.mrb[122].mxu0 }
0x110b   :  { %v9017_v48 = vadd.f32 %v3496_v44, %v3423_v46  ;;  %v6724_v49 = vpop.f32.mrb[123].mxu0  ;;  %v5091_v44 = vld [vmem:[%s9413_s7 + $0x1d8] sm:$0xff]  ;;  %v5082_v46 = vld [vmem:[%s9413_s7 + $0x1b0] sm:$0xff] }
0x110c   :  { %v7564_v45 = vpack.c.bf16 %v5091_v44, %v5090_v42  ;;  %v4627_v42 = vld [vmem:[%s9416_s10 + $0x60] sm:$0xff]  ;;  %v4629_v44 = vld [vmem:[%s9416_s10 + $0x70] sm:$0xff] }
0x1110   :  { %v3571_v21 = vpop.f32.mrb[124].mxu0 }
0x1111   :  { %6770 = vmatmul.mubr.msk.f32.vlgmr.msra.gmra.mrb[108].mxu1 %vm3353_vm4, %v3571_v21  ;;  %v6752_v50 = vpop.f32.mrb[125].mxu0  ;;  %v5092_v21 = vld [vmem:[%s9413_s7 + $0x1e0] sm:$0xff] }
0x1112   :  { %7514 = vmatpush3.bf16.msra.mxu1 %v8879_v60  ;;  %6806 = vmatprep.mubr.msk.f32.mxu1 %vm7668_vm0, %v7669_v17  ;;  %v5093_v50 = vld [vmem:[%s9413_s7 + $0x1e8] sm:$0xff] }
0x1113   :  { %6804 = vmatprep.subr.mxu1 %v7669_v17  ;;  %v7567_v51 = vpack.c.bf16 %v5093_v50, %v5092_v21  ;;  %v4720_v50 = vld [vmem:[%s9418_s12 + $0x8] sm:$0xff] }
0x1116   :  { %6805 = vmatpush3.msk.msra.mxu1 %vm3187_vm2, %v8883_v62  ;;  %v3729_v55 = vpop.f32.mrb[126].mxu0 }
0x1117   :  { %6807 = vmatmul.mubr.msk.f32.vlgmr.msra.gmra.mrb[110].mxu1 %vm3183_vm3, %v5049_v53  ;;  %6798 = vmatmul.mubr.msk.f32.vlgmr.msra.gmra.mrb[128].mxu0 %vm3353_vm4, %v3729_v55  ;;  %v6780_v63 = vpop.f32.mrb[127].mxu0  ;;  %v5095_v53 = vld [vmem:[%s9413_s7 + $0x1f8] sm:$0xff] }
0x1118   :  { %7529 = vmatpush3.bf16.msra.mxu0 %v8879_v60  ;;  %6834 = vmatprep.mubr.msk.f32.mxu0 %vm7668_vm0, %v7669_v17  ;;  %v7570_v55 = vpack.c.bf16 %v5095_v53, %v5094_v52  ;;  %v4738_v52 = vld [vmem:[%s9418_s12 + $0x98] sm:$0xff] }
0x1119   :  { %6832 = vmatprep.subr.mxu0 %v7669_v17  ;;  %7515 = vmatprep.subr.bf16.mxu1 %v7667_v16 }
0x111a   :  { %7517 = vmatpush3.bf16.msra.mxu1 %v7516_v56  ;;  %6825 = vmatprep.mubr.msk.f32.mxu1 %vm7668_vm0, %v7669_v17 }
0x111b   :  { %7518 = vmatprep.subr.bf16.mxu1 %v7667_v16 }
0x111c   :  { %6833 = vmatpush3.msk.msra.mxu0 %vm3187_vm2, %v8883_v62 }
0x111d   :  { %6835 = vmatmul.mubr.msk.f32.vlgmr.msra.gmra.mrb[130].mxu0 %vm3183_vm3, %v5061_v0  ;;  %7530 = vmatprep.subr.bf16.mxu0 %v7667_v16 }
0x111e   :  { %7520 = vmatpush3.bf16.msra.mxu1 %v7519_v2  ;;  %7532 = vmatpush3.bf16.msra.mxu0 %v7531_v3  ;;  %v5100_v3 = vld [vmem:[%s9413_s7 + $0x200] sm:$0xff] }
0x111f   :  { %7521 = vmatprep.subr.bf16.mxu1 %v7667_v16  ;;  %7533 = vmatprep.subr.bf16.mxu0 %v7667_v16 }
0x1120   :  { %6853 = vmatprep.mubr.msk.f32.mxu0 %vm7668_vm0, %v7669_v17 }
0x1122   :  { %7523 = vmatpush3.bf16.msra.mxu1 %v7522_v6  ;;  %7535 = vmatpush3.bf16.msra.mxu0 %v7534_v43  ;;  %v7576_v6 = vpack.c.bf16 %v5101_v4, %v5100_v3  ;;  %v4741_v3 = vld [vmem:[%s9418_s12 + $0xb0] sm:$0xff]  ;;  %v4742_v4 = vld [vmem:[%s9418_s12 + $0xb8] sm:$0xff] }
0x1123   :  { %7524 = vmatprep.subr.bf16.mxu1 %v7667_v16  ;;  %7536 = vmatprep.subr.bf16.mxu0 %v7667_v16 }
0x1126   :  { %7526 = vmatpush3.bf16.msra.mxu1 %v7525_v12  ;;  %7538 = vmatpush3.bf16.msra.mxu0 %v7537_v47  ;;  %v7582_v12 = vpack.c.bf16 %v5105_v1, %v5104_v54  ;;  %v4616_v47 = vld [vmem:[%s9416_s10 + $0x8] sm:$0xff]  ;;  %v4727_v1 = vld [vmem:[%s9418_s12 + $0x40] sm:$0xff] }
0x1127   :  { %7542 = vmatprep.subr.bf16.mxu1 %v7667_v16  ;;  %7539 = vmatprep.subr.bf16.mxu0 %v7667_v16  ;;  %v7587_v9 = vpack.c.bf16 %v4618_v8, %v4616_v47  ;;  %v4729_v8 = vld [vmem:[%s9418_s12 + $0x50] sm:$0xff] }
0x112a   :  { %7541 = vmatpush3.bf16.msra.mxu0 %v7540_v10  ;;  %v4617_v10 = vld [vmem:[%s9416_s10 + $0x10] sm:$0xff] }
0x112b   :  { %7557 = vmatprep.subr.bf16.mxu0 %v7667_v16 }
0x11e4   :  { %v3653_v11 = vpop.f32.mrb[108].mxu1 }
0x11e5   :  { %v3657_v13 = vadd.f32 %v3653_v11, %v9017_v48  ;;  %v6771_v14 = vpop.f32.mrb[109].mxu1  ;;  %v5083_v48 = vld [vmem:[%s9413_s7 + $0x1b8] sm:$0xff]  ;;  %v4620_v11 = vld [vmem:[%s9416_s10 + $0x28] sm:$0xff] }
0x11e6   :  { %v7555_v49 = vpack.c.bf16 %v5083_v48, %v5082_v46  ;;  %v4735_v46 = vld [vmem:[%s9418_s12 + $0x80] sm:$0xff]  ;;  %v4736_v48 = vld [vmem:[%s9418_s12 + $0x88] sm:$0xff] }
0x11e7   :  { %v7603_v21 = vpack.c.bf16 %v4736_v48, %v4735_v46 }
0x11ea   :  { %v3887_v15 = vpop.f32.mrb[110].mxu1  ;;  %v3811_v18 = vpop.f32.mrb[128].mxu0 }
0x11eb   :  { %v9104_v19 = vadd.f32 %v3811_v18, %v3657_v13  ;;  %6826 = vmatmul.mubr.msk.f32.vlgmr.msra.gmra.mrb[112].mxu1 %vm3353_vm4, %v3887_v15  ;;  %v6799_v20 = vpop.f32.mrb[129].mxu0  ;;  %v6808_v22 = vpop.f32.mrb[111].mxu1  ;;  %v4622_v13 = vld [vmem:[%s9416_s10 + $0x38] sm:$0xff]  ;;  %v4619_v18 = vld [vmem:[%s9416_s10 + $0x20] sm:$0xff] }
0x11ec   :  { %7544 = vmatpush3.bf16.msra.mxu1 %v8879_v60  ;;  %6862 = vmatprep.mubr.msk.f32.mxu1 %vm7668_vm0, %v7669_v17  ;;  %v7591_v15 = vpack.c.bf16 %v4622_v13, %v4620_v11  ;;  %v4624_v20 = vld [vmem:[%s9416_s10 + $0x48] sm:$0xff]  ;;  %v4626_v22 = vld [vmem:[%s9416_s10 + $0x58] sm:$0xff] }
0x11ed   :  { %6860 = vmatprep.subr.mxu1 %v7669_v17  ;;  %v7595_v24 = vpack.c.bf16 %v4626_v22, %v4624_v20 }
0x11f0   :  { %6861 = vmatpush3.msk.msra.mxu1 %vm3187_vm2, %v8883_v62  ;;  %v4045_v27 = vpop.f32.mrb[130].mxu0 }
0x11f1   :  { %6863 = vmatmul.mubr.msk.f32.vlgmr.msra.gmra.mrb[114].mxu1 %vm3183_vm3, %v5073_v25  ;;  %6854 = vmatmul.mubr.msk.f32.vlgmr.msra.gmra.mrb[132].mxu0 %vm3353_vm4, %v4045_v27  ;;  %v6836_v34 = vpop.f32.mrb[131].mxu0 }
0x11f2   :  { %7559 = vmatpush3.bf16.msra.mxu0 %v8879_v60  ;;  %6890 = vmatprep.mubr.msk.f32.mxu0 %vm7668_vm0, %v7669_v17 }
0x11f3   :  { %6888 = vmatprep.subr.mxu0 %v7669_v17  ;;  %7545 = vmatprep.subr.bf16.mxu1 %v7667_v16 }
0x11f4   :  { %7547 = vmatpush3.bf16.msra.mxu1 %v7546_v28  ;;  %6881 = vmatprep.mubr.msk.f32.mxu1 %vm7668_vm0, %v7669_v17 }
0x11f5   :  { %7548 = vmatprep.subr.bf16.mxu1 %v7667_v16 }
0x11f6   :  { %6889 = vmatpush3.msk.msra.mxu0 %vm3187_vm2, %v8883_v62 }
0x11f7   :  { %6891 = vmatmul.mubr.msk.f32.vlgmr.msra.gmra.mrb[134].mxu0 %vm3183_vm3, %v5085_v35  ;;  %7560 = vmatprep.subr.bf16.mxu0 %v7667_v16  ;;  %v4623_v35 = vld [vmem:[%s9416_s10 + $0x40] sm:$0xff] }
0x11f8   :  { %7550 = vmatpush3.bf16.msra.mxu1 %v7549_v36  ;;  %7562 = vmatpush3.bf16.msra.mxu0 %v7561_v37  ;;  %v4625_v36 = vld [vmem:[%s9416_s10 + $0x50] sm:$0xff] }
0x11f9   :  { %7551 = vmatprep.subr.bf16.mxu1 %v7667_v16  ;;  %7563 = vmatprep.subr.bf16.mxu0 %v7667_v16  ;;  %v7597_v37 = vpack.c.bf16 %v4625_v36, %v4623_v35 }
0x11fa   :  { %6909 = vmatprep.mubr.msk.f32.mxu0 %vm7668_vm0, %v7669_v17 }
0x11fc   :  { %7553 = vmatpush3.bf16.msra.mxu1 %v7552_v41  ;;  %7565 = vmatpush3.bf16.msra.mxu0 %v7564_v45  ;;  %v7599_v41 = vpack.c.bf16 %v4630_v40, %v4628_v39  ;;  %v7601_v45 = vpack.c.bf16 %v4629_v44, %v4627_v42 }
0x11fd   :  { %7554 = vmatprep.subr.bf16.mxu1 %v7667_v16  ;;  %7566 = vmatprep.subr.bf16.mxu0 %v7667_v16 }
0x1200   :  { %7556 = vmatpush3.bf16.msra.mxu1 %v7555_v49  ;;  %7568 = vmatpush3.bf16.msra.mxu0 %v7567_v51  ;;  %v4719_v49 = vld [vmem:[%s9418_s12] sm:$0xff]  ;;  %v4737_v51 = vld [vmem:[%s9418_s12 + $0x90] sm:$0xff] }
0x1201   :  { %7572 = vmatprep.subr.bf16.mxu1 %v7667_v16  ;;  %7569 = vmatprep.subr.bf16.mxu0 %v7667_v16  ;;  %v7605_v53 = vpack.c.bf16 %v4720_v50, %v4719_v49 }
0x1204   :  { %7571 = vmatpush3.bf16.msra.mxu0 %v7570_v55  ;;  %v7607_v55 = vpack.c.bf16 %v4738_v52, %v4737_v51  ;;  %v5111_v51 = vld [vmem:[%s9419_s13] ss:$0 sm:$0xff] }
0x1205   :  { %7588 = vmatprep.subr.bf16.mxu0 %v7587_v9  ;;  %v4747_v9 = vld [vmem:[%s9418_s12 + $0xe0] sm:$0xff] }
0x12be   :  { %v3969_v56 = vpop.f32.mrb[112].mxu1 }
0x12bf   :  { %v3973_v57 = vadd.f32 %v3969_v56, %v9104_v19  ;;  %v6827_v58 = vpop.f32.mrb[113].mxu1  ;;  %v4621_v19 = vld [vmem:[%s9416_s10 + $0x30] sm:$0xff] }
0x12c0   :  { %v7593_v23 = vpack.c.bf16 %v4621_v19, %v4619_v18  ;;  %v4721_v56 = vld [vmem:[%s9418_s12 + $0x10] sm:$0xff]  ;;  %v4739_v58 = vld [vmem:[%s9418_s12 + $0xa0] sm:$0xff] }
0x12c4   :  { %v4203_v59 = vpop.f32.mrb[114].mxu1  ;;  %v4127_v61 = vpop.f32.mrb[132].mxu0 }
0x12c5   :  { %v4131_v63 = vadd.f32 %v4127_v61, %v3973_v57  ;;  %6882 = vmatmul.mubr.msk.f32.vlgmr.msra.gmra.mrb[116].mxu1 %vm3353_vm4, %v4203_v59  ;;  %v6855_v0 = vpop.f32.mrb[133].mxu0  ;;  %v6864_v2 = vpop.f32.mrb[115].mxu1  ;;  %v4722_v57 = vld [vmem:[%s9418_s12 + $0x18] sm:$0xff]  ;;  %v4740_v59 = vld [vmem:[%s9418_s12 + $0xa8] sm:$0xff] }
0x12c6   :  { %7574 = vmatpush3.bf16.msra.mxu1 %v8879_v60  ;;  %6918 = vmatprep.mubr.msk.f32.mxu1 %vm7668_vm0, %v7669_v17  ;;  %v7609_v61 = vpack.c.bf16 %v4722_v57, %v4721_v56  ;;  %v4723_v0 = vld [vmem:[%s9418_s12 + $0x20] sm:$0xff]  ;;  %v4724_v2 = vld [vmem:[%s9418_s12 + $0x28] sm:$0xff] }
0x12c7   :  { %6916 = vmatprep.subr.mxu1 %v7669_v17 }
0x12ca   :  { %6917 = vmatpush3.msk.msra.mxu1 %vm3187_vm2, %v8883_v62  ;;  %v4361_v60 = vpop.f32.mrb[134].mxu0  ;;  %v7579_v62 = vpack.c.bf16 %v5103_v32, %v5102_v7  ;;  %v4726_v7 = vld [vmem:[%s9418_s12 + $0x38] sm:$0xff]  ;;  %v4743_v32 = vld [vmem:[%s9418_s12 + $0xc0] sm:$0xff] }
0x12cb   :  { %6919 = vmatmul.mubr.msk.f32.vlgmr.msra.gmra.mrb[118].mxu1 %vm3183_vm3, %v5097_v5  ;;  %6910 = vmatmul.mubr.msk.f32.vlgmr.msra.gmra.mrb[136].mxu0 %vm3353_vm4, %v4361_v60  ;;  %v6892_v43 = vpop.f32.mrb[135].mxu0  ;;  %v7613_v5 = vpack.c.bf16 %v4724_v2, %v4723_v0  ;;  %v4725_v60 = vld [vmem:[%s9418_s12 + $0x30] sm:$0xff] }
0x12cc   :  { %7575 = vmatprep.subr.bf16.mxu1 %v7667_v16  ;;  %6937 = vmatprep.mubr.msk.f32.mxu1 %vm7668_vm0, %v7669_v17  ;;  %v4744_v43 = vld [vmem:[%s9418_s12 + $0xc8] sm:$0xff] }
0x12cd   :  { %7577 = vmatpush3.bf16.msra.mxu1 %v7576_v6  ;;  %4710 = vmatprep.mubr.f32.mxu0 %v7669_v17  ;;  %v5106_v17 = vld [vmem:[%s9413_s7 + $0x230] sm:$0xff]  ;;  %v7615_v6 = vpack.c.bf16 %v4742_v4, %v4741_v3  ;;  %v7619_v54 = vpack.c.bf16 %v4744_v43, %v4743_v32 }
0x12ce   :  { %7578 = vmatprep.subr.bf16.mxu1 %v7667_v16  ;;  %v7585_v38 = vpack.c.bf16 %v5107_v26, %v5106_v17  ;;  %v4745_v17 = vld [vmem:[%s9418_s12 + $0xd0] sm:$0xff]  ;;  %v4746_v26 = vld [vmem:[%s9418_s12 + $0xd8] sm:$0xff] }
0x12cf   :  { %v7623_v47 = vpack.c.bf16 %v4746_v26, %v4745_v17 }
0x12d1   :  { %7580 = vmatpush3.bf16.msra.mxu1 %v7579_v62  ;;  %v7617_v62 = vpack.c.bf16 %v4726_v7, %v4725_v60 }
0x12d2   :  { %7581 = vmatprep.subr.bf16.mxu1 %v7667_v16 }
0x12d5   :  { %7583 = vmatpush3.bf16.msra.mxu1 %v7582_v12  ;;  %v4728_v12 = vld [vmem:[%s9418_s12 + $0x48] sm:$0xff] }
0x12d6   :  { %7584 = vmatprep.subr.bf16.mxu1 %v7667_v16  ;;  %v4615_v16 = vld [vmem:[%s9416_s10] sm:$0xff] }
0x12d7   :  { %v7589_v14 = vpack.c.bf16 %v4617_v10, %v4615_v16  ;;  %v4730_v16 = vld [vmem:[%s9418_s12 + $0x58] sm:$0xff]  ;;  %v4748_v10 = vld [vmem:[%s9418_s12 + $0xe8] sm:$0xff] }
0x12d8   :  { %v7625_v11 = vpack.c.bf16 %v4730_v16, %v4729_v8  ;;  %v7627_v13 = vpack.c.bf16 %v4748_v10, %v4747_v9 }
0x12d9   :  { %7586 = vmatpush3.bf16.msra.mxu1 %v7585_v38  ;;  %7590 = vmatpush1.bf16.msra.mxu0 %v7589_v14  ;;  %v7621_v38 = vpack.c.bf16 %v4728_v12, %v4727_v1 }
0x12da   :  { %7592 = vmatprep.subr.bf16.mxu0 %v7591_v15  ;;  %7604 = vmatprep.subr.bf16.mxu1 %v7603_v21  ;;  %v5109_v15 = vld [vmem:[%s9414_s8] ss:$0 sm:$0xff] }
0x12dd   :  { %7594 = vmatpush1.bf16.msra.mxu0 %v7593_v23  ;;  %v4731_v23 = vld [vmem:[%s9418_s12 + $0x60] sm:$0xff] }
0x12de   :  { %7596 = vmatprep.subr.bf16.mxu0 %v7595_v24  ;;  %v4732_v24 = vld [vmem:[%s9418_s12 + $0x68] sm:$0xff] }
0x12e1   :  { %7598 = vmatpush1.bf16.msra.mxu0 %v7597_v37  ;;  %v4631_v37 = vld [vmem:[%s9417_s11] sm:$0x3]  ;;  %s7670_s11 = smov [#allocation2]  }
0x12e2   :  { %7600 = vmatprep.subr.bf16.mxu0 %v7599_v41  ;;  %s4847_s20 = sshll.u32 %s7670_s11, 4  ;;  %s4848_s20 = int_to_ptr.vmem [resolvable:$true] %s4847_s20 }
0x12e3   :  { %s7643_s13 = scalar_lea.vmem %s4848_s20, 32  ;;  %p7648_p1 = scmp.lt.s32.totalorder %s4848_s20, %s4848_s20 }
0x12e4   :  { %p7644_p0 = scmp.ne.s32.totalorder %s4848_s20, %s7643_s13  ;;  %p7649_p2 = scmp.lt.s32.totalorder %s7643_s13, %s7643_s13 }
0x12e5   :  { %7602 = vmatpush1.bf16.msra.mxu0 %v7601_v45 }
0x12e6   :  { %p7650_p3 = por %p7649_p2, %p7648_p1 }
0x12e8   :  { %p7651_p4 = pnand %p7650_p3, %p7644_p0 }
0x1398   :  { %v4285_v25 = vpop.f32.mrb[116].mxu1 }
0x1399   :  { %v4289_v27 = vadd.f32 %v4285_v25, %v4131_v63  ;;  %v6883_v28 = vpop.f32.mrb[117].mxu1  ;;  %v7611_v63 = vpack.c.bf16 %v4740_v59, %v4739_v58  ;;  %v7629_v25 = vpack.c.bf16 %v4732_v24, %v4731_v23 }
0x139a   :  { %v4750_v28 = vld [vmem:[%s9418_s12 + $0xf8] sm:$0xff] }
0x139e   :  { %v4519_v29 = vpop.f32.mrb[118].mxu1  ;;  %v4443_v30 = vpop.f32.mrb[136].mxu0 }
0x139f   :  { %v9263_v31 = vadd.f32 %v4443_v30, %v4289_v27  ;;  %6938 = vmatmul.mubr.msk.f32.vlgmr.msra.gmra.mrb[120].mxu1 %vm3353_vm4, %v4519_v29  ;;  %v6920_v33 = vpop.f32.mrb[119].mxu1  ;;  %v6911_v34 = vpop.f32.mrb[137].mxu0  ;;  %v4749_v27 = vld [vmem:[%s9418_s12 + $0xf0] sm:$0xff] }
0x13a0   :  { %7606 = vmatpush3.bf16.msra.mxu1 %v7605_v53  ;;  %v7631_v29 = vpack.c.bf16 %v4750_v28, %v4749_v27  ;;  %v4733_v30 = vld [vmem:[%s9418_s12 + $0x70] sm:$0xff]  ;;  %v4633_v34 = vlaneseq }
0x13a1   :  { %7608 = vmatprep.subr.bf16.mxu1 %v7607_v55 }
0x13a2   :  { %v4634_v35 = vshrl.u32 %v4633_v34, 7 }
0x13a4   :  { %7610 = vmatpush3.bf16.msra.mxu1 %v7609_v61  ;;  %v4635_v36 = vsub.s32 0, %v4634_v35  ;;  %v4639_v39 = vsub.s32 1, %v4634_v35 }
0x13a5   :  { %7612 = vmatprep.subr.bf16.mxu1 %v7611_v63 }
0x13a6   :  { %v4636_v40 = vrot.slane %v4631_v37, %v4635_v36  ;;  %v4640_v41 = vrot.slane %v4631_v37, %v4639_v39 }
0x13a8   :  { %7614 = vmatpush3.bf16.msra.mxu1 %v7613_v5 }
0x13a9   :  { %7616 = vmatprep.subr.bf16.mxu1 %v7615_v6 }
0x13ac   :  { %7618 = vmatpush3.bf16.msra.mxu1 %v7617_v62 }
0x13ad   :  { %7620 = vmatprep.subr.bf16.mxu1 %v7619_v54 }
0x13b0   :  { %7622 = vmatpush3.bf16.msra.mxu1 %v7621_v38 }
0x13b1   :  { %7624 = vmatprep.subr.bf16.mxu1 %v7623_v47 }
0x13b4   :  { %7626 = vmatpush3.bf16.msra.mxu1 %v7625_v11 }
0x13b5   :  { %7628 = vmatprep.subr.bf16.mxu1 %v7627_v13 }
0x13b8   :  { %7630 = vmatpush3.bf16.msra.mxu1 %v7629_v25 }
0x13b9   :  { %7632 = vmatprep.subr.bf16.mxu1 %v7631_v29 }
0x1472   :  { %v4601_v14 = vpop.f32.mrb[120].mxu1 }
0x1473   :  { %v4605_v18 = vadd.f32 %v4601_v14, %v9263_v31  ;;  %v6939_v19 = vpop.f32.mrb[121].mxu1  ;;  %v4734_v31 = vld [vmem:[%s9418_s12 + $0x78] sm:$0xff] }
0x1474   :  { %v7633_v33 = vpack.c.bf16 %v4734_v31, %v4733_v30 }
0x1475   :  { %v4613_v20 = vadd.f32 %v5109_v15, %v4605_v18 }
0x1476   :  { %7634 = vmatpush3.bf16.msra.mxu1 %v7633_v33 }
0x1477   :  { %v4614_v22 = vmax.f32 %v4613_v20, 0.0 }
0x1479   :  { %5110 = vmatmul.mubr.msk.f32.vlgmr.msra.gmra.mrb[138].mxu0 %vm3353_vm4, %v4614_v22 }
0x154c   :  { %v4712_v42 = vpop.f32.mrb[138].mxu0 }
0x154d   :  { %v4713_v44 = vadd.f32 %v4712_v42, %v4636_v40  ;;  %v4714_v45 = vpop.f32.mrb[139].mxu0 }
0x154e   :  { %v4715_v46 = vadd.f32 %v4714_v45, %v4640_v41 }
0x154f   :  { %v4717_v49 = vmax.f32 %v4713_v44, 0.0 }
0x1550   :  { %v4718_v48 = vmax.f32 %v4715_v46, 0.0 }
0x1552   :  { %4822 = vmatprep.mubr.f32.mxu1 %v4718_v48 }
0x1553   :  { %4823 = vmatmul.mubr.f32.vlgmr.msra.gmra.mrb[122].mxu1 %v4717_v49 }
0x1626   :  { %v5757_v21 = vpop.f32.mrb[122].mxu1 }
0x1627   :  { %v5758_v50 = vpop.f32.mrb[123].mxu1 }
0x1628   :  { %v5759_v52 = vadd.f32 %v5758_v50, %v5757_v21 }
0x162a   :  { %v4825_v53 = vadd.f32 %v5759_v52, %v5111_v51 }
0x162c   :  { %v4829_v55 = vsel %vm4828_vm5, %v4825_v53, -inf }
0x162d   :  { %4830 = vmax.xlane.f32.xlu0 %v4829_v55 }
0x16ba   :  { %v4831_v56 = vpop.xlane.xlu0 %4830 }
0x16bb   :  { %v4832_v57 = vsub.f32 %v4825_v53, %v4831_v56 }
0x16bd   :  { %v4833_v58 = vmul.f32 1.442695, %v4832_v57 }
0x16bf   :  { %7639 = vpow2.f32 %v4833_v58 }
0x16c9   :  { %v7640_v59 = vpop.eup %7639 }
0x16ca   :  { %v4835_v61 = vsel %vm4828_vm5, %v7640_v59, 0.0 }
0x16cb   :  { %4836 = vadd.xlane.f32.xlu0 %v4835_v61 }
0x1758   :  { %v4837_v63 = vpop.xlane.xlu0 %4836 }
0x1759   :  { %7641 = vrcp.f32 %v4837_v63 }
0x1763   :  { %v7642_v0 = vpop.eup %7641 }
0x1764   :  { %v4839_v2 = vmul.f32 %v7642_v0, %v7640_v59 }
0x1766   :  { %4840 = vst.msk [vmem:[#allocation2] sm:$0x3] %vm4828_vm5, %v4839_v2 }
0x1767   :  { %7654 = shalt.err (!%p7651_p4)
}
0x1768   :  { %s7655_s21 = scalar_lea.hbm %s9420_s14, 32 }
0x1769   :  { %p7656_p5 = scmp.ne.s32.totalorder %s9420_s14, %s7655_s21  ;;  %p7659_p6 = scmp.lt.u32.totalorder %s7655_s21, %s9420_s14 }
0x176b   :  { %p7661_p7 = pnand %p7659_p6, %p7656_p5 }
0x176d   :  { %7664 = shalt.err (!%p7661_p7)
}
0x176e   :  { %4850 = dma.vmem_to_hbm [thread:$0]  %s4848_s20, 32, %s9420_s14, [#allocation3]  }
0x176f   :  { %7665 = dma.done.wait [#allocation3], 32  }
0x1770   :  { %7666 = vsyncadd [#allocation3], 4294967264 }
0x1771   :  { %4854 = vsyncpa [#allocation3], 1 }

</bundles_post_ra>
